<compile_context>
chip_gen: v7x
topology: tpu7x:2x2x1
jax: 0.10.0
libtpu: 0.0.40
codegen_flags: <defaults>
</compile_context>

<pallas_src>
import functools
import math

import jax
import jax.numpy as jnp
from jax.experimental import pallas as pl
from jax.experimental.pallas import tpu as pltpu

# ----------------------------- configuration ------------------------------
VOCAB_SIZE = 128
HIDDEN = 64
NUM_LAYERS = 2
NUM_HEADS = 4
HEAD_DIM = HIDDEN // NUM_HEADS
WINDOW_SIZE = 8
INTERMEDIATE = 4 * HIDDEN
MAX_POS = 64
BATCH = 2
SEQ = 16


# ------------------------------ helpers ------------------------------------
def _layernorm(x, g, b, eps=1e-5):
    mu = jnp.mean(x, axis=-1, keepdims=True)
    var = jnp.mean(jnp.square(x - mu), axis=-1, keepdims=True)
    return (x - mu) * jax.lax.rsqrt(var + eps) * g + b


def _const_spec(shape):
    zeros = (0,) * len(shape)
    return pl.BlockSpec(shape, lambda l: zeros)


def _layer_spec(stacked_shape):
    rest = tuple(int(d) for d in stacked_shape[1:])
    rest_zeros = (0,) * len(rest)
    return pl.BlockSpec((None,) + rest, lambda l: (l,) + rest_zeros)


# ------------------------------ fused kernel --------------------------------
def _fused_forward_kernel(
    # layer-invariant inputs
    ids_ref, mask_ref, tok_emb_ref, pos_emb_ref,
    emb_g_ref, emb_b_ref, fin_g_ref, fin_b_ref, lm_w_ref,
    # per-layer inputs (stacked [L, ...]; layer dim squeezed by BlockSpec)
    wq_ref, bq_ref, wk_ref, bk_ref, wv_ref, bv_ref,
    wo_ref, bo_ref, ln1_g_ref, ln1_b_ref,
    w1_ref, b1_ref, w2_ref, b2_ref, ln2_g_ref, ln2_b_ref,
    # outputs
    hidden_ref, logits_ref,
    # scratch (persists across grid steps)
    x_scr, bias_scr,
    *, batch, seq, heads, head_dim, window, vocab, hidden,
):
    layer = pl.program_id(0)
    m = batch * seq
    nb = heads * batch

    # ---------------- layer 0: embedding + LN + attention-bias build --------
    @pl.when(layer == 0)
    def _embed():
        ids = ids_ref[...]                                           # [M,1] i32
        vocab_iota = jax.lax.broadcasted_iota(jnp.int32, (m, vocab), 1)
        onehot = (vocab_iota == ids).astype(jnp.float32)             # [M,V]
        # exact f32 "gather" of the VMEM-resident token table via one-hot GEMM
        tok = jnp.dot(onehot, tok_emb_ref[...],
                      preferred_element_type=jnp.float32)            # [M,H]
        pos = jnp.concatenate([pos_emb_ref[...]] * batch, axis=0)    # [M,H]
        x_scr[...] = _layernorm(tok + pos, emb_g_ref[...], emb_b_ref[...])
        # TODO(synk): frequency-stat / context-modulation Hebbian embedding
        #             updates (update_model=True) skipped.

        # causal sliding-window + key-padding bias, built ONCE and reused
        qi = jax.lax.broadcasted_iota(jnp.int32, (seq, seq), 0)
        kj = jax.lax.broadcasted_iota(jnp.int32, (seq, seq), 1)
        local = (kj <= qi) & (kj > qi - window)                      # [S,S]
        key_ok = mask_ref[...] > 0.0                                 # [B,S]
        keep = local[None, :, :] & key_ok[:, None, :]                # [B,S,S]
        bias_scr[...] = jnp.where(keep, 0.0, -1e9).astype(jnp.float32)

    # ---------------- transformer layer (every grid step) -------------------
    x = x_scr[...]                                                   # [M,H] f32
    xb = x.astype(jnp.bfloat16)

    def project(w_ref, b_ref):
        # per-head GEMMs (weights pre-split per head on host): no in-kernel
        # lane slicing; stack head-major along the leading (batch-like) dim.
        parts = []
        for h in range(heads):
            y = jnp.dot(xb, w_ref[h], preferred_element_type=jnp.float32)
            y = y + b_ref[h]                                         # [M,HD]
            parts.append(y.reshape(batch, seq, head_dim))
        return jnp.concatenate(parts, axis=0).astype(jnp.bfloat16)   # [NH*B,S,HD]

    q = project(wq_ref, bq_ref)          # 1/sqrt(head_dim) pre-folded into wq/bq
    k = project(wk_ref, bk_ref)
    v = project(wv_ref, bv_ref)

    bias = jnp.concatenate([bias_scr[...]] * heads, axis=0)          # [NH*B,S,S]

    # batched attention over all (head, batch) pairs; no explicit k transpose
    s = jnp.einsum('bqd,bkd->bqk', q, k,
                   preferred_element_type=jnp.float32) + bias        # [NH*B,S,S]
    mx = jnp.max(s, axis=-1, keepdims=True)
    p = jnp.exp(s - mx)
    denom = jnp.sum(p, axis=-1, keepdims=True)
    p = (p * pl.reciprocal(denom, approx=True)).astype(jnp.bfloat16)
    o = jnp.einsum('bqk,bkd->bqd', p, v,
                   preferred_element_type=jnp.float32)               # [NH*B,S,HD]

    # output projection as a sum of per-head GEMMs (avoids lane-concat merge)
    acc = None
    for h in range(heads):
        o_h = o[h * batch:(h + 1) * batch].reshape(m, head_dim).astype(jnp.bfloat16)
        d = jnp.dot(o_h, wo_ref[h], preferred_element_type=jnp.float32)
        acc = d if acc is None else acc + d
    attn = acc + bo_ref[...]

    x1 = _layernorm(x + attn, ln1_g_ref[...], ln1_b_ref[...])

    # FeedForward with (pre-combined slow+fast) weights + residual + LN
    h1 = jnp.dot(x1.astype(jnp.bfloat16), w1_ref[...],
                 preferred_element_type=jnp.float32) + b1_ref[...]
    h1 = jax.nn.gelu(h1)  # TODO(synk): tanh approx; PyTorch nn.GELU is exact erf
    ffn = jnp.dot(h1.astype(jnp.bfloat16), w2_ref[...],
                  preferred_element_type=jnp.float32) + b2_ref[...]
    x2 = _layernorm(x1 + ffn, ln2_g_ref[...], ln2_b_ref[...])
    x_scr[...] = x2
    # TODO(synk): Hebbian fast-weight update (update_weights=True path) skipped.

    # ---------------- last layer: final LayerNorm + tied lm_head ------------
    @pl.when(layer == pl.num_programs(0) - 1)
    def _final():
        hn = _layernorm(x2, fin_g_ref[...], fin_b_ref[...])
        hidden_ref[...] = hn.astype(hidden_ref.dtype)
        logits_ref[...] = jnp.dot(hn.astype(jnp.bfloat16), lm_w_ref[...],
                                  preferred_element_type=jnp.float32)


# ----------------------------- parameter setup -----------------------------
def init_params(key):
    def nrm(k, shape, std=0.02):
        return std * jax.random.normal(k, shape, jnp.float32)

    keys = jax.random.split(key, 2 + NUM_LAYERS)
    params = {
        # lm_head tied to token_emb; both N(0, 0.02) as in _init_weights
        "token_emb": nrm(keys[0], (VOCAB_SIZE, HIDDEN)),
        "pos_emb": nrm(keys[1], (MAX_POS, HIDDEN)),
        "emb_ln_g": jnp.ones((HIDDEN,), jnp.float32),
        "emb_ln_b": jnp.zeros((HIDDEN,), jnp.float32),
        "final_ln_g": jnp.ones((HIDDEN,), jnp.float32),
        "final_ln_b": jnp.zeros((HIDDEN,), jnp.float32),
        "layers": [],
    }
    for li in range(NUM_LAYERS):
        k = jax.random.split(keys[2 + li], 6)
        params["layers"].append({
            "wq": nrm(k[0], (HIDDEN, HIDDEN)), "bq": jnp.zeros((HIDDEN,), jnp.float32),
            "wk": nrm(k[1], (HIDDEN, HIDDEN)), "bk": jnp.zeros((HIDDEN,), jnp.float32),
            "wv": nrm(k[2], (HIDDEN, HIDDEN)), "bv": jnp.zeros((HIDDEN,), jnp.float32),
            "wo": nrm(k[3], (HIDDEN, HIDDEN)), "bo": jnp.zeros((HIDDEN,), jnp.float32),
            "attn_ln_g": jnp.ones((HIDDEN,), jnp.float32),
            "attn_ln_b": jnp.zeros((HIDDEN,), jnp.float32),
            "w1": nrm(k[4], (HIDDEN, INTERMEDIATE)),
            "b1": jnp.zeros((INTERMEDIATE,), jnp.float32),
            "w2": nrm(k[5], (INTERMEDIATE, HIDDEN)),
            "b2": jnp.zeros((HIDDEN,), jnp.float32),
            # Hebbian fast weights: zero-init, only change when update_model=True
            "w1_fast": jnp.zeros((HIDDEN, INTERMEDIATE), jnp.float32),
            "w2_fast": jnp.zeros((INTERMEDIATE, HIDDEN), jnp.float32),
            "ffn_ln_g": jnp.ones((HIDDEN,), jnp.float32),
            "ffn_ln_b": jnp.zeros((HIDDEN,), jnp.float32),
        })
    return params


def prepare_params(params):
    """One-time host-side preprocessing: per-head weight splits, 1/sqrt(d)
    scale folding, fast-weight folding, bf16 casts for MXU operands, tied
    lm_head transpose, and stacking of per-layer weights into [L, ...]."""
    H, NH, HD = HIDDEN, NUM_HEADS, HEAD_DIM
    scale = 1.0 / math.sqrt(HD)
    r2 = lambda v: v.reshape(1, -1).astype(jnp.float32)

    acc = {k: [] for k in ("wq", "bq", "wk", "bk", "wv", "bv", "wo", "bo",
                           "ln1_g", "ln1_b", "w1", "b1", "w2", "b2",
                           "ln2_g", "ln2_b")}
    for lp in params["layers"]:
        acc["wq"].append((lp["wq"] * scale).reshape(H, NH, HD)
                         .transpose(1, 0, 2).astype(jnp.bfloat16))     # [NH,H,HD]
        acc["bq"].append((lp["bq"] * scale).reshape(NH, 1, HD).astype(jnp.float32))
        acc["wk"].append(lp["wk"].reshape(H, NH, HD).transpose(1, 0, 2)
                         .astype(jnp.bfloat16))
        acc["bk"].append(lp["bk"].reshape(NH, 1, HD).astype(jnp.float32))
        acc["wv"].append(lp["wv"].reshape(H, NH, HD).transpose(1, 0, 2)
                         .astype(jnp.bfloat16))
        acc["bv"].append(lp["bv"].reshape(NH, 1, HD).astype(jnp.float32))
        acc["wo"].append(lp["wo"].reshape(NH, HD, H).astype(jnp.bfloat16))
        acc["bo"].append(r2(lp["bo"]))
        acc["ln1_g"].append(r2(lp["attn_ln_g"]))
        acc["ln1_b"].append(r2(lp["attn_ln_b"]))
        acc["w1"].append((lp["w1"] + lp["w1_fast"]).astype(jnp.bfloat16))
        acc["b1"].append(r2(lp["b1"]))
        acc["w2"].append((lp["w2"] + lp["w2_fast"]).astype(jnp.bfloat16))
        acc["b2"].append(r2(lp["b2"]))
        acc["ln2_g"].append(r2(lp["ffn_ln_g"]))
        acc["ln2_b"].append(r2(lp["ffn_ln_b"]))

    prep = {k: jnp.stack(v, axis=0) for k, v in acc.items()}
    prep.update({
        "tok_emb": params["token_emb"].astype(jnp.float32),
        "pos_emb": params["pos_emb"].astype(jnp.float32),
        "emb_ln_g": r2(params["emb_ln_g"]), "emb_ln_b": r2(params["emb_ln_b"]),
        "final_ln_g": r2(params["final_ln_g"]), "final_ln_b": r2(params["final_ln_b"]),
        "lm_head_w": params["token_emb"].T.astype(jnp.bfloat16),       # [H,V], tied
    })
    return prep


# ------------------------------- model forward -----------------------------
def hebbian_lm_forward(prep, input_ids, attention_mask=None):
    B, S = input_ids.shape
    V, H = prep["tok_emb"].shape
    L, NH = prep["wq"].shape[0], prep["wq"].shape[1]
    HD = prep["wq"].shape[3]
    M = B * S
    assert S <= prep["pos_emb"].shape[0], "seq_len exceeds max_position_embeddings"
    if attention_mask is None:
        attention_mask = jnp.ones_like(input_ids)

    ids2 = input_ids.reshape(M, 1).astype(jnp.int32)
    mask_f32 = attention_mask.astype(jnp.float32)
    pos = prep["pos_emb"][:S]                                         # [S,H] static slice

    kernel = functools.partial(
        _fused_forward_kernel,
        batch=B, seq=S, heads=NH, head_dim=HD,
        window=WINDOW_SIZE, vocab=V, hidden=H)

    in_specs = [
        _const_spec((M, 1)),                               # ids
        _const_spec((B, S)),                               # attention mask
        _const_spec((V, H)),                               # token emb table
        _const_spec((S, H)),                               # pos emb
        _const_spec((1, H)), _const_spec((1, H)),          # emb LN
        _const_spec((1, H)), _const_spec((1, H)),          # final LN
        _const_spec((H, V)),                               # tied lm_head
        _layer_spec(prep["wq"].shape), _layer_spec(prep["bq"].shape),
        _layer_spec(prep["wk"].shape), _layer_spec(prep["bk"].shape),
        _layer_spec(prep["wv"].shape), _layer_spec(prep["bv"].shape),
        _layer_spec(prep["wo"].shape), _layer_spec(prep["bo"].shape),
        _layer_spec(prep["ln1_g"].shape), _layer_spec(prep["ln1_b"].shape),
        _layer_spec(prep["w1"].shape), _layer_spec(prep["b1"].shape),
        _layer_spec(prep["w2"].shape), _layer_spec(prep["b2"].shape),
        _layer_spec(prep["ln2_g"].shape), _layer_spec(prep["ln2_b"].shape),
    ]
    out_specs = (_const_spec((M, H)), _const_spec((M, V)))
    out_shape = (jax.ShapeDtypeStruct((M, H), jnp.float32),
                 jax.ShapeDtypeStruct((M, V), jnp.float32))

    hidden, logits = pl.pallas_call(
        kernel,
        grid=(L,),
        in_specs=in_specs,
        out_specs=out_specs,
        out_shape=out_shape,
        scratch_shapes=[pltpu.VMEM((M, H), jnp.float32),   # resident activation x
                        pltpu.VMEM((B, S, S), jnp.float32)],  # attention bias
        compiler_params=pltpu.CompilerParams(dimension_semantics=("arbitrary",)),
    )(ids2, mask_f32, prep["tok_emb"], pos,
      prep["emb_ln_g"], prep["emb_ln_b"], prep["final_ln_g"], prep["final_ln_b"],
      prep["lm_head_w"],
      prep["wq"], prep["bq"], prep["wk"], prep["bk"], prep["wv"], prep["bv"],
      prep["wo"], prep["bo"], prep["ln1_g"], prep["ln1_b"],
      prep["w1"], prep["b1"], prep["w2"], prep["b2"], prep["ln2_g"], prep["ln2_b"])

    return {
        "hidden_states": hidden.reshape(B, S, H),
        "logits": logits.reshape(B, S, V),
    }


# ----------------------------------- main -----------------------------------
if __name__ == "__main__":
    key = jax.random.PRNGKey(0)
    pkey, dkey = jax.random.split(key)
    params = init_params(pkey)
    prep = prepare_params(params)

    input_ids = jax.random.randint(dkey, (BATCH, SEQ), minval=3, maxval=VOCAB_SIZE,
                                   dtype=jnp.int32)
    attention_mask = jnp.ones((BATCH, SEQ), dtype=jnp.int32)

    fwd = jax.jit(hebbian_lm_forward)
    outputs = fwd(prep, input_ids, attention_mask)
    jax.block_until_ready(outputs)

    assert outputs["hidden_states"].shape == (BATCH, SEQ, HIDDEN)
    assert outputs["logits"].shape == (BATCH, SEQ, VOCAB_SIZE)
    assert bool(jnp.all(jnp.isfinite(outputs["logits"])))
    print("KERNEL_OK")
</pallas_src>

<mosaic_0001>
module attributes {stable_mosaic.version = 11 : i64} {
  func.func @_fused_forward_kernel(%arg0: i32, %arg1: memref<32x1xi32, #tpu.memory_space<vmem>>, %arg2: memref<2x16xf32, #tpu.memory_space<vmem>>, %arg3: memref<128x64xf32, #tpu.memory_space<vmem>>, %arg4: memref<16x64xf32, #tpu.memory_space<vmem>>, %arg5: memref<1x64xf32, #tpu.memory_space<vmem>>, %arg6: memref<1x64xf32, #tpu.memory_space<vmem>>, %arg7: memref<1x64xf32, #tpu.memory_space<vmem>>, %arg8: memref<1x64xf32, #tpu.memory_space<vmem>>, %arg9: memref<64x128xbf16, #tpu.memory_space<vmem>>, %arg10: memref<1x4x64x16xbf16, #tpu.memory_space<vmem>>, %arg11: memref<1x4x1x16xf32, #tpu.memory_space<vmem>>, %arg12: memref<1x4x64x16xbf16, #tpu.memory_space<vmem>>, %arg13: memref<1x4x1x16xf32, #tpu.memory_space<vmem>>, %arg14: memref<1x4x64x16xbf16, #tpu.memory_space<vmem>>, %arg15: memref<1x4x1x16xf32, #tpu.memory_space<vmem>>, %arg16: memref<1x4x16x64xbf16, #tpu.memory_space<vmem>>, %arg17: memref<1x1x64xf32, #tpu.memory_space<vmem>>, %arg18: memref<1x1x64xf32, #tpu.memory_space<vmem>>, %arg19: memref<1x1x64xf32, #tpu.memory_space<vmem>>, %arg20: memref<1x64x256xbf16, #tpu.memory_space<vmem>>, %arg21: memref<1x1x256xf32, #tpu.memory_space<vmem>>, %arg22: memref<1x256x64xbf16, #tpu.memory_space<vmem>>, %arg23: memref<1x1x64xf32, #tpu.memory_space<vmem>>, %arg24: memref<1x1x64xf32, #tpu.memory_space<vmem>>, %arg25: memref<1x1x64xf32, #tpu.memory_space<vmem>>, %arg26: memref<32x64xf32, #tpu.memory_space<vmem>>, %arg27: memref<32x128xf32, #tpu.memory_space<vmem>>, %arg28: memref<32x64xf32, #tpu.memory_space<vmem>>, %arg29: memref<2x16x16xf32, #tpu.memory_space<vmem>>) attributes {dimension_semantics = [#tpu.dimension_semantics<arbitrary>], iteration_bounds = array<i64: 2>, scalar_prefetch = 0 : i64, scratch_operands = 2 : i64, tpu.core_type = #tpu.core_type<tc>, window_params = [{pipeline_mode = #tpu.pipeline_mode<synchronous>, transform_indices = @transform_0, window_bounds = array<i64: 32, 1>}, {pipeline_mode = #tpu.pipeline_mode<synchronous>, transform_indices = @transform_1, window_bounds = array<i64: 2, 16>}, {pipeline_mode = #tpu.pipeline_mode<synchronous>, transform_indices = @transform_2, window_bounds = array<i64: 128, 64>}, {pipeline_mode = #tpu.pipeline_mode<synchronous>, transform_indices = @transform_3, window_bounds = array<i64: 16, 64>}, {pipeline_mode = #tpu.pipeline_mode<synchronous>, transform_indices = @transform_4, window_bounds = array<i64: 1, 64>}, {pipeline_mode = #tpu.pipeline_mode<synchronous>, transform_indices = @transform_5, window_bounds = array<i64: 1, 64>}, {pipeline_mode = #tpu.pipeline_mode<synchronous>, transform_indices = @transform_6, window_bounds = array<i64: 1, 64>}, {pipeline_mode = #tpu.pipeline_mode<synchronous>, transform_indices = @transform_7, window_bounds = array<i64: 1, 64>}, {pipeline_mode = #tpu.pipeline_mode<synchronous>, transform_indices = @transform_8, window_bounds = array<i64: 64, 128>}, {transform_indices = @transform_9, window_bounds = array<i64: 1, 4, 64, 16>}, {transform_indices = @transform_10, window_bounds = array<i64: 1, 4, 1, 16>}, {transform_indices = @transform_11, window_bounds = array<i64: 1, 4, 64, 16>}, {transform_indices = @transform_12, window_bounds = array<i64: 1, 4, 1, 16>}, {transform_indices = @transform_13, window_bounds = array<i64: 1, 4, 64, 16>}, {transform_indices = @transform_14, window_bounds = array<i64: 1, 4, 1, 16>}, {transform_indices = @transform_15, window_bounds = array<i64: 1, 4, 16, 64>}, {transform_indices = @transform_16, window_bounds = array<i64: 1, 1, 64>}, {transform_indices = @transform_17, window_bounds = array<i64: 1, 1, 64>}, {transform_indices = @transform_18, window_bounds = array<i64: 1, 1, 64>}, {transform_indices = @transform_19, window_bounds = array<i64: 1, 64, 256>}, {transform_indices = @transform_20, window_bounds = array<i64: 1, 1, 256>}, {transform_indices = @transform_21, window_bounds = array<i64: 1, 256, 64>}, {transform_indices = @transform_22, window_bounds = array<i64: 1, 1, 64>}, {transform_indices = @transform_23, window_bounds = array<i64: 1, 1, 64>}, {transform_indices = @transform_24, window_bounds = array<i64: 1, 1, 64>}, {pipeline_mode = #tpu.pipeline_mode<synchronous>, transform_indices = @transform_25, window_bounds = array<i64: 32, 64>}, {pipeline_mode = #tpu.pipeline_mode<synchronous>, transform_indices = @transform_26, window_bounds = array<i64: 32, 128>}]} {
    %c0_i32 = arith.constant 0 : i32
    %0 = arith.cmpi eq, %arg0, %c0_i32 : i32
    %1 = arith.extui %0 : i1 to i32
    %c0_i32_0 = arith.constant 0 : i32
    %2 = arith.cmpi ne, %1, %c0_i32_0 : i32
    scf.if %2 {
      %c0_179 = arith.constant 0 : index
      %c0_180 = arith.constant 0 : index
      %241 = vector.load %arg1[%c0_179, %c0_180] : memref<32x1xi32, #tpu.memory_space<vmem>>, vector<32x1xi32>
      %242 = tpu.iota {dimensions = array<i32: 1>} : vector<32x128xi32>
      %243 = vector.broadcast %241 : vector<32x1xi32> to vector<32x128xi32>
      %244 = arith.cmpi eq, %242, %243 : vector<32x128xi32>
      %245 = arith.extui %244 : vector<32x128xi1> to vector<32x128xi32>
      %246 = arith.sitofp %245 : vector<32x128xi32> to vector<32x128xf32>
      %c0_181 = arith.constant 0 : index
      %c0_182 = arith.constant 0 : index
      %247 = vector.load %arg3[%c0_181, %c0_182] : memref<128x64xf32, #tpu.memory_space<vmem>>, vector<128x64xf32>
      %cst_183 = arith.constant dense<0.000000e+00> : vector<32x64xf32>
      %248 = tpu.matmul %246, %247, %cst_183 {dimension_numbers = #tpu.dot_dimension_numbers<[1], [0], [0], [1], [0, 0, 1, 1], [], []>} : vector<32x128xf32>, vector<128x64xf32>, vector<32x64xf32> -> vector<32x64xf32>
      %c0_184 = arith.constant 0 : index
      %c0_185 = arith.constant 0 : index
      %249 = vector.load %arg4[%c0_184, %c0_185] : memref<16x64xf32, #tpu.memory_space<vmem>>, vector<16x64xf32>
      %250 = tpu.concatenate %249, %249 in 0 : vector<16x64xf32>, vector<16x64xf32> -> vector<32x64xf32>
      %251 = arith.addf %248, %250 : vector<32x64xf32>
      %c0_186 = arith.constant 0 : index
      %c0_187 = arith.constant 0 : index
      %252 = vector.load %arg5[%c0_186, %c0_187] : memref<1x64xf32, #tpu.memory_space<vmem>>, vector<1x64xf32>
      %c0_188 = arith.constant 0 : index
      %c0_189 = arith.constant 0 : index
      %253 = vector.load %arg6[%c0_188, %c0_189] : memref<1x64xf32, #tpu.memory_space<vmem>>, vector<1x64xf32>
      %cst_190 = arith.constant dense<0.000000e+00> : vector<32xf32>
      %254 = vector.multi_reduction <add>, %251, %cst_190 [1] : vector<32x64xf32> to vector<32xf32>
      %255 = vector.shape_cast %254 : vector<32xf32> to vector<32x1xf32>
      %cst_191 = arith.constant 6.400000e+01 : f32
      %256 = vector.broadcast %cst_191 : f32 to vector<32x1xf32>
      %257 = arith.divf %255, %256 : vector<32x1xf32>
      %258 = vector.broadcast %257 : vector<32x1xf32> to vector<32x64xf32>
      %259 = arith.subf %251, %258 : vector<32x64xf32>
      %260 = arith.mulf %259, %259 : vector<32x64xf32>
      %cst_192 = arith.constant dense<0.000000e+00> : vector<32xf32>
      %261 = vector.multi_reduction <add>, %260, %cst_192 [1] : vector<32x64xf32> to vector<32xf32>
      %262 = vector.shape_cast %261 : vector<32xf32> to vector<32x1xf32>
      %cst_193 = arith.constant 6.400000e+01 : f32
      %263 = vector.broadcast %cst_193 : f32 to vector<32x1xf32>
      %264 = arith.divf %262, %263 : vector<32x1xf32>
      %265 = vector.broadcast %257 : vector<32x1xf32> to vector<32x64xf32>
      %266 = arith.subf %251, %265 : vector<32x64xf32>
      %cst_194 = arith.constant 9.99999974E-6 : f32
      %267 = vector.broadcast %cst_194 : f32 to vector<32x1xf32>
      %268 = arith.addf %264, %267 : vector<32x1xf32>
      %269 = math.rsqrt %268 : vector<32x1xf32>
      %270 = vector.broadcast %269 : vector<32x1xf32> to vector<32x64xf32>
      %271 = arith.mulf %266, %270 : vector<32x64xf32>
      %272 = vector.broadcast %252 : vector<1x64xf32> to vector<32x64xf32>
      %273 = arith.mulf %271, %272 : vector<32x64xf32>
      %274 = vector.broadcast %253 : vector<1x64xf32> to vector<32x64xf32>
      %275 = arith.addf %273, %274 : vector<32x64xf32>
      %c0_195 = arith.constant 0 : index
      %c0_196 = arith.constant 0 : index
      %276 = vector.load %arg28[%c0_195, %c0_196] : memref<32x64xf32, #tpu.memory_space<vmem>>, vector<32x64xf32>
      tpu.vector_store %arg28[%c0_195, %c0_196], %275 {strides = array<i32>} : memref<32x64xf32, #tpu.memory_space<vmem>>, vector<32x64xf32>,
      %277 = tpu.iota {dimensions = array<i32: 0>} : vector<16x16xi32>
      %278 = tpu.iota {dimensions = array<i32: 1>} : vector<16x16xi32>
      %279 = arith.cmpi sle, %278, %277 : vector<16x16xi32>
      %c8_i32 = arith.constant 8 : i32
      %280 = vector.broadcast %c8_i32 : i32 to vector<16x16xi32>
      %281 = arith.subi %277, %280 : vector<16x16xi32>
      %282 = arith.cmpi sgt, %278, %281 : vector<16x16xi32>
      %283 = arith.andi %279, %282 : vector<16x16xi1>
      %c0_197 = arith.constant 0 : index
      %c0_198 = arith.constant 0 : index
      %284 = vector.load %arg2[%c0_197, %c0_198] : memref<2x16xf32, #tpu.memory_space<vmem>>, vector<2x16xf32>
      %cst_199 = arith.constant 0.000000e+00 : f32
      %285 = vector.broadcast %cst_199 : f32 to vector<2x16xf32>
      %286 = arith.cmpf ogt, %284, %285 : vector<2x16xf32>
      %287 = vector.shape_cast %283 : vector<16x16xi1> to vector<1x16x16xi1>
      %288 = vector.shape_cast %286 : vector<2x16xi1> to vector<2x1x16xi1>
      %289 = vector.broadcast %287 : vector<1x16x16xi1> to vector<2x16x16xi1>
      %290 = vector.broadcast %288 : vector<2x1x16xi1> to vector<2x16x16xi1>
      %291 = arith.andi %289, %290 : vector<2x16x16xi1>
      %cst_200 = arith.constant 0.000000e+00 : f32
      %cst_201 = arith.constant -1.000000e+09 : f32
      %292 = vector.broadcast %cst_200 : f32 to vector<2x16x16xf32>
      %293 = vector.broadcast %cst_201 : f32 to vector<2x16x16xf32>
      %294 = arith.select %291, %292, %293 : vector<2x16x16xi1>, vector<2x16x16xf32>
      %c0_202 = arith.constant 0 : index
      %c0_203 = arith.constant 0 : index
      %c0_204 = arith.constant 0 : index
      %295 = vector.load %arg29[%c0_202, %c0_203, %c0_204] : memref<2x16x16xf32, #tpu.memory_space<vmem>>, vector<2x16x16xf32>
      tpu.vector_store %arg29[%c0_202, %c0_203, %c0_204], %294 {strides = array<i32>} : memref<2x16x16xf32, #tpu.memory_space<vmem>>, vector<2x16x16xf32>,
    } else {
    }
    %c0 = arith.constant 0 : index
    %c0_1 = arith.constant 0 : index
    %3 = vector.load %arg28[%c0, %c0_1] : memref<32x64xf32, #tpu.memory_space<vmem>>, vector<32x64xf32>
    %4 = arith.truncf %3 : vector<32x64xf32> to vector<32x64xbf16>
    %c0_2 = arith.constant 0 : index
    %c0_3 = arith.constant 0 : index
    %c0_4 = arith.constant 0 : index
    %c0_5 = arith.constant 0 : index
    %5 = vector.load %arg10[%c0_2, %c0_3, %c0_4, %c0_5] : memref<1x4x64x16xbf16, #tpu.memory_space<vmem>>, vector<1x1x64x16xbf16>
    %6 = vector.shape_cast %5 : vector<1x1x64x16xbf16> to vector<64x16xbf16>
    %cst = arith.constant dense<0.000000e+00> : vector<32x16xf32>
    %7 = tpu.matmul %4, %6, %cst {dimension_numbers = #tpu.dot_dimension_numbers<[1], [0], [0], [1], [0, 0, 1, 1], [], []>} : vector<32x64xbf16>, vector<64x16xbf16>, vector<32x16xf32> -> vector<32x16xf32>
    %c0_6 = arith.constant 0 : index
    %c0_7 = arith.constant 0 : index
    %c0_8 = arith.constant 0 : index
    %c0_9 = arith.constant 0 : index
    %8 = vector.load %arg11[%c0_6, %c0_7, %c0_8, %c0_9] : memref<1x4x1x16xf32, #tpu.memory_space<vmem>>, vector<1x1x1x16xf32>
    %9 = vector.shape_cast %8 : vector<1x1x1x16xf32> to vector<1x16xf32>
    %10 = vector.broadcast %9 : vector<1x16xf32> to vector<32x16xf32>
    %11 = arith.addf %7, %10 : vector<32x16xf32>
    %12 = vector.shape_cast %11 : vector<32x16xf32> to vector<2x16x16xf32>
    %c0_10 = arith.constant 0 : index
    %c1 = arith.constant 1 : index
    %c0_11 = arith.constant 0 : index
    %c0_12 = arith.constant 0 : index
    %13 = vector.load %arg10[%c0_10, %c1, %c0_11, %c0_12] : memref<1x4x64x16xbf16, #tpu.memory_space<vmem>>, vector<1x1x64x16xbf16>
    %14 = vector.shape_cast %13 : vector<1x1x64x16xbf16> to vector<64x16xbf16>
    %cst_13 = arith.constant dense<0.000000e+00> : vector<32x16xf32>
    %15 = tpu.matmul %4, %14, %cst_13 {dimension_numbers = #tpu.dot_dimension_numbers<[1], [0], [0], [1], [0, 0, 1, 1], [], []>} : vector<32x64xbf16>, vector<64x16xbf16>, vector<32x16xf32> -> vector<32x16xf32>
    %c0_14 = arith.constant 0 : index
    %c1_15 = arith.constant 1 : index
    %c0_16 = arith.constant 0 : index
    %c0_17 = arith.constant 0 : index
    %16 = vector.load %arg11[%c0_14, %c1_15, %c0_16, %c0_17] : memref<1x4x1x16xf32, #tpu.memory_space<vmem>>, vector<1x1x1x16xf32>
    %17 = vector.shape_cast %16 : vector<1x1x1x16xf32> to vector<1x16xf32>
    %18 = vector.broadcast %17 : vector<1x16xf32> to vector<32x16xf32>
    %19 = arith.addf %15, %18 : vector<32x16xf32>
    %20 = vector.shape_cast %19 : vector<32x16xf32> to vector<2x16x16xf32>
    %c0_18 = arith.constant 0 : index
    %c2 = arith.constant 2 : index
    %c0_19 = arith.constant 0 : index
    %c0_20 = arith.constant 0 : index
    %21 = vector.load %arg10[%c0_18, %c2, %c0_19, %c0_20] : memref<1x4x64x16xbf16, #tpu.memory_space<vmem>>, vector<1x1x64x16xbf16>
    %22 = vector.shape_cast %21 : vector<1x1x64x16xbf16> to vector<64x16xbf16>
    %cst_21 = arith.constant dense<0.000000e+00> : vector<32x16xf32>
    %23 = tpu.matmul %4, %22, %cst_21 {dimension_numbers = #tpu.dot_dimension_numbers<[1], [0], [0], [1], [0, 0, 1, 1], [], []>} : vector<32x64xbf16>, vector<64x16xbf16>, vector<32x16xf32> -> vector<32x16xf32>
    %c0_22 = arith.constant 0 : index
    %c2_23 = arith.constant 2 : index
    %c0_24 = arith.constant 0 : index
    %c0_25 = arith.constant 0 : index
    %24 = vector.load %arg11[%c0_22, %c2_23, %c0_24, %c0_25] : memref<1x4x1x16xf32, #tpu.memory_space<vmem>>, vector<1x1x1x16xf32>
    %25 = vector.shape_cast %24 : vector<1x1x1x16xf32> to vector<1x16xf32>
    %26 = vector.broadcast %25 : vector<1x16xf32> to vector<32x16xf32>
    %27 = arith.addf %23, %26 : vector<32x16xf32>
    %28 = vector.shape_cast %27 : vector<32x16xf32> to vector<2x16x16xf32>
    %c0_26 = arith.constant 0 : index
    %c3 = arith.constant 3 : index
    %c0_27 = arith.constant 0 : index
    %c0_28 = arith.constant 0 : index
    %29 = vector.load %arg10[%c0_26, %c3, %c0_27, %c0_28] : memref<1x4x64x16xbf16, #tpu.memory_space<vmem>>, vector<1x1x64x16xbf16>
    %30 = vector.shape_cast %29 : vector<1x1x64x16xbf16> to vector<64x16xbf16>
    %cst_29 = arith.constant dense<0.000000e+00> : vector<32x16xf32>
    %31 = tpu.matmul %4, %30, %cst_29 {dimension_numbers = #tpu.dot_dimension_numbers<[1], [0], [0], [1], [0, 0, 1, 1], [], []>} : vector<32x64xbf16>, vector<64x16xbf16>, vector<32x16xf32> -> vector<32x16xf32>
    %c0_30 = arith.constant 0 : index
    %c3_31 = arith.constant 3 : index
    %c0_32 = arith.constant 0 : index
    %c0_33 = arith.constant 0 : index
    %32 = vector.load %arg11[%c0_30, %c3_31, %c0_32, %c0_33] : memref<1x4x1x16xf32, #tpu.memory_space<vmem>>, vector<1x1x1x16xf32>
    %33 = vector.shape_cast %32 : vector<1x1x1x16xf32> to vector<1x16xf32>
    %34 = vector.broadcast %33 : vector<1x16xf32> to vector<32x16xf32>
    %35 = arith.addf %31, %34 : vector<32x16xf32>
    %36 = vector.shape_cast %35 : vector<32x16xf32> to vector<2x16x16xf32>
    %37 = tpu.concatenate %12, %20, %28, %36 in 0 : vector<2x16x16xf32>, vector<2x16x16xf32>, vector<2x16x16xf32>, vector<2x16x16xf32> -> vector<8x16x16xf32>
    %38 = arith.truncf %37 : vector<8x16x16xf32> to vector<8x16x16xbf16>
    %c0_34 = arith.constant 0 : index
    %c0_35 = arith.constant 0 : index
    %c0_36 = arith.constant 0 : index
    %c0_37 = arith.constant 0 : index
    %39 = vector.load %arg12[%c0_34, %c0_35, %c0_36, %c0_37] : memref<1x4x64x16xbf16, #tpu.memory_space<vmem>>, vector<1x1x64x16xbf16>
    %40 = vector.shape_cast %39 : vector<1x1x64x16xbf16> to vector<64x16xbf16>
    %cst_38 = arith.constant dense<0.000000e+00> : vector<32x16xf32>
    %41 = tpu.matmul %4, %40, %cst_38 {dimension_numbers = #tpu.dot_dimension_numbers<[1], [0], [0], [1], [0, 0, 1, 1], [], []>} : vector<32x64xbf16>, vector<64x16xbf16>, vector<32x16xf32> -> vector<32x16xf32>
    %c0_39 = arith.constant 0 : index
    %c0_40 = arith.constant 0 : index
    %c0_41 = arith.constant 0 : index
    %c0_42 = arith.constant 0 : index
    %42 = vector.load %arg13[%c0_39, %c0_40, %c0_41, %c0_42] : memref<1x4x1x16xf32, #tpu.memory_space<vmem>>, vector<1x1x1x16xf32>
    %43 = vector.shape_cast %42 : vector<1x1x1x16xf32> to vector<1x16xf32>
    %44 = vector.broadcast %43 : vector<1x16xf32> to vector<32x16xf32>
    %45 = arith.addf %41, %44 : vector<32x16xf32>
    %46 = vector.shape_cast %45 : vector<32x16xf32> to vector<2x16x16xf32>
    %c0_43 = arith.constant 0 : index
    %c1_44 = arith.constant 1 : index
    %c0_45 = arith.constant 0 : index
    %c0_46 = arith.constant 0 : index
    %47 = vector.load %arg12[%c0_43, %c1_44, %c0_45, %c0_46] : memref<1x4x64x16xbf16, #tpu.memory_space<vmem>>, vector<1x1x64x16xbf16>
    %48 = vector.shape_cast %47 : vector<1x1x64x16xbf16> to vector<64x16xbf16>
    %cst_47 = arith.constant dense<0.000000e+00> : vector<32x16xf32>
    %49 = tpu.matmul %4, %48, %cst_47 {dimension_numbers = #tpu.dot_dimension_numbers<[1], [0], [0], [1], [0, 0, 1, 1], [], []>} : vector<32x64xbf16>, vector<64x16xbf16>, vector<32x16xf32> -> vector<32x16xf32>
    %c0_48 = arith.constant 0 : index
    %c1_49 = arith.constant 1 : index
    %c0_50 = arith.constant 0 : index
    %c0_51 = arith.constant 0 : index
    %50 = vector.load %arg13[%c0_48, %c1_49, %c0_50, %c0_51] : memref<1x4x1x16xf32, #tpu.memory_space<vmem>>, vector<1x1x1x16xf32>
    %51 = vector.shape_cast %50 : vector<1x1x1x16xf32> to vector<1x16xf32>
    %52 = vector.broadcast %51 : vector<1x16xf32> to vector<32x16xf32>
    %53 = arith.addf %49, %52 : vector<32x16xf32>
    %54 = vector.shape_cast %53 : vector<32x16xf32> to vector<2x16x16xf32>
    %c0_52 = arith.constant 0 : index
    %c2_53 = arith.constant 2 : index
    %c0_54 = arith.constant 0 : index
    %c0_55 = arith.constant 0 : index
    %55 = vector.load %arg12[%c0_52, %c2_53, %c0_54, %c0_55] : memref<1x4x64x16xbf16, #tpu.memory_space<vmem>>, vector<1x1x64x16xbf16>
    %56 = vector.shape_cast %55 : vector<1x1x64x16xbf16> to vector<64x16xbf16>
    %cst_56 = arith.constant dense<0.000000e+00> : vector<32x16xf32>
    %57 = tpu.matmul %4, %56, %cst_56 {dimension_numbers = #tpu.dot_dimension_numbers<[1], [0], [0], [1], [0, 0, 1, 1], [], []>} : vector<32x64xbf16>, vector<64x16xbf16>, vector<32x16xf32> -> vector<32x16xf32>
    %c0_57 = arith.constant 0 : index
    %c2_58 = arith.constant 2 : index
    %c0_59 = arith.constant 0 : index
    %c0_60 = arith.constant 0 : index
    %58 = vector.load %arg13[%c0_57, %c2_58, %c0_59, %c0_60] : memref<1x4x1x16xf32, #tpu.memory_space<vmem>>, vector<1x1x1x16xf32>
    %59 = vector.shape_cast %58 : vector<1x1x1x16xf32> to vector<1x16xf32>
    %60 = vector.broadcast %59 : vector<1x16xf32> to vector<32x16xf32>
    %61 = arith.addf %57, %60 : vector<32x16xf32>
    %62 = vector.shape_cast %61 : vector<32x16xf32> to vector<2x16x16xf32>
    %c0_61 = arith.constant 0 : index
    %c3_62 = arith.constant 3 : index
    %c0_63 = arith.constant 0 : index
    %c0_64 = arith.constant 0 : index
    %63 = vector.load %arg12[%c0_61, %c3_62, %c0_63, %c0_64] : memref<1x4x64x16xbf16, #tpu.memory_space<vmem>>, vector<1x1x64x16xbf16>
    %64 = vector.shape_cast %63 : vector<1x1x64x16xbf16> to vector<64x16xbf16>
    %cst_65 = arith.constant dense<0.000000e+00> : vector<32x16xf32>
    %65 = tpu.matmul %4, %64, %cst_65 {dimension_numbers = #tpu.dot_dimension_numbers<[1], [0], [0], [1], [0, 0, 1, 1], [], []>} : vector<32x64xbf16>, vector<64x16xbf16>, vector<32x16xf32> -> vector<32x16xf32>
    %c0_66 = arith.constant 0 : index
    %c3_67 = arith.constant 3 : index
    %c0_68 = arith.constant 0 : index
    %c0_69 = arith.constant 0 : index
    %66 = vector.load %arg13[%c0_66, %c3_67, %c0_68, %c0_69] : memref<1x4x1x16xf32, #tpu.memory_space<vmem>>, vector<1x1x1x16xf32>
    %67 = vector.shape_cast %66 : vector<1x1x1x16xf32> to vector<1x16xf32>
    %68 = vector.broadcast %67 : vector<1x16xf32> to vector<32x16xf32>
    %69 = arith.addf %65, %68 : vector<32x16xf32>
    %70 = vector.shape_cast %69 : vector<32x16xf32> to vector<2x16x16xf32>
    %71 = tpu.concatenate %46, %54, %62, %70 in 0 : vector<2x16x16xf32>, vector<2x16x16xf32>, vector<2x16x16xf32>, vector<2x16x16xf32> -> vector<8x16x16xf32>
    %72 = arith.truncf %71 : vector<8x16x16xf32> to vector<8x16x16xbf16>
    %c0_70 = arith.constant 0 : index
    %c0_71 = arith.constant 0 : index
    %c0_72 = arith.constant 0 : index
    %c0_73 = arith.constant 0 : index
    %73 = vector.load %arg14[%c0_70, %c0_71, %c0_72, %c0_73] : memref<1x4x64x16xbf16, #tpu.memory_space<vmem>>, vector<1x1x64x16xbf16>
    %74 = vector.shape_cast %73 : vector<1x1x64x16xbf16> to vector<64x16xbf16>
    %cst_74 = arith.constant dense<0.000000e+00> : vector<32x16xf32>
    %75 = tpu.matmul %4, %74, %cst_74 {dimension_numbers = #tpu.dot_dimension_numbers<[1], [0], [0], [1], [0, 0, 1, 1], [], []>} : vector<32x64xbf16>, vector<64x16xbf16>, vector<32x16xf32> -> vector<32x16xf32>
    %c0_75 = arith.constant 0 : index
    %c0_76 = arith.constant 0 : index
    %c0_77 = arith.constant 0 : index
    %c0_78 = arith.constant 0 : index
    %76 = vector.load %arg15[%c0_75, %c0_76, %c0_77, %c0_78] : memref<1x4x1x16xf32, #tpu.memory_space<vmem>>, vector<1x1x1x16xf32>
    %77 = vector.shape_cast %76 : vector<1x1x1x16xf32> to vector<1x16xf32>
    %78 = vector.broadcast %77 : vector<1x16xf32> to vector<32x16xf32>
    %79 = arith.addf %75, %78 : vector<32x16xf32>
    %80 = vector.shape_cast %79 : vector<32x16xf32> to vector<2x16x16xf32>
    %c0_79 = arith.constant 0 : index
    %c1_80 = arith.constant 1 : index
    %c0_81 = arith.constant 0 : index
    %c0_82 = arith.constant 0 : index
    %81 = vector.load %arg14[%c0_79, %c1_80, %c0_81, %c0_82] : memref<1x4x64x16xbf16, #tpu.memory_space<vmem>>, vector<1x1x64x16xbf16>
    %82 = vector.shape_cast %81 : vector<1x1x64x16xbf16> to vector<64x16xbf16>
    %cst_83 = arith.constant dense<0.000000e+00> : vector<32x16xf32>
    %83 = tpu.matmul %4, %82, %cst_83 {dimension_numbers = #tpu.dot_dimension_numbers<[1], [0], [0], [1], [0, 0, 1, 1], [], []>} : vector<32x64xbf16>, vector<64x16xbf16>, vector<32x16xf32> -> vector<32x16xf32>
    %c0_84 = arith.constant 0 : index
    %c1_85 = arith.constant 1 : index
    %c0_86 = arith.constant 0 : index
    %c0_87 = arith.constant 0 : index
    %84 = vector.load %arg15[%c0_84, %c1_85, %c0_86, %c0_87] : memref<1x4x1x16xf32, #tpu.memory_space<vmem>>, vector<1x1x1x16xf32>
    %85 = vector.shape_cast %84 : vector<1x1x1x16xf32> to vector<1x16xf32>
    %86 = vector.broadcast %85 : vector<1x16xf32> to vector<32x16xf32>
    %87 = arith.addf %83, %86 : vector<32x16xf32>
    %88 = vector.shape_cast %87 : vector<32x16xf32> to vector<2x16x16xf32>
    %c0_88 = arith.constant 0 : index
    %c2_89 = arith.constant 2 : index
    %c0_90 = arith.constant 0 : index
    %c0_91 = arith.constant 0 : index
    %89 = vector.load %arg14[%c0_88, %c2_89, %c0_90, %c0_91] : memref<1x4x64x16xbf16, #tpu.memory_space<vmem>>, vector<1x1x64x16xbf16>
    %90 = vector.shape_cast %89 : vector<1x1x64x16xbf16> to vector<64x16xbf16>
    %cst_92 = arith.constant dense<0.000000e+00> : vector<32x16xf32>
    %91 = tpu.matmul %4, %90, %cst_92 {dimension_numbers = #tpu.dot_dimension_numbers<[1], [0], [0], [1], [0, 0, 1, 1], [], []>} : vector<32x64xbf16>, vector<64x16xbf16>, vector<32x16xf32> -> vector<32x16xf32>
    %c0_93 = arith.constant 0 : index
    %c2_94 = arith.constant 2 : index
    %c0_95 = arith.constant 0 : index
    %c0_96 = arith.constant 0 : index
    %92 = vector.load %arg15[%c0_93, %c2_94, %c0_95, %c0_96] : memref<1x4x1x16xf32, #tpu.memory_space<vmem>>, vector<1x1x1x16xf32>
    %93 = vector.shape_cast %92 : vector<1x1x1x16xf32> to vector<1x16xf32>
    %94 = vector.broadcast %93 : vector<1x16xf32> to vector<32x16xf32>
    %95 = arith.addf %91, %94 : vector<32x16xf32>
    %96 = vector.shape_cast %95 : vector<32x16xf32> to vector<2x16x16xf32>
    %c0_97 = arith.constant 0 : index
    %c3_98 = arith.constant 3 : index
    %c0_99 = arith.constant 0 : index
    %c0_100 = arith.constant 0 : index
    %97 = vector.load %arg14[%c0_97, %c3_98, %c0_99, %c0_100] : memref<1x4x64x16xbf16, #tpu.memory_space<vmem>>, vector<1x1x64x16xbf16>
    %98 = vector.shape_cast %97 : vector<1x1x64x16xbf16> to vector<64x16xbf16>
    %cst_101 = arith.constant dense<0.000000e+00> : vector<32x16xf32>
    %99 = tpu.matmul %4, %98, %cst_101 {dimension_numbers = #tpu.dot_dimension_numbers<[1], [0], [0], [1], [0, 0, 1, 1], [], []>} : vector<32x64xbf16>, vector<64x16xbf16>, vector<32x16xf32> -> vector<32x16xf32>
    %c0_102 = arith.constant 0 : index
    %c3_103 = arith.constant 3 : index
    %c0_104 = arith.constant 0 : index
    %c0_105 = arith.constant 0 : index
    %100 = vector.load %arg15[%c0_102, %c3_103, %c0_104, %c0_105] : memref<1x4x1x16xf32, #tpu.memory_space<vmem>>, vector<1x1x1x16xf32>
    %101 = vector.shape_cast %100 : vector<1x1x1x16xf32> to vector<1x16xf32>
    %102 = vector.broadcast %101 : vector<1x16xf32> to vector<32x16xf32>
    %103 = arith.addf %99, %102 : vector<32x16xf32>
    %104 = vector.shape_cast %103 : vector<32x16xf32> to vector<2x16x16xf32>
    %105 = tpu.concatenate %80, %88, %96, %104 in 0 : vector<2x16x16xf32>, vector<2x16x16xf32>, vector<2x16x16xf32>, vector<2x16x16xf32> -> vector<8x16x16xf32>
    %106 = arith.truncf %105 : vector<8x16x16xf32> to vector<8x16x16xbf16>
    %c0_106 = arith.constant 0 : index
    %c0_107 = arith.constant 0 : index
    %c0_108 = arith.constant 0 : index
    %107 = vector.load %arg29[%c0_106, %c0_107, %c0_108] : memref<2x16x16xf32, #tpu.memory_space<vmem>>, vector<2x16x16xf32>
    %108 = tpu.concatenate %107, %107, %107, %107 in 0 : vector<2x16x16xf32>, vector<2x16x16xf32>, vector<2x16x16xf32>, vector<2x16x16xf32> -> vector<8x16x16xf32>
    "tpu.trace_start"() <{level = 10 : i32, message = "bqd,bkd->bqk"}> : () -> ()
    %cst_109 = arith.constant dense<0.000000e+00> : vector<8x16x16xf32>
    %109 = tpu.matmul %38, %72, %cst_109 {dimension_numbers = #tpu.dot_dimension_numbers<[2], [2], [1], [1], [0, 0, 0, 1, 1, 1], [0], [0]>} : vector<8x16x16xbf16>, vector<8x16x16xbf16>, vector<8x16x16xf32> -> vector<8x16x16xf32>
    "tpu.trace_stop"() : () -> ()
    %110 = arith.addf %109, %108 : vector<8x16x16xf32>
    %cst_110 = arith.constant dense<0xFF800000> : vector<8x16xf32>
    %111 = vector.multi_reduction <maximumf>, %110, %cst_110 [2] : vector<8x16x16xf32> to vector<8x16xf32>
    %112 = vector.shape_cast %111 : vector<8x16xf32> to vector<8x16x1xf32>
    %113 = vector.broadcast %112 : vector<8x16x1xf32> to vector<8x16x16xf32>
    %114 = arith.subf %110, %113 : vector<8x16x16xf32>
    %115 = math.exp %114 : vector<8x16x16xf32>
    %cst_111 = arith.constant dense<0.000000e+00> : vector<8x16xf32>
    %116 = vector.multi_reduction <add>, %115, %cst_111 [2] : vector<8x16x16xf32> to vector<8x16xf32>
    %117 = vector.shape_cast %116 : vector<8x16xf32> to vector<8x16x1xf32>
    %118 = tpu.reciprocal %117 {approx = true} : vector<8x16x1xf32> -> vector<8x16x1xf32>
    %119 = vector.broadcast %118 : vector<8x16x1xf32> to vector<8x16x16xf32>
    %120 = arith.mulf %115, %119 : vector<8x16x16xf32>
    %121 = arith.truncf %120 : vector<8x16x16xf32> to vector<8x16x16xbf16>
    "tpu.trace_start"() <{level = 10 : i32, message = "bqk,bkd->bqd"}> : () -> ()
    %cst_112 = arith.constant dense<0.000000e+00> : vector<8x16x16xf32>
    %122 = tpu.matmul %121, %106, %cst_112 {dimension_numbers = #tpu.dot_dimension_numbers<[2], [1], [1], [2], [0, 0, 0, 1, 1, 2], [0], [0]>} : vector<8x16x16xbf16>, vector<8x16x16xbf16>, vector<8x16x16xf32> -> vector<8x16x16xf32>
    "tpu.trace_stop"() : () -> ()
    %123 = vector.extract_strided_slice %122 {offsets = [0, 0, 0], sizes = [2, 16, 16], strides = [1, 1, 1]} : vector<8x16x16xf32> to vector<2x16x16xf32>
    %124 = vector.shape_cast %123 : vector<2x16x16xf32> to vector<32x16xf32>
    %125 = arith.truncf %124 : vector<32x16xf32> to vector<32x16xbf16>
    %c0_113 = arith.constant 0 : index
    %c0_114 = arith.constant 0 : index
    %c0_115 = arith.constant 0 : index
    %c0_116 = arith.constant 0 : index
    %126 = vector.load %arg16[%c0_113, %c0_114, %c0_115, %c0_116] : memref<1x4x16x64xbf16, #tpu.memory_space<vmem>>, vector<1x1x16x64xbf16>
    %127 = vector.shape_cast %126 : vector<1x1x16x64xbf16> to vector<16x64xbf16>
    %cst_117 = arith.constant dense<0.000000e+00> : vector<32x64xf32>
    %128 = tpu.matmul %125, %127, %cst_117 {dimension_numbers = #tpu.dot_dimension_numbers<[1], [0], [0], [1], [0, 0, 1, 1], [], []>} : vector<32x16xbf16>, vector<16x64xbf16>, vector<32x64xf32> -> vector<32x64xf32>
    %129 = vector.extract_strided_slice %122 {offsets = [2, 0, 0], sizes = [2, 16, 16], strides = [1, 1, 1]} : vector<8x16x16xf32> to vector<2x16x16xf32>
    %130 = vector.shape_cast %129 : vector<2x16x16xf32> to vector<32x16xf32>
    %131 = arith.truncf %130 : vector<32x16xf32> to vector<32x16xbf16>
    %c0_118 = arith.constant 0 : index
    %c1_119 = arith.constant 1 : index
    %c0_120 = arith.constant 0 : index
    %c0_121 = arith.constant 0 : index
    %132 = vector.load %arg16[%c0_118, %c1_119, %c0_120, %c0_121] : memref<1x4x16x64xbf16, #tpu.memory_space<vmem>>, vector<1x1x16x64xbf16>
    %133 = vector.shape_cast %132 : vector<1x1x16x64xbf16> to vector<16x64xbf16>
    %cst_122 = arith.constant dense<0.000000e+00> : vector<32x64xf32>
    %134 = tpu.matmul %131, %133, %cst_122 {dimension_numbers = #tpu.dot_dimension_numbers<[1], [0], [0], [1], [0, 0, 1, 1], [], []>} : vector<32x16xbf16>, vector<16x64xbf16>, vector<32x64xf32> -> vector<32x64xf32>
    %135 = arith.addf %128, %134 : vector<32x64xf32>
    %136 = vector.extract_strided_slice %122 {offsets = [4, 0, 0], sizes = [2, 16, 16], strides = [1, 1, 1]} : vector<8x16x16xf32> to vector<2x16x16xf32>
    %137 = vector.shape_cast %136 : vector<2x16x16xf32> to vector<32x16xf32>
    %138 = arith.truncf %137 : vector<32x16xf32> to vector<32x16xbf16>
    %c0_123 = arith.constant 0 : index
    %c2_124 = arith.constant 2 : index
    %c0_125 = arith.constant 0 : index
    %c0_126 = arith.constant 0 : index
    %139 = vector.load %arg16[%c0_123, %c2_124, %c0_125, %c0_126] : memref<1x4x16x64xbf16, #tpu.memory_space<vmem>>, vector<1x1x16x64xbf16>
    %140 = vector.shape_cast %139 : vector<1x1x16x64xbf16> to vector<16x64xbf16>
    %cst_127 = arith.constant dense<0.000000e+00> : vector<32x64xf32>
    %141 = tpu.matmul %138, %140, %cst_127 {dimension_numbers = #tpu.dot_dimension_numbers<[1], [0], [0], [1], [0, 0, 1, 1], [], []>} : vector<32x16xbf16>, vector<16x64xbf16>, vector<32x64xf32> -> vector<32x64xf32>
    %142 = arith.addf %135, %141 : vector<32x64xf32>
    %143 = vector.extract_strided_slice %122 {offsets = [6, 0, 0], sizes = [2, 16, 16], strides = [1, 1, 1]} : vector<8x16x16xf32> to vector<2x16x16xf32>
    %144 = vector.shape_cast %143 : vector<2x16x16xf32> to vector<32x16xf32>
    %145 = arith.truncf %144 : vector<32x16xf32> to vector<32x16xbf16>
    %c0_128 = arith.constant 0 : index
    %c3_129 = arith.constant 3 : index
    %c0_130 = arith.constant 0 : index
    %c0_131 = arith.constant 0 : index
    %146 = vector.load %arg16[%c0_128, %c3_129, %c0_130, %c0_131] : memref<1x4x16x64xbf16, #tpu.memory_space<vmem>>, vector<1x1x16x64xbf16>
    %147 = vector.shape_cast %146 : vector<1x1x16x64xbf16> to vector<16x64xbf16>
    %cst_132 = arith.constant dense<0.000000e+00> : vector<32x64xf32>
    %148 = tpu.matmul %145, %147, %cst_132 {dimension_numbers = #tpu.dot_dimension_numbers<[1], [0], [0], [1], [0, 0, 1, 1], [], []>} : vector<32x16xbf16>, vector<16x64xbf16>, vector<32x64xf32> -> vector<32x64xf32>
    %149 = arith.addf %142, %148 : vector<32x64xf32>
    %c0_133 = arith.constant 0 : index
    %c0_134 = arith.constant 0 : index
    %c0_135 = arith.constant 0 : index
    %150 = vector.load %arg17[%c0_133, %c0_134, %c0_135] : memref<1x1x64xf32, #tpu.memory_space<vmem>>, vector<1x1x64xf32>
    %151 = vector.shape_cast %150 : vector<1x1x64xf32> to vector<1x64xf32>
    %152 = vector.broadcast %151 : vector<1x64xf32> to vector<32x64xf32>
    %153 = arith.addf %149, %152 : vector<32x64xf32>
    %154 = arith.addf %3, %153 : vector<32x64xf32>
    %c0_136 = arith.constant 0 : index
    %c0_137 = arith.constant 0 : index
    %c0_138 = arith.constant 0 : index
    %155 = vector.load %arg18[%c0_136, %c0_137, %c0_138] : memref<1x1x64xf32, #tpu.memory_space<vmem>>, vector<1x1x64xf32>
    %156 = vector.shape_cast %155 : vector<1x1x64xf32> to vector<1x64xf32>
    %c0_139 = arith.constant 0 : index
    %c0_140 = arith.constant 0 : index
    %c0_141 = arith.constant 0 : index
    %157 = vector.load %arg19[%c0_139, %c0_140, %c0_141] : memref<1x1x64xf32, #tpu.memory_space<vmem>>, vector<1x1x64xf32>
    %158 = vector.shape_cast %157 : vector<1x1x64xf32> to vector<1x64xf32>
    %cst_142 = arith.constant dense<0.000000e+00> : vector<32xf32>
    %159 = vector.multi_reduction <add>, %154, %cst_142 [1] : vector<32x64xf32> to vector<32xf32>
    %160 = vector.shape_cast %159 : vector<32xf32> to vector<32x1xf32>
    %cst_143 = arith.constant 6.400000e+01 : f32
    %161 = vector.broadcast %cst_143 : f32 to vector<32x1xf32>
    %162 = arith.divf %160, %161 : vector<32x1xf32>
    %163 = vector.broadcast %162 : vector<32x1xf32> to vector<32x64xf32>
    %164 = arith.subf %154, %163 : vector<32x64xf32>
    %165 = arith.mulf %164, %164 : vector<32x64xf32>
    %cst_144 = arith.constant dense<0.000000e+00> : vector<32xf32>
    %166 = vector.multi_reduction <add>, %165, %cst_144 [1] : vector<32x64xf32> to vector<32xf32>
    %167 = vector.shape_cast %166 : vector<32xf32> to vector<32x1xf32>
    %cst_145 = arith.constant 6.400000e+01 : f32
    %168 = vector.broadcast %cst_145 : f32 to vector<32x1xf32>
    %169 = arith.divf %167, %168 : vector<32x1xf32>
    %170 = vector.broadcast %162 : vector<32x1xf32> to vector<32x64xf32>
    %171 = arith.subf %154, %170 : vector<32x64xf32>
    %cst_146 = arith.constant 9.99999974E-6 : f32
    %172 = vector.broadcast %cst_146 : f32 to vector<32x1xf32>
    %173 = arith.addf %169, %172 : vector<32x1xf32>
    %174 = math.rsqrt %173 : vector<32x1xf32>
    %175 = vector.broadcast %174 : vector<32x1xf32> to vector<32x64xf32>
    %176 = arith.mulf %171, %175 : vector<32x64xf32>
    %177 = vector.broadcast %156 : vector<1x64xf32> to vector<32x64xf32>
    %178 = arith.mulf %176, %177 : vector<32x64xf32>
    %179 = vector.broadcast %158 : vector<1x64xf32> to vector<32x64xf32>
    %180 = arith.addf %178, %179 : vector<32x64xf32>
    %181 = arith.truncf %180 : vector<32x64xf32> to vector<32x64xbf16>
    %c0_147 = arith.constant 0 : index
    %c0_148 = arith.constant 0 : index
    %c0_149 = arith.constant 0 : index
    %182 = vector.load %arg20[%c0_147, %c0_148, %c0_149] : memref<1x64x256xbf16, #tpu.memory_space<vmem>>, vector<1x64x256xbf16>
    %183 = vector.shape_cast %182 : vector<1x64x256xbf16> to vector<64x256xbf16>
    %cst_150 = arith.constant dense<0.000000e+00> : vector<32x256xf32>
    %184 = tpu.matmul %181, %183, %cst_150 {dimension_numbers = #tpu.dot_dimension_numbers<[1], [0], [0], [1], [0, 0, 1, 1], [], []>} : vector<32x64xbf16>, vector<64x256xbf16>, vector<32x256xf32> -> vector<32x256xf32>
    %c0_151 = arith.constant 0 : index
    %c0_152 = arith.constant 0 : index
    %c0_153 = arith.constant 0 : index
    %185 = vector.load %arg21[%c0_151, %c0_152, %c0_153] : memref<1x1x256xf32, #tpu.memory_space<vmem>>, vector<1x1x256xf32>
    %186 = vector.shape_cast %185 : vector<1x1x256xf32> to vector<1x256xf32>
    %187 = vector.broadcast %186 : vector<1x256xf32> to vector<32x256xf32>
    %188 = arith.addf %184, %187 : vector<32x256xf32>
    %189 = arith.mulf %188, %188 : vector<32x256xf32>
    %190 = arith.mulf %188, %189 : vector<32x256xf32>
    %cst_154 = arith.constant 4.471500e-02 : f32
    %191 = vector.broadcast %cst_154 : f32 to vector<32x256xf32>
    %192 = arith.mulf %191, %190 : vector<32x256xf32>
    %193 = arith.addf %188, %192 : vector<32x256xf32>
    %cst_155 = arith.constant 0.797884583 : f32
    %194 = vector.broadcast %cst_155 : f32 to vector<32x256xf32>
    %195 = arith.mulf %194, %193 : vector<32x256xf32>
    %196 = math.tanh %195 : vector<32x256xf32>
    %cst_156 = arith.constant 1.000000e+00 : f32
    %197 = vector.broadcast %cst_156 : f32 to vector<32x256xf32>
    %198 = arith.addf %197, %196 : vector<32x256xf32>
    %cst_157 = arith.constant 5.000000e-01 : f32
    %199 = vector.broadcast %cst_157 : f32 to vector<32x256xf32>
    %200 = arith.mulf %199, %198 : vector<32x256xf32>
    %201 = arith.mulf %188, %200 : vector<32x256xf32>
    %202 = arith.truncf %201 : vector<32x256xf32> to vector<32x256xbf16>
    %c0_158 = arith.constant 0 : index
    %c0_159 = arith.constant 0 : index
    %c0_160 = arith.constant 0 : index
    %203 = vector.load %arg22[%c0_158, %c0_159, %c0_160] : memref<1x256x64xbf16, #tpu.memory_space<vmem>>, vector<1x256x64xbf16>
    %204 = vector.shape_cast %203 : vector<1x256x64xbf16> to vector<256x64xbf16>
    %cst_161 = arith.constant dense<0.000000e+00> : vector<32x64xf32>
    %205 = tpu.matmul %202, %204, %cst_161 {dimension_numbers = #tpu.dot_dimension_numbers<[1], [0], [0], [1], [0, 0, 1, 1], [], []>} : vector<32x256xbf16>, vector<256x64xbf16>, vector<32x64xf32> -> vector<32x64xf32>
    %c0_162 = arith.constant 0 : index
    %c0_163 = arith.constant 0 : index
    %c0_164 = arith.constant 0 : index
    %206 = vector.load %arg23[%c0_162, %c0_163, %c0_164] : memref<1x1x64xf32, #tpu.memory_space<vmem>>, vector<1x1x64xf32>
    %207 = vector.shape_cast %206 : vector<1x1x64xf32> to vector<1x64xf32>
    %208 = vector.broadcast %207 : vector<1x64xf32> to vector<32x64xf32>
    %209 = arith.addf %205, %208 : vector<32x64xf32>
    %210 = arith.addf %180, %209 : vector<32x64xf32>
    %c0_165 = arith.constant 0 : index
    %c0_166 = arith.constant 0 : index
    %c0_167 = arith.constant 0 : index
    %211 = vector.load %arg24[%c0_165, %c0_166, %c0_167] : memref<1x1x64xf32, #tpu.memory_space<vmem>>, vector<1x1x64xf32>
    %212 = vector.shape_cast %211 : vector<1x1x64xf32> to vector<1x64xf32>
    %c0_168 = arith.constant 0 : index
    %c0_169 = arith.constant 0 : index
    %c0_170 = arith.constant 0 : index
    %213 = vector.load %arg25[%c0_168, %c0_169, %c0_170] : memref<1x1x64xf32, #tpu.memory_space<vmem>>, vector<1x1x64xf32>
    %214 = vector.shape_cast %213 : vector<1x1x64xf32> to vector<1x64xf32>
    %cst_171 = arith.constant dense<0.000000e+00> : vector<32xf32>
    %215 = vector.multi_reduction <add>, %210, %cst_171 [1] : vector<32x64xf32> to vector<32xf32>
    %216 = vector.shape_cast %215 : vector<32xf32> to vector<32x1xf32>
    %cst_172 = arith.constant 6.400000e+01 : f32
    %217 = vector.broadcast %cst_172 : f32 to vector<32x1xf32>
    %218 = arith.divf %216, %217 : vector<32x1xf32>
    %219 = vector.broadcast %218 : vector<32x1xf32> to vector<32x64xf32>
    %220 = arith.subf %210, %219 : vector<32x64xf32>
    %221 = arith.mulf %220, %220 : vector<32x64xf32>
    %cst_173 = arith.constant dense<0.000000e+00> : vector<32xf32>
    %222 = vector.multi_reduction <add>, %221, %cst_173 [1] : vector<32x64xf32> to vector<32xf32>
    %223 = vector.shape_cast %222 : vector<32xf32> to vector<32x1xf32>
    %cst_174 = arith.constant 6.400000e+01 : f32
    %224 = vector.broadcast %cst_174 : f32 to vector<32x1xf32>
    %225 = arith.divf %223, %224 : vector<32x1xf32>
    %226 = vector.broadcast %218 : vector<32x1xf32> to vector<32x64xf32>
    %227 = arith.subf %210, %226 : vector<32x64xf32>
    %cst_175 = arith.constant 9.99999974E-6 : f32
    %228 = vector.broadcast %cst_175 : f32 to vector<32x1xf32>
    %229 = arith.addf %225, %228 : vector<32x1xf32>
    %230 = math.rsqrt %229 : vector<32x1xf32>
    %231 = vector.broadcast %230 : vector<32x1xf32> to vector<32x64xf32>
    %232 = arith.mulf %227, %231 : vector<32x64xf32>
    %233 = vector.broadcast %212 : vector<1x64xf32> to vector<32x64xf32>
    %234 = arith.mulf %232, %233 : vector<32x64xf32>
    %235 = vector.broadcast %214 : vector<1x64xf32> to vector<32x64xf32>
    %236 = arith.addf %234, %235 : vector<32x64xf32>
    %c0_176 = arith.constant 0 : index
    %c0_177 = arith.constant 0 : index
    %237 = vector.load %arg28[%c0_176, %c0_177] : memref<32x64xf32, #tpu.memory_space<vmem>>, vector<32x64xf32>
    tpu.vector_store %arg28[%c0_176, %c0_177], %236 {strides = array<i32>} : memref<32x64xf32, #tpu.memory_space<vmem>>, vector<32x64xf32>,
    %c1_i32 = arith.constant 1 : i32
    %238 = arith.cmpi eq, %arg0, %c1_i32 : i32
    %239 = arith.extui %238 : i1 to i32
    %c0_i32_178 = arith.constant 0 : i32
    %240 = arith.cmpi ne, %239, %c0_i32_178 : i32
    scf.if %240 {
      %c0_179 = arith.constant 0 : index
      %c0_180 = arith.constant 0 : index
      %241 = vector.load %arg7[%c0_179, %c0_180] : memref<1x64xf32, #tpu.memory_space<vmem>>, vector<1x64xf32>
      %c0_181 = arith.constant 0 : index
      %c0_182 = arith.constant 0 : index
      %242 = vector.load %arg8[%c0_181, %c0_182] : memref<1x64xf32, #tpu.memory_space<vmem>>, vector<1x64xf32>
      %cst_183 = arith.constant dense<0.000000e+00> : vector<32xf32>
      %243 = vector.multi_reduction <add>, %236, %cst_183 [1] : vector<32x64xf32> to vector<32xf32>
      %244 = vector.shape_cast %243 : vector<32xf32> to vector<32x1xf32>
      %cst_184 = arith.constant 6.400000e+01 : f32
      %245 = vector.broadcast %cst_184 : f32 to vector<32x1xf32>
      %246 = arith.divf %244, %245 : vector<32x1xf32>
      %247 = vector.broadcast %246 : vector<32x1xf32> to vector<32x64xf32>
      %248 = arith.subf %236, %247 : vector<32x64xf32>
      %249 = arith.mulf %248, %248 : vector<32x64xf32>
      %cst_185 = arith.constant dense<0.000000e+00> : vector<32xf32>
      %250 = vector.multi_reduction <add>, %249, %cst_185 [1] : vector<32x64xf32> to vector<32xf32>
      %251 = vector.shape_cast %250 : vector<32xf32> to vector<32x1xf32>
      %cst_186 = arith.constant 6.400000e+01 : f32
      %252 = vector.broadcast %cst_186 : f32 to vector<32x1xf32>
      %253 = arith.divf %251, %252 : vector<32x1xf32>
      %254 = vector.broadcast %246 : vector<32x1xf32> to vector<32x64xf32>
      %255 = arith.subf %236, %254 : vector<32x64xf32>
      %cst_187 = arith.constant 9.99999974E-6 : f32
      %256 = vector.broadcast %cst_187 : f32 to vector<32x1xf32>
      %257 = arith.addf %253, %256 : vector<32x1xf32>
      %258 = math.rsqrt %257 : vector<32x1xf32>
      %259 = vector.broadcast %258 : vector<32x1xf32> to vector<32x64xf32>
      %260 = arith.mulf %255, %259 : vector<32x64xf32>
      %261 = vector.broadcast %241 : vector<1x64xf32> to vector<32x64xf32>
      %262 = arith.mulf %260, %261 : vector<32x64xf32>
      %263 = vector.broadcast %242 : vector<1x64xf32> to vector<32x64xf32>
      %264 = arith.addf %262, %263 : vector<32x64xf32>
      %c0_188 = arith.constant 0 : index
      %c0_189 = arith.constant 0 : index
      %265 = vector.load %arg26[%c0_188, %c0_189] : memref<32x64xf32, #tpu.memory_space<vmem>>, vector<32x64xf32>
      tpu.vector_store %arg26[%c0_188, %c0_189], %264 {strides = array<i32>} : memref<32x64xf32, #tpu.memory_space<vmem>>, vector<32x64xf32>,
      %266 = arith.truncf %264 : vector<32x64xf32> to vector<32x64xbf16>
      %c0_190 = arith.constant 0 : index
      %c0_191 = arith.constant 0 : index
      %267 = vector.load %arg9[%c0_190, %c0_191] : memref<64x128xbf16, #tpu.memory_space<vmem>>, vector<64x128xbf16>
      %cst_192 = arith.constant dense<0.000000e+00> : vector<32x128xf32>
      %268 = tpu.matmul %266, %267, %cst_192 {dimension_numbers = #tpu.dot_dimension_numbers<[1], [0], [0], [1], [0, 0, 1, 1], [], []>} : vector<32x64xbf16>, vector<64x128xbf16>, vector<32x128xf32> -> vector<32x128xf32>
      %c0_193 = arith.constant 0 : index
      %c0_194 = arith.constant 0 : index
      %269 = vector.load %arg27[%c0_193, %c0_194] : memref<32x128xf32, #tpu.memory_space<vmem>>, vector<32x128xf32>
      tpu.vector_store %arg27[%c0_193, %c0_194], %268 {strides = array<i32>} : memref<32x128xf32, #tpu.memory_space<vmem>>, vector<32x128xf32>,
    } else {
    }
    return
  }
  func.func @transform_0(%arg0: i32) -> (i32, i32) {
    %c0_i32 = arith.constant 0 : i32
    %c0_i32_0 = arith.constant 0 : i32
    %c0_i32_1 = arith.constant 0 : i32
    return %c0_i32, %c0_i32_0 : i32, i32
  }
  func.func @transform_1(%arg0: i32) -> (i32, i32) {
    %c0_i32 = arith.constant 0 : i32
    %c0_i32_0 = arith.constant 0 : i32
    %c0_i32_1 = arith.constant 0 : i32
    return %c0_i32, %c0_i32_0 : i32, i32
  }
  func.func @transform_2(%arg0: i32) -> (i32, i32) {
    %c0_i32 = arith.constant 0 : i32
    %c0_i32_0 = arith.constant 0 : i32
    %c0_i32_1 = arith.constant 0 : i32
    return %c0_i32, %c0_i32_0 : i32, i32
  }
  func.func @transform_3(%arg0: i32) -> (i32, i32) {
    %c0_i32 = arith.constant 0 : i32
    %c0_i32_0 = arith.constant 0 : i32
    %c0_i32_1 = arith.constant 0 : i32
    return %c0_i32, %c0_i32_0 : i32, i32
  }
  func.func @transform_4(%arg0: i32) -> (i32, i32) {
    %c0_i32 = arith.constant 0 : i32
    %c0_i32_0 = arith.constant 0 : i32
    %c0_i32_1 = arith.constant 0 : i32
    return %c0_i32, %c0_i32_0 : i32, i32
  }
  func.func @transform_5(%arg0: i32) -> (i32, i32) {
    %c0_i32 = arith.constant 0 : i32
    %c0_i32_0 = arith.constant 0 : i32
    %c0_i32_1 = arith.constant 0 : i32
    return %c0_i32, %c0_i32_0 : i32, i32
  }
  func.func @transform_6(%arg0: i32) -> (i32, i32) {
    %c0_i32 = arith.constant 0 : i32
    %c0_i32_0 = arith.constant 0 : i32
    %c0_i32_1 = arith.constant 0 : i32
    return %c0_i32, %c0_i32_0 : i32, i32
  }
  func.func @transform_7(%arg0: i32) -> (i32, i32) {
    %c0_i32 = arith.constant 0 : i32
    %c0_i32_0 = arith.constant 0 : i32
    %c0_i32_1 = arith.constant 0 : i32
    return %c0_i32, %c0_i32_0 : i32, i32
  }
  func.func @transform_8(%arg0: i32) -> (i32, i32) {
    %c0_i32 = arith.constant 0 : i32
    %c0_i32_0 = arith.constant 0 : i32
    %c0_i32_1 = arith.constant 0 : i32
    return %c0_i32, %c0_i32_0 : i32, i32
  }
  func.func @transform_9(%arg0: i32) -> (i32, i32, i32, i32) {
    %c0_i32 = arith.constant 0 : i32
    %c0_i32_0 = arith.constant 0 : i32
    %c0_i32_1 = arith.constant 0 : i32
    %c0_i32_2 = arith.constant 0 : i32
    return %arg0, %c0_i32, %c0_i32_0, %c0_i32_1 : i32, i32, i32, i32
  }
  func.func @transform_10(%arg0: i32) -> (i32, i32, i32, i32) {
    %c0_i32 = arith.constant 0 : i32
    %c0_i32_0 = arith.constant 0 : i32
    %c0_i32_1 = arith.constant 0 : i32
    %c0_i32_2 = arith.constant 0 : i32
    return %arg0, %c0_i32, %c0_i32_0, %c0_i32_1 : i32, i32, i32, i32
  }
  func.func @transform_11(%arg0: i32) -> (i32, i32, i32, i32) {
    %c0_i32 = arith.constant 0 : i32
    %c0_i32_0 = arith.constant 0 : i32
    %c0_i32_1 = arith.constant 0 : i32
    %c0_i32_2 = arith.constant 0 : i32
    return %arg0, %c0_i32, %c0_i32_0, %c0_i32_1 : i32, i32, i32, i32
  }
  func.func @transform_12(%arg0: i32) -> (i32, i32, i32, i32) {
    %c0_i32 = arith.constant 0 : i32
    %c0_i32_0 = arith.constant 0 : i32
    %c0_i32_1 = arith.constant 0 : i32
    %c0_i32_2 = arith.constant 0 : i32
    return %arg0, %c0_i32, %c0_i32_0, %c0_i32_1 : i32, i32, i32, i32
  }
  func.func @transform_13(%arg0: i32) -> (i32, i32, i32, i32) {
    %c0_i32 = arith.constant 0 : i32
    %c0_i32_0 = arith.constant 0 : i32
    %c0_i32_1 = arith.constant 0 : i32
    %c0_i32_2 = arith.constant 0 : i32
    return %arg0, %c0_i32, %c0_i32_0, %c0_i32_1 : i32, i32, i32, i32
  }
  func.func @transform_14(%arg0: i32) -> (i32, i32, i32, i32) {
    %c0_i32 = arith.constant 0 : i32
    %c0_i32_0 = arith.constant 0 : i32
    %c0_i32_1 = arith.constant 0 : i32
    %c0_i32_2 = arith.constant 0 : i32
    return %arg0, %c0_i32, %c0_i32_0, %c0_i32_1 : i32, i32, i32, i32
  }
  func.func @transform_15(%arg0: i32) -> (i32, i32, i32, i32) {
    %c0_i32 = arith.constant 0 : i32
    %c0_i32_0 = arith.constant 0 : i32
    %c0_i32_1 = arith.constant 0 : i32
    %c0_i32_2 = arith.constant 0 : i32
    return %arg0, %c0_i32, %c0_i32_0, %c0_i32_1 : i32, i32, i32, i32
  }
  func.func @transform_16(%arg0: i32) -> (i32, i32, i32) {
    %c0_i32 = arith.constant 0 : i32
    %c0_i32_0 = arith.constant 0 : i32
    %c0_i32_1 = arith.constant 0 : i32
    return %arg0, %c0_i32, %c0_i32_0 : i32, i32, i32
  }
  func.func @transform_17(%arg0: i32) -> (i32, i32, i32) {
    %c0_i32 = arith.constant 0 : i32
    %c0_i32_0 = arith.constant 0 : i32
    %c0_i32_1 = arith.constant 0 : i32
    return %arg0, %c0_i32, %c0_i32_0 : i32, i32, i32
  }
  func.func @transform_18(%arg0: i32) -> (i32, i32, i32) {
    %c0_i32 = arith.constant 0 : i32
    %c0_i32_0 = arith.constant 0 : i32
    %c0_i32_1 = arith.constant 0 : i32
    return %arg0, %c0_i32, %c0_i32_0 : i32, i32, i32
  }
  func.func @transform_19(%arg0: i32) -> (i32, i32, i32) {
    %c0_i32 = arith.constant 0 : i32
    %c0_i32_0 = arith.constant 0 : i32
    %c0_i32_1 = arith.constant 0 : i32
    return %arg0, %c0_i32, %c0_i32_0 : i32, i32, i32
  }
  func.func @transform_20(%arg0: i32) -> (i32, i32, i32) {
    %c0_i32 = arith.constant 0 : i32
    %c0_i32_0 = arith.constant 0 : i32
    %c0_i32_1 = arith.constant 0 : i32
    return %arg0, %c0_i32, %c0_i32_0 : i32, i32, i32
  }
  func.func @transform_21(%arg0: i32) -> (i32, i32, i32) {
    %c0_i32 = arith.constant 0 : i32
    %c0_i32_0 = arith.constant 0 : i32
    %c0_i32_1 = arith.constant 0 : i32
    return %arg0, %c0_i32, %c0_i32_0 : i32, i32, i32
  }
  func.func @transform_22(%arg0: i32) -> (i32, i32, i32) {
    %c0_i32 = arith.constant 0 : i32
    %c0_i32_0 = arith.constant 0 : i32
    %c0_i32_1 = arith.constant 0 : i32
    return %arg0, %c0_i32, %c0_i32_0 : i32, i32, i32
  }
  func.func @transform_23(%arg0: i32) -> (i32, i32, i32) {
    %c0_i32 = arith.constant 0 : i32
    %c0_i32_0 = arith.constant 0 : i32
    %c0_i32_1 = arith.constant 0 : i32
    return %arg0, %c0_i32, %c0_i32_0 : i32, i32, i32
  }
  func.func @transform_24(%arg0: i32) -> (i32, i32, i32) {
    %c0_i32 = arith.constant 0 : i32
    %c0_i32_0 = arith.constant 0 : i32
    %c0_i32_1 = arith.constant 0 : i32
    return %arg0, %c0_i32, %c0_i32_0 : i32, i32, i32
  }
  func.func @transform_25(%arg0: i32) -> (i32, i32) {
    %c0_i32 = arith.constant 0 : i32
    %c0_i32_0 = arith.constant 0 : i32
    %c0_i32_1 = arith.constant 0 : i32
    return %c0_i32, %c0_i32_0 : i32, i32
  }
  func.func @transform_26(%arg0: i32) -> (i32, i32) {
    %c0_i32 = arith.constant 0 : i32
    %c0_i32_0 = arith.constant 0 : i32
    %c0_i32_1 = arith.constant 0 : i32
    return %c0_i32, %c0_i32_0 : i32, i32
  }
}

</mosaic_0001>

<bundles_post_ra>
// kernel: hebbian_lm_forward.1
= control target key start
LH: loop header
LB: loop body
LE: loop exit
PB: predicated region body
PF: predicated region fallthrough
CT: control target
= control target key end

     0   :  { %s6803_s0 = inlined_call_operand.vmem [shape: s32[32,1], index: 0, kind: input, shape index: {}]   ;;  %s6804_s1 = inlined_call_operand.vmem [shape: f32[2,16], index: 1, kind: input, shape index: {}]   ;;  %s6805_s2 = inlined_call_operand.vmem [shape: f32[128,64], index: 2, kind: input, shape index: {}]   ;;  %s6806_s3 = inlined_call_operand.vmem [shape: f32[16,64], index: 3, kind: input, shape index: {}]   ;;  %s6807_s4 = inlined_call_operand.vmem [shape: f32[1,64], index: 4, kind: input, shape index: {}]   ;;  %s6808_s5 = inlined_call_operand.vmem [shape: f32[1,64], index: 5, kind: input, shape index: {}]   ;;  %s6809_s6 = inlined_call_operand.vmem [shape: f32[1,64], index: 6, kind: input, shape index: {}]   ;;  %s6810_s7 = inlined_call_operand.vmem [shape: f32[1,64], index: 7, kind: input, shape index: {}]   ;;  %s6811_s8 = inlined_call_operand.vmem [shape: bf16[64,128], index: 8, kind: input, shape index: {}]   ;;  %s6812_s9 = inlined_call_operand.vmem [shape: bf16[2,4,64,16], index: 9, kind: input, shape index: {}]   ;;  %s6813_s10 = inlined_call_operand.vmem [shape: f32[2,4,1,16], index: 10, kind: input, shape index: {}]   ;;  %s6814_s11 = inlined_call_operand.vmem [shape: bf16[2,4,64,16], index: 11, kind: input, shape index: {}]   ;;  %s6815_s12 = inlined_call_operand.vmem [shape: f32[2,4,1,16], index: 12, kind: input, shape index: {}]   ;;  %s6816_s13 = inlined_call_operand.vmem [shape: bf16[2,4,64,16], index: 13, kind: input, shape index: {}]   ;;  %s6817_s14 = inlined_call_operand.vmem [shape: f32[2,4,1,16], index: 14, kind: input, shape index: {}]   ;;  %s6818_s15 = inlined_call_operand.vmem [shape: bf16[2,4,16,64], index: 15, kind: input, shape index: {}]   ;;  %s6819_s16 = inlined_call_operand.vmem [shape: f32[2,1,64], index: 16, kind: input, shape index: {}]   ;;  %s6820_s17 = inlined_call_operand.vmem [shape: f32[2,1,64], index: 17, kind: input, shape index: {}]   ;;  %s6821_s18 = inlined_call_operand.vmem [shape: f32[2,1,64], index: 18, kind: input, shape index: {}]   ;;  %s6822_s19 = inlined_call_operand.vmem [shape: bf16[2,64,256], index: 19, kind: input, shape index: {}]   ;;  %s6823_s20 = inlined_call_operand.vmem [shape: f32[2,1,256], index: 20, kind: input, shape index: {}]   ;;  %s6824_s21 = inlined_call_operand.vmem [shape: bf16[2,256,64], index: 21, kind: input, shape index: {}]   ;;  %s6825_s22 = inlined_call_operand.vmem [shape: f32[2,1,64], index: 22, kind: input, shape index: {}]   ;;  %s6826_s23 = inlined_call_operand.vmem [shape: f32[2,1,64], index: 23, kind: input, shape index: {}]   ;;  %s6827_s24 = inlined_call_operand.vmem [shape: f32[2,1,64], index: 24, kind: input, shape index: {}]   ;;  %s6828_s25 = inlined_call_operand.hbm [shape: f32[32,64], index: 25, kind: output, shape index: {0}]   ;;  %s6829_s26 = inlined_call_operand.hbm [shape: f32[32,128], index: 26, kind: output, shape index: {1}]  }
   0x1   :  { %6843 = sst [smem:[#allocation16_spill]] %s6803_s0 }
   0x2   :  { %6844 = sst [smem:[#allocation17_spill]] %s6804_s1 }
   0x3   :  { %6845 = sst [smem:[#allocation18_spill]] %s6805_s2 }
   0x4   :  { %6846 = sst [smem:[#allocation19_spill]] %s6806_s3 }
   0x5   :  { %6847 = sst [smem:[#allocation20_spill]] %s6807_s4 }
   0x6   :  { %6848 = sst [smem:[#allocation21_spill]] %s6808_s5 }
   0x7   :  { %6849 = sst [smem:[#allocation22_spill]] %s6809_s6 }
   0x8   :  { %6850 = sst [smem:[#allocation23_spill]] %s6810_s7 }
   0x9   :  { %6851 = sst [smem:[#allocation24_spill]] %s6811_s8 }
   0xa   :  { %6852 = sst [smem:[#allocation25_spill]] %s6812_s9 }
   0xb   :  { %6853 = sst [smem:[#allocation26_spill]] %s6813_s10 }
   0xc   :  { %6854 = sst [smem:[#allocation27_spill]] %s6814_s11 }
   0xd   :  { %6855 = sst [smem:[#allocation28_spill]] %s6815_s12 }
   0xe   :  { %6856 = sst [smem:[#allocation29_spill]] %s6816_s13 }
   0xf   :  { %6857 = sst [smem:[#allocation30_spill]] %s6817_s14 }
  0x10   :  { %6858 = sst [smem:[#allocation31_spill]] %s6818_s15 }
  0x11   :  { %6859 = sst [smem:[#allocation32_spill]] %s6828_s25 }
  0x12   :  { %6860 = sst [smem:[#allocation33_spill]] %s6829_s26 }
  0x13   :  { %32 = vsyncpa [#allocation5], 0 }
  0x14   :  { %33 = vsyncpa [#allocation7], 0  ;;  %s5849_s27 = smov 0  }
  0x15 LB: > { %6861 = sst [smem:[#allocation10_spill]] %s5701_s27  ;;  %s5855_s3 = sadd.s32 4294967295, %s5701_s27   ;;  %s5701_s27 = sphi %s5849_s27, %s39_s27  }
  0x16   : > { %6862 = sst [smem:[#allocation11_spill]] %s5855_s3  ;;  %p4577_p0 = scmp.ge.s32.totalorder %s5701_s27, 1 }
  0x17   : > { %p841_p1 = scmp.lt.s32.totalorder %s5701_s27, 3 }
  0x19   : > { %p842_p2 = pnand %p4577_p0, %p841_p1 }
  0x1b   : > { %845 = sbr.rel (%p842_p2) target bundleno = 3744 (0xea0), region = 120 }
  0x22   : > { %p965_p3 = scmp.lt.s32.totalorder %s5855_s3, 1  ;;  %s6863_s0 = sld [smem:[#allocation25_spill]] }
  0x23   : > { %s6864_s5 = sld [smem:[#allocation26_spill]]  ;;  %s6866_s11 = sld [smem:[#allocation27_spill]] }
  0x24   : > { %s5861_s7 = scalar_select %p965_p3, %s5855_s3, 1 }
  0x25   : > { %s6868_s12 = sld [smem:[#allocation28_spill]]  ;;  %s6870_s13 = sld [smem:[#allocation29_spill]] }
  0x26   : > { %s4852_s28 = sshll.u32 %s5861_s7, 7  ;;  %s4580_s8 = sshll.u32 %s5861_s7, 2 }
  0x27   : > { %s6871_s14 = sld [smem:[#allocation30_spill]]  ;;  %s4855_s6 = sshll.u32 %s5861_s7, 5 }
  0x28   : > { %s5868_s9 = scalar_lea.vmem %s6863_s0, %s4852_s28  ;;  %s6873_s15 = sld [smem:[#allocation31_spill]] }
  0x29   : > { %s5873_s10 = scalar_lea.vmem %s6864_s5, %s4580_s8  ;;  %s5878_s27 = scalar_lea.vmem %s6866_s11, %s4852_s28 }
  0x2a   : > { %6865 = sst [smem:[#allocation12_spill]] %s5873_s10  ;;  %s4591_s11 = sshll.u32 %s5861_s7, 1 }
  0x2b   : > { %6867 = sst [smem:[#allocation13_spill]] %s5878_s27  ;;  %s5883_s3 = scalar_lea.vmem %s6868_s12, %s4580_s8 }
  0x2c   : > { %6869 = sst [smem:[#allocation14_spill]] %s5883_s3  ;;  %s5888_s0 = scalar_lea.vmem %s6870_s13, %s4852_s28 }
  0x2d   : > { %s5893_s5 = scalar_lea.vmem %s6871_s14, %s4580_s8  ;;  %s4856_s8 = sshll.u32 %s5861_s7, 6 }
  0x2e   : > { %6872 = sst [smem:[#allocation15_spill]] %s5893_s5  ;;  %s5903_s26 = scalar_lea.vmem %s6873_s15, %s4855_s6 }
  0x2f   : > { %s5917_s5 = scalar_lea.vmem %s6822_s19, %s4856_s8  ;;  %s5923_s27 = scalar_lea.vmem %s6823_s20, %s4591_s11 }
  0x30   : > { %s5928_s12 = scalar_lea.vmem %s6824_s21, %s4852_s28  ;;  %s1022_s29 = scalar_lea.vmem %s6825_s22, %s5861_s7 }
  0x31   : > { %s1025_s14 = scalar_lea.vmem %s6826_s23, %s5861_s7  ;;  %s1028_s15 = scalar_lea.vmem %s6827_s24, %s5861_s7 }
  0x32   : > { %s6874_s10 = sld [smem:[#allocation11_spill]] }
  0x38   : > { %p4594_p4 = scmp.ne.s32.totalorder %s6874_s10, 0 }
  0x39   : > { %s6875_s6 = sld [smem:[#allocation17_spill]] (!%p4594_p4)  ;;  %v1038_v1 = vlaneseq (!%p4594_p4)  ;;  %v5703_v2 = vmov (!%p4594_p4), 1966171168   ;;  %v5704_v4 = vmov (!%p4594_p4), 0   ;;  %s6876_s30 = sld [smem:[#allocation16_spill]] (!%p4594_p4)  ;;  %vm1308_vm7 = vcmask (!%p4594_p4), 130048  }
  0x3a   : > { %1033 = sbr.rel (%p4594_p4) target bundleno = 732 (0x2dc), region = 124  ;;  %v1261_v3 = vunpack.c.l.s4 (!%p4594_p4), %v5703_v2  ;;  %5434 = vset.pattern.permute.xlu1 (!%p4594_p4), %v5704_v4  ;;  %5433 = vset.pattern.permute.xlu0 (!%p4594_p4), %v5704_v4  ;;  %s6877_s11 = sld [smem:[#allocation18_spill]] (!%p4594_p4)  ;;  %v5705_v40 = vmov (!%p4594_p4), -1e+09   ;;  %v5706_v56 = vmov (!%p4594_p4), 1.0  }
  0x3b   : > { %v5952_v7 = vshrl.u32 (!%p4594_p4), %v1038_v1, 7  ;;  %v5981_v24 = vand.u32 (!%p4594_p4), 127, %v1038_v1  ;;  %s6880_s25 = sld [smem:[#allocation19_spill]] (!%p4594_p4)  ;;  %s6881_s10 = sld [smem:[#allocation20_spill]] (!%p4594_p4) }
  0x3c   : > { %v1262_v11 = vunpack.c.0.s8 (!%p4594_p4), %v1261_v3  ;;  %s6882_s28 = sld [smem:[#allocation21_spill]] (!%p4594_p4) }
  0x3d   : > { %v1249_v21 = vadd.s32 (!%p4594_p4), 8, %v5952_v7  ;;  %v1292_v27 = vsub.s32 (!%p4594_p4), 0, %v5952_v7  ;;  %vm1254_vm2 = vcmp.gt.s32.totalorder (!%p4594_p4), %v5981_v24, %v5952_v7  ;;  %vm1250_vm4 = vcmp.le.s32.totalorder (!%p4594_p4), %v5981_v24, %v5952_v7 }
  0x3e   : > { %v1265_v17 = vsub.s32 (!%p4594_p4), %v1262_v11, %v5952_v7 }
  0x3f   : > { %v1257_v0 = vld [vmem:[%s6875_s6] sm:$0x3] (!%p4594_p4)  ;;  %v1035_v5 = vld [vmem:[%s6876_s30 + $0x8] sm:$0xff] (!%p4594_p4)  ;;  %v1037_v8 = vld [vmem:[%s6876_s30 + $0x18] sm:$0xff] (!%p4594_p4)  ;;  %vm1251_vm1 = vcmp.le.s32.totalorder (!%p4594_p4), %v5981_v24, %v1249_v21 }
  0x40   : > { %vm1258_vm0 = vcmp.gt.f32.partialorder (!%p4594_p4), %v1257_v0, 0.0  ;;  %v1034_v6 = vld [vmem:[%s6876_s30] sm:$0xff] (!%p4594_p4)  ;;  %1044 = vperm.xlu1 (!%p4594_p4), %5434, %v1035_v5   ;;  %v1065_v10 = vld [vmem:[%s6877_s11 + $0x8] sm:$0xff] (!%p4594_p4)  ;;  %v1036_v12 = vld [vmem:[%s6876_s30 + $0x10] sm:$0xff] (!%p4594_p4) }
  0x41   : > { %1041 = vperm.xlu0 %5433, %v1034_v6   ;;  %v1064_v9 = vld [vmem:[%s6877_s11] sm:$0xff]  ;;  %v1066_v14 = vld [vmem:[%s6877_s11 + $0x10] sm:$0xff]  ;;  %v1067_v15 = vld [vmem:[%s6877_s11 + $0x18] sm:$0xff]  ;;  %v1259_v16 = vsel %vm1258_vm0, 1, %v5704_v4 }
  0x42   : > { %v5342_v13 = vpack.c.bf16 %v1065_v10, %v1064_v9  ;;  %v5346_v18 = vpack.c.bf16 %v1067_v15, %v1066_v14  ;;  %v1068_v19 = vld [vmem:[%s6877_s11 + $0x20] sm:$0xff]  ;;  %v1069_v20 = vld [vmem:[%s6877_s11 + $0x28] sm:$0xff]  ;;  %v1266_v22 = vrot.slane %v1259_v16, %v1265_v17  ;;  %v1070_v28 = vld [vmem:[%s6877_s11 + $0x30] sm:$0xff] }
  0x43   : > { %v5350_v23 = vpack.c.bf16 %v1069_v20, %v1068_v19  ;;  %v1071_v29 = vld [vmem:[%s6877_s11 + $0x38] sm:$0xff]  ;;  %v1072_v34 = vld [vmem:[%s6877_s11 + $0x40] sm:$0xff]  ;;  %v1073_v35 = vld [vmem:[%s6877_s11 + $0x48] sm:$0xff] }
  0x44   : > { %5343 = vmatprep.subr.bf16.mxu0 %v5342_v13  ;;  %5374 = vmatprep.subr.bf16.mxu1 %v5342_v13  ;;  %v1267_v25 = vcombine.high %v1266_v22, %v1266_v22  ;;  %v1274_v26 = vrot.slane %v1266_v22, %v1265_v17  ;;  %v5354_v32 = vpack.c.bf16 %v1071_v29, %v1070_v28  ;;  %vm6003_vm6 = vmand %vm1251_vm1, %vm1254_vm2  ;;  %v1074_v42 = vld [vmem:[%s6877_s11 + $0x50] sm:$0xff]  ;;  %v1075_v43 = vld [vmem:[%s6877_s11 + $0x58] sm:$0xff]  ;;  %vm1169_vm2 = vcmask 523264  }
  0x45   : > { %1050 = vperm.xlu1 %5434, %v1037_v8   ;;  %1047 = vperm.xlu0 %5433, %v1036_v12   ;;  %v5358_v39 = vpack.c.bf16 %v1073_v35, %v1072_v34  ;;  %v5362_v47 = vpack.c.bf16 %v1075_v43, %v1074_v42  ;;  %v1076_v48 = vld [vmem:[%s6877_s11 + $0x60] sm:$0xff]  ;;  %v1077_v49 = vld [vmem:[%s6877_s11 + $0x68] sm:$0xff]  ;;  %v1078_v51 = vld [vmem:[%s6877_s11 + $0x70] sm:$0xff] }
  0x46   : > { %5345 = vmatpush3.bf16.msra.mxu0 %v5342_v13  ;;  %5382 = vmatpush3.bf16.msra.mxu1 %v5342_v13  ;;  %v1281_v30 = vrot.slane %v1267_v25, %v1265_v17  ;;  %vm1282_vm3 = vcmp.ne.s32.totalorder %v1274_v26, 0  ;;  %v5366_v50 = vpack.c.bf16 %v1077_v49, %v1076_v48  ;;  %v1079_v52 = vld [vmem:[%s6877_s11 + $0x78] sm:$0xff]  ;;  %v1081_v59 = vld [vmem:[%s6880_s25 + $0x8] sm:$0xff]  ;;  %v1080_v60 = vld [vmem:[%s6880_s25] sm:$0xff] }
  0x47   : > { %5347 = vmatprep.subr.bf16.mxu0 %v5346_v18  ;;  %5375 = vmatprep.subr.bf16.mxu1 %v5346_v18  ;;  %v1288_v31 = vsel %vm1282_vm3, 1, %v5704_v4  ;;  %v5370_v53 = vpack.c.bf16 %v1079_v52, %v1078_v51  ;;  %v4603_v42 = vld [vmem:[%s6881_s10] ss:$0 sm:$0xff] }
  0x48   : > { %vm1283_vm5 = vcmp.ne.s32.totalorder %v1281_v30, 0  ;;  %v1293_v33 = vrot.slane %v1288_v31, %v1292_v27 }
  0x49   : > { %v1289_v37 = vsel %vm1283_vm5, 1, %v5704_v4 }
  0x4a   : > { %5349 = vmatpush3.bf16.msra.mxu0 %v5346_v18  ;;  %5383 = vmatpush3.bf16.msra.mxu1 %v5346_v18  ;;  %v1297_v38 = vrot.slane %v1289_v37, %v1292_v27  ;;  %vm1298_vm8 = vcmp.eq.s32.totalorder %v1293_v33, 1 }
  0x4b   : > { %5351 = vmatprep.subr.bf16.mxu0 %v5350_v23  ;;  %5376 = vmatprep.subr.bf16.mxu1 %v5350_v23  ;;  %vm1300_vm9 = vmand %vm1250_vm4, %vm1298_vm8 }
  0x4c   : > { %vm1299_vm10 = vcmp.eq.s32.totalorder %v1297_v38, 1  ;;  %vm1301_vm11 = vmand %vm6003_vm6, %vm1298_vm8  ;;  %v1304_v41 = vsel %vm1300_vm9, 0.0, %v5705_v40 }
  0x4d   : > { %vm1302_vm12 = vmand %vm1250_vm4, %vm1299_vm10  ;;  %v1305_v44 = vsel %vm1301_vm11, 0.0, %v5705_v40  ;;  %1309 = vst.msk [vmem:[#allocation3] sm:$0xff] %vm1308_vm7, %v1304_v41 }
  0x4e   : > { %5353 = vmatpush3.bf16.msra.mxu0 %v5350_v23  ;;  %5384 = vmatpush3.bf16.msra.mxu1 %v5350_v23  ;;  %vm1303_vm13 = vmand %vm6003_vm6, %vm1299_vm10  ;;  %v1306_v45 = vsel %vm1302_vm12, 0.0, %v5705_v40  ;;  %1310 = vst.msk [vmem:[#allocation3 + $0x8] sm:$0xff] %vm1308_vm7, %v1305_v44 }
  0x4f   : > { %5355 = vmatprep.subr.bf16.mxu0 %v5354_v32  ;;  %5377 = vmatprep.subr.bf16.mxu1 %v5354_v32  ;;  %v1307_v46 = vsel %vm1303_vm13, 0.0, %v5705_v40  ;;  %1311 = vst.msk [vmem:[#allocation3 + $0x10] sm:$0xff] %vm1308_vm7, %v1306_v45  ;;  %v4604_v45 = vld [vmem:[%s6882_s28] ss:$0 sm:$0xff] }
  0x50   : > { %1312 = vst.msk [vmem:[#allocation3 + $0x18] sm:$0xff] %vm1308_vm7, %v1307_v46 }
  0x52   : > { %5357 = vmatpush3.bf16.msra.mxu0 %v5354_v32  ;;  %5385 = vmatpush3.bf16.msra.mxu1 %v5354_v32 }
  0x53   : > { %5359 = vmatprep.subr.bf16.mxu0 %v5358_v39  ;;  %5378 = vmatprep.subr.bf16.mxu1 %v5358_v39 }
  0x56   : > { %5361 = vmatpush3.bf16.msra.mxu0 %v5358_v39  ;;  %5386 = vmatpush3.bf16.msra.mxu1 %v5358_v39 }
  0x57   : > { %5363 = vmatprep.subr.bf16.mxu0 %v5362_v47  ;;  %5379 = vmatprep.subr.bf16.mxu1 %v5362_v47 }
  0x5a   : > { %5365 = vmatpush3.bf16.msra.mxu0 %v5362_v47  ;;  %5387 = vmatpush3.bf16.msra.mxu1 %v5362_v47 }
  0x5b   : > { %5367 = vmatprep.subr.bf16.mxu0 %v5366_v50  ;;  %5380 = vmatprep.subr.bf16.mxu1 %v5366_v50 }
  0x5e   : > { %5369 = vmatpush3.bf16.msra.mxu0 %v5366_v50  ;;  %5388 = vmatpush3.bf16.msra.mxu1 %v5366_v50 }
  0x5f   : > { %5371 = vmatprep.subr.bf16.mxu0 %v5370_v53  ;;  %5381 = vmatprep.subr.bf16.mxu1 %v5370_v53 }
  0x62   : > { %5373 = vmatpush3.bf16.msra.mxu0 %v5370_v53  ;;  %5389 = vmatpush3.bf16.msra.mxu1 %v5370_v53 }
  0xbf   : > { %v1045_v54 = vpop.permute.xlu1 %1044 }
  0xc0   : > { %v1042_v55 = vpop.permute.xlu0 %1041  ;;  %vm1053_vm14 = vcmp.eq.s32.totalorder %v5981_v24, %v1045_v54 }
  0xc1   : > { %vm1052_vm15 = vcmp.eq.s32.totalorder %v5981_v24, %v1042_v55 }
  0xc2   : > { %5060 = vmatprep.mubr.msk.f32.mxu0 %vm1052_vm15, %v5706_v56 }
  0xc3   : > { %5061 = vmatmul.mubr.msk.f32.vlgmr.msra.gmra.mrb[0].mxu0 %vm1053_vm14, %v5706_v56 }
  0xc4   : > { %v1051_v57 = vpop.permute.xlu1 %1050  ;;  %v1048_v58 = vpop.permute.xlu0 %1047 }
  0xc5   : > { %vm1055_vm0 = vcmp.eq.s32.totalorder %v5981_v24, %v1051_v57  ;;  %vm1054_vm1 = vcmp.eq.s32.totalorder %v5981_v24, %v1048_v58 }
  0xc6   : > { %5063 = vmatprep.mubr.msk.f32.mxu1 %vm1054_vm1, %v5706_v56 }
  0xc7   : > { %5064 = vmatmul.mubr.msk.f32.vlgmr.msra.gmra.mrb[0].mxu1 %vm1055_vm0, %v5706_v56 }
 0x196   : > { %v5062_v61 = vpop.f32.mrb[0].mxu0 }
 0x197   : > { %v1154_v62 = vadd.f32 %v5062_v61, %v1081_v59  ;;  %v1148_v63 = vpop.f32.mrb[1].mxu0 }
 0x198   : > { %v1149_v0 = vadd.f32 %v1148_v63, %v1080_v60 }
 0x199   : > { %v1173_v1 = vsel %vm1169_vm2, %v1154_v62, 0.0 }
 0x19a   : > { %1174 = vadd.xlane.f32.xlu1 %v1173_v1  ;;  %v5065_v2 = vpop.f32.mrb[0].mxu1  ;;  %v1170_v3 = vsel %vm1169_vm2, %v1149_v0, 0.0 }
 0x19b   : > { %1171 = vadd.xlane.f32.xlu0 %v1170_v3  ;;  %v1158_v4 = vpop.f32.mrb[1].mxu1  ;;  %v1164_v6 = vadd.f32 %v5065_v2, %v1081_v59 }
 0x19c   : > { %v1159_v5 = vadd.f32 %v1158_v4, %v1080_v60 }
 0x19d   : > { %v1179_v8 = vsel %vm1169_vm2, %v1164_v6, 0.0 }
 0x19e   : > { %v1176_v7 = vsel %vm1169_vm2, %v1159_v5, 0.0 }
 0x19f   : > { %1177 = vadd.xlane.f32.xlu0 %v1176_v7 }
 0x1a3   : > { %1180 = vadd.xlane.f32.xlu0 %v1179_v8 }
 0x227   : > { %v1175_v9 = vpop.xlane.xlu1 %1174 }
 0x228   : > { %v1184_v10 = vmul.f32 0.015625, %v1175_v9  ;;  %v1172_v11 = vpop.xlane.xlu0 %1171 }
 0x229   : > { %v1183_v12 = vmul.f32 0.015625, %v1172_v11 }
 0x22a   : > { %v1188_v13 = vsub.f32 %v1154_v62, %v1184_v10 }
 0x22b   : > { %v1187_v14 = vsub.f32 %v1149_v0, %v1183_v12 }
 0x22c   : > { %v1178_v15 = vpop.xlane.xlu0 %1177  ;;  %v1192_v16 = vmul.f32 %v1188_v13, %v1188_v13 }
 0x22d   : > { %v1185_v17 = vmul.f32 0.015625, %v1178_v15  ;;  %v1191_v18 = vmul.f32 %v1187_v14, %v1187_v14 }
 0x22e   : > { %v1198_v19 = vsel %vm1169_vm2, %v1192_v16, 0.0 }
 0x22f   : > { %v1189_v20 = vsub.f32 %v1159_v5, %v1185_v17  ;;  %1199 = vadd.xlane.f32.xlu0 %v1198_v19  ;;  %v1195_v21 = vsel %vm1169_vm2, %v1191_v18, 0.0 }
 0x230   : > { %1196 = vadd.xlane.f32.xlu1 %v1195_v21  ;;  %v1181_v22 = vpop.xlane.xlu0 %1180 }
 0x231   : > { %v1186_v23 = vmul.f32 0.015625, %v1181_v22  ;;  %v1193_v24 = vmul.f32 %v1189_v20, %v1189_v20 }
 0x233   : > { %v1190_v25 = vsub.f32 %v1164_v6, %v1186_v23  ;;  %v1201_v26 = vsel %vm1169_vm2, %v1193_v24, 0.0 }
 0x234   : > { %1202 = vadd.xlane.f32.xlu1 %v1201_v26 }
 0x235   : > { %v1194_v27 = vmul.f32 %v1190_v25, %v1190_v25 }
 0x237   : > { %v1204_v28 = vsel %vm1169_vm2, %v1194_v27, 0.0 }
 0x238   : > { %1205 = vadd.xlane.f32.xlu0 %v1204_v28 }
 0x2bc   : > { %v1200_v29 = vpop.xlane.xlu0 %1199 }
 0x2bd   : > { %v1208_v30 = vmul.f32 0.015625, %v1200_v29  ;;  %v1197_v31 = vpop.xlane.xlu1 %1196 }
 0x2be   : > { %v1207_v32 = vmul.f32 0.015625, %v1197_v31 }
 0x2bf   : > { %v1212_v33 = vadd.f32 1e-05, %v1208_v30 }
 0x2c0   : > { %v1211_v34 = vadd.f32 1e-05, %v1207_v32 }
 0x2c1   : > { %5435 = vrsqrt.f32 %v1212_v33  ;;  %v1203_v35 = vpop.xlane.xlu1 %1202 }
 0x2c2   : > { %5437 = vrsqrt.f32 %v1211_v34  ;;  %v1209_v36 = vmul.f32 0.015625, %v1203_v35 }
 0x2c4   : > { %v1213_v37 = vadd.f32 1e-05, %v1209_v36 }
 0x2c5   : > { %v1206_v38 = vpop.xlane.xlu0 %1205 }
 0x2c6   : > { %5439 = vrsqrt.f32 %v1213_v37  ;;  %v1210_v39 = vmul.f32 0.015625, %v1206_v38 }
 0x2c8   : > { %v1214_v40 = vadd.f32 1e-05, %v1210_v39 }
 0x2ca   : > { %5441 = vrsqrt.f32 %v1214_v40 }
 0x2cb   : > { %v5436_v41 = vpop.eup %5435 }
 0x2cc   : > { %v5438_v43 = vpop.eup %5437  ;;  %v1220_v44 = vmul.f32 %v5436_v41, %v1188_v13 }
 0x2cd   : > { %v1219_v46 = vmul.f32 %v5438_v43, %v1187_v14 }
 0x2ce   : > { %v1230_v47 = vmul.f32 %v4603_v42, %v1220_v44 }
 0x2cf   : > { %v1229_v48 = vmul.f32 %v4603_v42, %v1219_v46 }
 0x2d0   : > { %v5440_v49 = vpop.eup %5439  ;;  %v1240_v50 = vadd.f32 %v4604_v45, %v1230_v47 }
 0x2d1   : > { %v1239_v51 = vadd.f32 %v4604_v45, %v1229_v48  ;;  %v1221_v52 = vmul.f32 %v5440_v49, %v1189_v20 }
 0x2d2   : > { %1244 = vst.msk [vmem:[#allocation2 + $0x8] sm:$0xff] %vm1169_vm2, %v1240_v50 }
 0x2d3   : > { %1243 = vst.msk [vmem:[#allocation2] sm:$0xff] %vm1169_vm2, %v1239_v51  ;;  %v1231_v53 = vmul.f32 %v4603_v42, %v1221_v52 }
 0x2d4   : > { %v5442_v54 = vpop.eup %5441 }
 0x2d5   : > { %v1241_v55 = vadd.f32 %v4604_v45, %v1231_v53  ;;  %v1222_v56 = vmul.f32 %v5442_v54, %v1190_v25 }
 0x2d7   : > { %1245 = vst.msk [vmem:[#allocation2 + $0x10] sm:$0xff] %vm1169_vm2, %v1241_v55  ;;  %v1232_v57 = vmul.f32 %v4603_v42, %v1222_v56 }
 0x2d9   : > { %v1242_v58 = vadd.f32 %v4604_v45, %v1232_v57 }
 0x2db   : > { %1246 = vst.msk [vmem:[#allocation2 + $0x18] sm:$0xff] %vm1169_vm2, %v1242_v58 }
 0x2dc PF: > { %v5443_v59 = vld [vmem:[%s5868_s9] sm:$0xff]   ;;  %v5444_v60 = vld [vmem:[%s5868_s9 + $0x8] sm:$0xff]   ;;  %v5445_v61 = vld [vmem:[%s5868_s9 + $0x10] sm:$0xff]   ;;  %vm1358_vm3 = vcmask 523264   ;;  %s6883_s4 = sld [smem:[#allocation13_spill]]  ;;  %v5707_v49 = vmov 0.0   ;;  %s6887_s8 = scalar_lea.vmem %s6819_s16, %s5861_s7 }
 0x2dd   : > { %5066 = vmatprep.subr.bf16.mxu0 %v5443_v59  ;;  %v1313_v62 = vld [vmem:[#allocation2] sm:$0xff]  ;;  %v1314_v63 = vld [vmem:[#allocation2 + $0x8] sm:$0xff]  ;;  %v5446_v1 = vld [vmem:[%s5868_s9 + $0x18] sm:$0xff]   ;;  %vm5708_vm4 = vmmov 0   ;;  %vm2428_vm5 = vcmask 130048   ;;  %s6886_s3 = sld [smem:[#allocation15_spill]]  ;;  %s6888_s10 = scalar_lea.vmem %s6820_s17, %s5861_s7 }
 0x2de   : > { %5067 = vmatpush3.bf16.msra.mxu0 %v5443_v59  ;;  %v6070_v0 = vpack.c.bf16 %v1314_v63, %v1313_v62  ;;  %v1315_v2 = vld [vmem:[#allocation2 + $0x10] sm:$0xff]  ;;  %v5447_v4 = vld [vmem:[%s5868_s9 + $0x20] sm:$0xff]   ;;  %v5455_v7 = vld [vmem:[%s5868_s9 + $0x68] sm:$0xff]   ;;  %s6889_s28 = scalar_lea.vmem %s6821_s18, %s5861_s7 }
 0x2df   : > { %5068 = vmatprep.subr.bf16.mxu0 %v5444_v60  ;;  %v5453_v5 = vld [vmem:[%s5868_s9 + $0x60] sm:$0xff]   ;;  %v5448_v8 = vld [vmem:[%s5868_s9 + $0x28] sm:$0xff]   ;;  %v5457_v9 = vld [vmem:[%s5868_s9 + $0x70] sm:$0xff]  }
 0x2e0   : > { %5074 = vmatprep.mubr.msk.bf16.mxu0 %vm1358_vm3, %v6070_v0  ;;  %5110 = vmatprep.mubr.msk.bf16.mxu1 %vm1358_vm3, %v6070_v0  ;;  %v5449_v10 = vld [vmem:[%s5868_s9 + $0x30] sm:$0xff]   ;;  %v5459_v11 = vld [vmem:[%s5868_s9 + $0x78] sm:$0xff]   ;;  %v5451_v14 = vld [vmem:[%s5868_s9 + $0x40] sm:$0xff]  }
 0x2e1   : > { %5102 = vmatprep.subr.bf16.mxu1 %v5453_v5  ;;  %v5450_v12 = vld [vmem:[%s5868_s9 + $0x38] sm:$0xff]   ;;  %v5452_v16 = vld [vmem:[%s5868_s9 + $0x48] sm:$0xff]   ;;  %v5454_v18 = vld [vmem:[%s5868_s9 + $0x50] sm:$0xff]  }
 0x2e2   : > { %5069 = vmatpush3.bf16.msra.mxu0 %v5444_v60  ;;  %v1316_v3 = vld [vmem:[#allocation2 + $0x18] sm:$0xff]  ;;  %5103 = vmatpush3.bf16.msra.mxu1 %v5453_v5  ;;  %v5461_v13 = vld [vmem:[%s6883_s4 + $0x20] sm:$0xff]   ;;  %v5463_v15 = vld [vmem:[%s6883_s4 + $0x28] sm:$0xff]  }
 0x2e3   : > { %5070 = vmatprep.subr.bf16.mxu0 %v5445_v61  ;;  %v6079_v6 = vpack.c.bf16 %v1316_v3, %v1315_v2  ;;  %5104 = vmatprep.subr.bf16.mxu1 %v5455_v7  ;;  %v5465_v17 = vld [vmem:[%s6883_s4 + $0x30] sm:$0xff]   ;;  %v5467_v19 = vld [vmem:[%s6883_s4 + $0x38] sm:$0xff]   ;;  %v5470_v21 = vld [vmem:[%s6883_s4 + $0x60] sm:$0xff]  }
 0x2e4   : > { %v5456_v20 = vld [vmem:[%s5868_s9 + $0x58] sm:$0xff]   ;;  %v5458_v22 = vld [vmem:[%s6883_s4] sm:$0xff]   ;;  %v5472_v23 = vld [vmem:[%s6883_s4 + $0x68] sm:$0xff]   ;;  %s6884_s9 = sld [smem:[#allocation12_spill]] }
 0x2e5   : > { %v5460_v24 = vld [vmem:[%s6883_s4 + $0x8] sm:$0xff]   ;;  %v5473_v25 = vld [vmem:[%s6883_s4 + $0x70] sm:$0xff]   ;;  %v5474_v27 = vld [vmem:[%s6883_s4 + $0x78] sm:$0xff]  }
 0x2e6   : > { %5071 = vmatpush3.bf16.msra.mxu0 %v5445_v61  ;;  %5105 = vmatpush3.bf16.msra.mxu1 %v5455_v7  ;;  %v5462_v26 = vld [vmem:[%s6883_s4 + $0x10] sm:$0xff]   ;;  %v5464_v28 = vld [vmem:[%s6883_s4 + $0x18] sm:$0xff]   ;;  %v5466_v29 = vld [vmem:[%s6883_s4 + $0x40] sm:$0xff]  }
 0x2e7   : > { %5072 = vmatprep.subr.bf16.mxu0 %v5446_v1  ;;  %5106 = vmatprep.subr.bf16.mxu1 %v5457_v9  ;;  %v5468_v30 = vld [vmem:[%s6883_s4 + $0x48] sm:$0xff]   ;;  %v5469_v31 = vld [vmem:[%s6883_s4 + $0x50] sm:$0xff]   ;;  %v5471_v32 = vld [vmem:[%s6883_s4 + $0x58] sm:$0xff]  }
 0x2e8   : > { %v5475_v33 = vld [vmem:[%s5888_s0] sm:$0xff]   ;;  %v5477_v35 = vld [vmem:[%s5888_s0 + $0x8] sm:$0xff]   ;;  %v5479_v37 = vld [vmem:[%s5888_s0 + $0x10] sm:$0xff]  }
 0x2e9   : > { %v5476_v34 = vld [vmem:[%s5888_s0 + $0x20] sm:$0xff]   ;;  %v5478_v36 = vld [vmem:[%s5888_s0 + $0x28] sm:$0xff]   ;;  %v5480_v38 = vld [vmem:[%s5888_s0 + $0x30] sm:$0xff]  }
 0x2ea   : > { %5073 = vmatpush3.bf16.msra.mxu0 %v5446_v1  ;;  %5107 = vmatpush3.bf16.msra.mxu1 %v5457_v9  ;;  %v5481_v39 = vld [vmem:[%s5888_s0 + $0x18] sm:$0xff]   ;;  %v5483_v41 = vld [vmem:[%s5888_s0 + $0x60] sm:$0xff]   ;;  %v5485_v43 = vld [vmem:[%s5888_s0 + $0x68] sm:$0xff]  }
 0x2eb   : > { %5078 = vmatprep.subr.bf16.mxu0 %v5447_v4  ;;  %5108 = vmatprep.subr.bf16.mxu1 %v5459_v11  ;;  %v5482_v40 = vld [vmem:[%s5888_s0 + $0x38] sm:$0xff]   ;;  %v5484_v42 = vld [vmem:[%s5888_s0 + $0x40] sm:$0xff]   ;;  %v5486_v44 = vld [vmem:[%s5888_s0 + $0x48] sm:$0xff]  }
 0x2ec   : > { %v5487_v45 = vld [vmem:[%s5888_s0 + $0x70] sm:$0xff]   ;;  %v5489_v47 = vld [vmem:[%s5888_s0 + $0x78] sm:$0xff]   ;;  %v4606_v50 = vld [vmem:[%s6884_s9] ss:$0 sm:$0xff] }
 0x2ed   : > { %5075 = vmatmul.mubr.msk.bf16.vlgmr.msra.gmra.mrb[0].mxu0 %vm1358_vm3, %v6079_v6  ;;  %v5488_v46 = vld [vmem:[%s5888_s0 + $0x50] sm:$0xff]   ;;  %v5490_v48 = vld [vmem:[%s5888_s0 + $0x58] sm:$0xff]   ;;  %v4654_v61 = vld [vmem:[%s6884_s9 + $0x3] ss:$0 sm:$0xff]  ;;  %s6885_s0 = sld [smem:[#allocation14_spill]] }
 0x2ee   : > { %5079 = vmatpush3.bf16.msra.mxu0 %v5447_v4  ;;  %5086 = vmatprep.mubr.msk.bf16.mxu0 %vm1358_vm3, %v6070_v0  ;;  %v4622_v63 = vld [vmem:[%s6884_s9 + $0x1] ss:$0 sm:$0xff] }
 0x2ef   : > { %5080 = vmatprep.subr.bf16.mxu0 %v5448_v8  ;;  %5109 = vmatpush3.bf16.msra.mxu1 %v5459_v11 }
 0x2f0   : > { %5126 = vmatprep.subr.bf16.mxu1 %v5461_v13 }
 0x2f2   : > { %5081 = vmatpush3.bf16.msra.mxu0 %v5448_v8  ;;  %5111 = vmatmul.mubr.msk.bf16.vlgmr.msra.gmra.mrb[0].mxu1 %vm1358_vm3, %v6079_v6 }
 0x2f3   : > { %5082 = vmatprep.subr.bf16.mxu0 %v5449_v10  ;;  %5127 = vmatpush3.bf16.msra.mxu1 %v5461_v13 }
 0x2f4   : > { %5128 = vmatprep.subr.bf16.mxu1 %v5463_v15  ;;  %5134 = vmatprep.mubr.msk.bf16.mxu1 %vm1358_vm3, %v6070_v0 }
 0x2f6   : > { %5083 = vmatpush3.bf16.msra.mxu0 %v5449_v10 }
 0x2f7   : > { %5084 = vmatprep.subr.bf16.mxu0 %v5450_v12  ;;  %5129 = vmatpush3.bf16.msra.mxu1 %v5463_v15 }
 0x2f8   : > { %5130 = vmatprep.subr.bf16.mxu1 %v5465_v17 }
 0x2fa   : > { %5085 = vmatpush3.bf16.msra.mxu0 %v5450_v12 }
 0x2fb   : > { %5090 = vmatprep.subr.bf16.mxu0 %v5451_v14  ;;  %5131 = vmatpush3.bf16.msra.mxu1 %v5465_v17 }
 0x2fc   : > { %5132 = vmatprep.subr.bf16.mxu1 %v5467_v19 }
 0x2fd   : > { %5087 = vmatmul.mubr.msk.bf16.vlgmr.msra.gmra.mrb[4].mxu0 %vm1358_vm3, %v6079_v6 }
 0x2fe   : > { %5091 = vmatpush3.bf16.msra.mxu0 %v5451_v14  ;;  %5098 = vmatprep.mubr.msk.bf16.mxu0 %vm1358_vm3, %v6070_v0 }
 0x2ff   : > { %5092 = vmatprep.subr.bf16.mxu0 %v5452_v16  ;;  %5133 = vmatpush3.bf16.msra.mxu1 %v5467_v19  ;;  %v4677_v19 = vld [vmem:[%s6885_s0 + $0x1] ss:$0 sm:$0xff] }
 0x300   : > { %5150 = vmatprep.subr.bf16.mxu1 %v5470_v21 }
 0x302   : > { %5093 = vmatpush3.bf16.msra.mxu0 %v5452_v16  ;;  %5135 = vmatmul.mubr.msk.bf16.vlgmr.msra.gmra.mrb[4].mxu1 %vm1358_vm3, %v6079_v6 }
 0x303   : > { %5094 = vmatprep.subr.bf16.mxu0 %v5454_v18  ;;  %5151 = vmatpush3.bf16.msra.mxu1 %v5470_v21  ;;  %v4638_v21 = vld [vmem:[%s6884_s9 + $0x2] ss:$0 sm:$0xff] }
 0x304   : > { %5152 = vmatprep.subr.bf16.mxu1 %v5472_v23  ;;  %5158 = vmatprep.mubr.msk.bf16.mxu1 %vm1358_vm3, %v6070_v0 }
 0x306   : > { %5095 = vmatpush3.bf16.msra.mxu0 %v5454_v18 }
 0x307   : > { %5096 = vmatprep.subr.bf16.mxu0 %v5456_v20  ;;  %5153 = vmatpush3.bf16.msra.mxu1 %v5472_v23 }
 0x308   : > { %5154 = vmatprep.subr.bf16.mxu1 %v5473_v25 }
 0x30a   : > { %5097 = vmatpush3.bf16.msra.mxu0 %v5456_v20 }
 0x30b   : > { %5114 = vmatprep.subr.bf16.mxu0 %v5458_v22  ;;  %5155 = vmatpush3.bf16.msra.mxu1 %v5473_v25 }
 0x30c   : > { %5156 = vmatprep.subr.bf16.mxu1 %v5474_v27 }
 0x30d   : > { %5099 = vmatmul.mubr.msk.bf16.vlgmr.msra.gmra.mrb[8].mxu0 %vm1358_vm3, %v6079_v6 }
 0x30e   : > { %5115 = vmatpush3.bf16.msra.mxu0 %v5458_v22  ;;  %5122 = vmatprep.mubr.msk.bf16.mxu0 %vm1358_vm3, %v6070_v0 }
 0x30f   : > { %5116 = vmatprep.subr.bf16.mxu0 %v5460_v24  ;;  %5157 = vmatpush3.bf16.msra.mxu1 %v5474_v27 }
 0x310   : > { %5174 = vmatprep.subr.bf16.mxu1 %v5476_v34 }
 0x312   : > { %5117 = vmatpush3.bf16.msra.mxu0 %v5460_v24  ;;  %5159 = vmatmul.mubr.msk.bf16.vlgmr.msra.gmra.mrb[8].mxu1 %vm1358_vm3, %v6079_v6 }
 0x313   : > { %5118 = vmatprep.subr.bf16.mxu0 %v5462_v26  ;;  %5182 = vmatprep.mubr.msk.bf16.mxu1 %vm1358_vm3, %v6070_v0 }
 0x314   : > { %5175 = vmatpush3.bf16.msra.mxu1 %v5476_v34 }
 0x315   : > { %5176 = vmatprep.subr.bf16.mxu1 %v5478_v36 }
 0x316   : > { %5119 = vmatpush3.bf16.msra.mxu0 %v5462_v26 }
 0x317   : > { %5120 = vmatprep.subr.bf16.mxu0 %v5464_v28 }
 0x318   : > { %5177 = vmatpush3.bf16.msra.mxu1 %v5478_v36 }
 0x319   : > { %5178 = vmatprep.subr.bf16.mxu1 %v5480_v38 }
 0x31a   : > { %5121 = vmatpush3.bf16.msra.mxu0 %v5464_v28 }
 0x31b   : > { %5138 = vmatprep.subr.bf16.mxu0 %v5466_v29 }
 0x31c   : > { %5179 = vmatpush3.bf16.msra.mxu1 %v5480_v38 }
 0x31d   : > { %5123 = vmatmul.mubr.msk.bf16.vlgmr.msra.gmra.mrb[12].mxu0 %vm1358_vm3, %v6079_v6  ;;  %5180 = vmatprep.subr.bf16.mxu1 %v5482_v40 }
 0x31e   : > { %5139 = vmatpush3.bf16.msra.mxu0 %v5466_v29  ;;  %5146 = vmatprep.mubr.msk.bf16.mxu0 %vm1358_vm3, %v6070_v0 }
 0x31f   : > { %5140 = vmatprep.subr.bf16.mxu0 %v5468_v30 }
 0x320   : > { %5181 = vmatpush3.bf16.msra.mxu1 %v5482_v40 }
 0x321   : > { %5198 = vmatprep.subr.bf16.mxu1 %v5483_v41 }
 0x322   : > { %5141 = vmatpush3.bf16.msra.mxu0 %v5468_v30 }
 0x323   : > { %5142 = vmatprep.subr.bf16.mxu0 %v5469_v31  ;;  %5183 = vmatmul.mubr.msk.bf16.vlgmr.msra.gmra.mrb[12].mxu1 %vm1358_vm3, %v6079_v6 }
 0x324   : > { %5199 = vmatpush3.bf16.msra.mxu1 %v5483_v41  ;;  %5206 = vmatprep.mubr.msk.bf16.mxu1 %vm1358_vm3, %v6070_v0  ;;  %v4709_v41 = vld [vmem:[%s6885_s0 + $0x3] ss:$0 sm:$0xff] }
 0x325   : > { %5200 = vmatprep.subr.bf16.mxu1 %v5485_v43 }
 0x326   : > { %5143 = vmatpush3.bf16.msra.mxu0 %v5469_v31 }
 0x327   : > { %5144 = vmatprep.subr.bf16.mxu0 %v5471_v32 }
 0x328   : > { %5201 = vmatpush3.bf16.msra.mxu1 %v5485_v43 }
 0x329   : > { %5202 = vmatprep.subr.bf16.mxu1 %v5487_v45 }
 0x32a   : > { %5145 = vmatpush3.bf16.msra.mxu0 %v5471_v32 }
 0x32b   : > { %5162 = vmatprep.subr.bf16.mxu0 %v5475_v33 }
 0x32c   : > { %5203 = vmatpush3.bf16.msra.mxu1 %v5487_v45 }
 0x32d   : > { %5147 = vmatmul.mubr.msk.bf16.vlgmr.msra.gmra.mrb[16].mxu0 %vm1358_vm3, %v6079_v6  ;;  %5204 = vmatprep.subr.bf16.mxu1 %v5489_v47 }
 0x32e   : > { %5170 = vmatprep.mubr.msk.bf16.mxu0 %vm1358_vm3, %v6070_v0  ;;  %5163 = vmatpush3.bf16.msra.mxu0 %v5475_v33 }
 0x32f   : > { %5164 = vmatprep.subr.bf16.mxu0 %v5477_v35 }
 0x330   : > { %5205 = vmatpush3.bf16.msra.mxu1 %v5489_v47 }
 0x331   : > { %5216 = vmatprep.subr.bf16.mxu1 %v5707_v49 }
 0x332   : > { %5165 = vmatpush3.bf16.msra.mxu0 %v5477_v35 }
 0x333   : > { %5166 = vmatprep.subr.bf16.mxu0 %v5479_v37  ;;  %5207 = vmatmul.mubr.msk.bf16.vlgmr.msra.gmra.mrb[16].mxu1 %vm1358_vm3, %v6079_v6 }
 0x334   : > { %5218 = vmatprep.mubr.msk.bf16.mxu1 %vm5708_vm4, %v5707_v49 }
 0x336   : > { %5167 = vmatpush3.bf16.msra.mxu0 %v5479_v37 }
 0x337   : > { %5168 = vmatprep.subr.bf16.mxu0 %v5481_v39 }
 0x33a   : > { %5169 = vmatpush3.bf16.msra.mxu0 %v5481_v39 }
 0x33b   : > { %5186 = vmatprep.subr.bf16.mxu0 %v5484_v42 }
 0x33d   : > { %5171 = vmatmul.mubr.msk.bf16.vlgmr.msra.gmra.mrb[20].mxu0 %vm1358_vm3, %v6079_v6 }
 0x33e   : > { %5187 = vmatpush3.bf16.msra.mxu0 %v5484_v42  ;;  %5194 = vmatprep.mubr.msk.bf16.mxu0 %vm1358_vm3, %v6070_v0 }
 0x33f   : > { %5188 = vmatprep.subr.bf16.mxu0 %v5486_v44 }
 0x342   : > { %5189 = vmatpush3.bf16.msra.mxu0 %v5486_v44 }
 0x343   : > { %5190 = vmatprep.subr.bf16.mxu0 %v5488_v46 }
 0x346   : > { %5191 = vmatpush3.bf16.msra.mxu0 %v5488_v46 }
 0x347   : > { %5192 = vmatprep.subr.bf16.mxu0 %v5490_v48 }
 0x34a   : > { %5193 = vmatpush3.bf16.msra.mxu0 %v5490_v48  ;;  %v4661_v48 = vld [vmem:[%s6885_s0] ss:$0 sm:$0xff] }
 0x34b   : > { %5210 = vmatprep.subr.bf16.mxu0 %v5707_v49 }
 0x34d   : > { %5195 = vmatmul.mubr.msk.bf16.vlgmr.msra.gmra.mrb[24].mxu0 %vm1358_vm3, %v6079_v6 }
 0x34e   : > { %5212 = vmatprep.mubr.msk.bf16.mxu0 %vm5708_vm4, %v5707_v49 }
 0x3c0   : > { %v5076_v51 = vpop.f32.mrb[0].mxu0 }
 0x3c1   : > { %v6174_v52 = vadd.f32 %v5076_v51, %v4606_v50  ;;  %v1399_v53 = vpop.f32.mrb[1].mxu0 }
 0x3c2   : > { %v5077_v54 = vpop.f32.mrb[2].mxu0  ;;  %v6178_v57 = vadd.f32 %v4606_v50, %v1399_v53 }
 0x3c3   : > { %v6176_v55 = vadd.f32 %v5077_v54, %v4606_v50  ;;  %v1402_v56 = vpop.f32.mrb[3].mxu0 }
 0x3c4   : > { %v6180_v58 = vadd.f32 %v4606_v50, %v1402_v56 }
 0x3c5   : > { %v1685_v59 = vpack.c.bf16 %v6176_v55, %v6174_v52  ;;  %v5112_v62 = vpop.f32.mrb[0].mxu1 }
 0x3c6   : > { %v1684_v60 = vpack.c.bf16 %v6180_v58, %v6178_v57  ;;  %v6188_v0 = vadd.f32 %v5112_v62, %v4654_v61  ;;  %v1669_v1 = vpop.f32.mrb[1].mxu1 }
 0x3c7   : > { %v6190_v2 = vadd.f32 %v4654_v61, %v1669_v1  ;;  %v5113_v3 = vpop.f32.mrb[2].mxu1 }
 0x3c8   : > { %v6192_v5 = vadd.f32 %v5113_v3, %v4654_v61  ;;  %v1672_v6 = vpop.f32.mrb[3].mxu1 }
 0x3c9   : > { %v6196_v9 = vadd.f32 %v4654_v61, %v1672_v6 }
 0x3ca   : > { %v1691_v11 = vpack.c.bf16 %v6192_v5, %v6188_v0 }
 0x3cb   : > { %v1690_v14 = vpack.c.bf16 %v6196_v9, %v6190_v2 }
 0x3d0   : > { %v5088_v4 = vpop.f32.mrb[4].mxu0 }
 0x3d1   : > { %v6194_v7 = vadd.f32 %v5088_v4, %v4622_v63  ;;  %v1489_v8 = vpop.f32.mrb[5].mxu0 }
 0x3d2   : > { %v5089_v10 = vpop.f32.mrb[6].mxu0  ;;  %v6204_v15 = vadd.f32 %v4622_v63, %v1489_v8 }
 0x3d3   : > { %v6200_v12 = vadd.f32 %v5089_v10, %v4622_v63  ;;  %v1492_v13 = vpop.f32.mrb[7].mxu0 }
 0x3d4   : > { %v6206_v16 = vadd.f32 %v4622_v63, %v1492_v13 }
 0x3d5   : > { %v1687_v17 = vpack.c.bf16 %v6200_v12, %v6194_v7  ;;  %v5136_v20 = vpop.f32.mrb[4].mxu1 }
 0x3d6   : > { %v1686_v18 = vpack.c.bf16 %v6206_v16, %v6204_v15  ;;  %v1864_v22 = vadd.f32 %v5136_v20, %v4677_v19  ;;  %v1855_v23 = vpop.f32.mrb[5].mxu1  ;;  %v4716_v15 = vld [vmem:[%s6886_s3] ss:$0 sm:$0xff]  ;;  %v4732_v16 = vld [vmem:[%s6886_s3 + $0x1] ss:$0 sm:$0xff] }
 0x3d7   : > { %v1856_v24 = vadd.f32 %v4677_v19, %v1855_v23  ;;  %v5137_v25 = vpop.f32.mrb[6].mxu1 }
 0x3d8   : > { %v1867_v27 = vadd.f32 %v5137_v25, %v4677_v19  ;;  %v1858_v28 = vpop.f32.mrb[7].mxu1 }
 0x3d9   : > { %v1859_v31 = vadd.f32 %v4677_v19, %v1858_v28 }
 0x3da   : > { %v2053_v33 = vpack.c.bf16 %v1867_v27, %v1864_v22 }
 0x3db   : > { %v2052_v36 = vpack.c.bf16 %v1859_v31, %v1856_v24 }
 0x3dc   : > { %v2574_v20 = vsel %vm2428_vm5, %v2053_v33, 0 }
 0x3dd   : > { %v2527_v22 = vsel %vm2428_vm5, %v2052_v36, 0 }
 0x3e0   : > { %v5100_v26 = vpop.f32.mrb[8].mxu0 }
 0x3e1   : > { %v6214_v29 = vadd.f32 %v5100_v26, %v4638_v21  ;;  %v1579_v30 = vpop.f32.mrb[9].mxu0 }
 0x3e2   : > { %v5101_v32 = vpop.f32.mrb[10].mxu0  ;;  %v6218_v37 = vadd.f32 %v4638_v21, %v1579_v30 }
 0x3e3   : > { %v6216_v34 = vadd.f32 %v5101_v32, %v4638_v21  ;;  %v1582_v35 = vpop.f32.mrb[11].mxu0 }
 0x3e4   : > { %v6220_v38 = vadd.f32 %v4638_v21, %v1582_v35  ;;  %v4693_v21 = vld [vmem:[%s6885_s0 + $0x2] ss:$0 sm:$0xff] }
 0x3e5   : > { %v1689_v39 = vpack.c.bf16 %v6216_v34, %v6214_v29  ;;  %v5160_v42 = vpop.f32.mrb[8].mxu1 }
 0x3e6   : > { %v1688_v40 = vpack.c.bf16 %v6220_v38, %v6218_v37  ;;  %v2044_v43 = vadd.f32 %v5160_v42, %v4709_v41  ;;  %v2035_v44 = vpop.f32.mrb[9].mxu1  ;;  %v4748_v42 = vld [vmem:[%s6886_s3 + $0x2] ss:$0 sm:$0xff] }
 0x3e7   : > { %v2036_v45 = vadd.f32 %v4709_v41, %v2035_v44  ;;  %v5161_v46 = vpop.f32.mrb[10].mxu1 }
 0x3e8   : > { %v2047_v50 = vadd.f32 %v5161_v46, %v4709_v41  ;;  %v2038_v51 = vpop.f32.mrb[11].mxu1 }
 0x3e9   : > { %v2039_v54 = vadd.f32 %v4709_v41, %v2038_v51  ;;  %v4764_v41 = vld [vmem:[%s6886_s3 + $0x3] ss:$0 sm:$0xff] }
 0x3ea   : > { %v2057_v61 = vpack.c.bf16 %v2047_v50, %v2044_v43 }
 0x3eb   : > { %v2056_v3 = vpack.c.bf16 %v2039_v54, %v2036_v45 }
 0x3ec   : > { %v2762_v7 = vsel %vm2428_vm5, %v2057_v61, 0 }
 0x3ed   : > { %v2715_v12 = vsel %vm2428_vm5, %v2056_v3, 0 }
 0x3f0   : > { %v5124_v47 = vpop.f32.mrb[12].mxu0 }
 0x3f1   : > { %v1765_v53 = vpop.f32.mrb[13].mxu0  ;;  %v1774_v62 = vadd.f32 %v5124_v47, %v4661_v48 }
 0x3f2   : > { %v5125_v56 = vpop.f32.mrb[14].mxu0  ;;  %v1766_v4 = vadd.f32 %v4661_v48, %v1765_v53 }
 0x3f3   : > { %v1777_v63 = vadd.f32 %v5125_v56, %v4661_v48  ;;  %v1768_v1 = vpop.f32.mrb[15].mxu0 }
 0x3f4   : > { %v1769_v6 = vadd.f32 %v4661_v48, %v1768_v1 }
 0x3f5   : > { %v2051_v8 = vpack.c.bf16 %v1777_v63, %v1774_v62 }
 0x3f6   : > { %v2050_v10 = vpack.c.bf16 %v1769_v6, %v1766_v4  ;;  %v5184_v30 = vpop.f32.mrb[12].mxu1 }
 0x3f7   : > { %v2480_v13 = vsel %vm2428_vm5, %v2051_v8, 0  ;;  %v2221_v31 = vpop.f32.mrb[13].mxu1 }
 0x3f8   : > { %5217 = vmatpush3.bf16.xpose.msra.mxu1 %v2480_v13  ;;  %v2433_v19 = vsel %vm2428_vm5, %v2050_v10, 0  ;;  %v5185_v32 = vpop.f32.mrb[14].mxu1  ;;  %v6335_v13 = vld [vmem:[#allocation3 + $0x10] sm:$0xff] }
 0x3f9   : > { %5211 = vmatpush3.bf16.xpose.msra.mxu0 %v2433_v19  ;;  %5228 = vmatprep.subr.bf16.mxu1 %v5707_v49  ;;  %v6299_v34 = vadd.f32 %v5185_v32, %v4732_v16  ;;  %v2224_v35 = vpop.f32.mrb[15].mxu1  ;;  %v6337_v19 = vld [vmem:[#allocation3] sm:$0xff] }
 0x3fa   : > { %5222 = vmatprep.subr.bf16.mxu0 %v5707_v49  ;;  %v6301_v37 = vadd.f32 %v4732_v16, %v2224_v35 }
 0x3ff   : > { %5219 = vmatmul.mubr.msk.bf16.vlgmr.msra.gmra.mrb[20].mxu1 %vm2428_vm5, %v1685_v59 }
 0x400   : > { %v5148_v23 = vpop.f32.mrb[16].mxu0  ;;  %5213 = vmatmul.mubr.msk.bf16.vlgmr.msra.gmra.mrb[28].mxu0 %vm2428_vm5, %v1684_v60  ;;  %5229 = vmatpush3.bf16.xpose.msra.mxu1 %v2574_v20 }
 0x401   : > { %v1954_v24 = vadd.f32 %v5148_v23, %v4693_v21  ;;  %v1945_v25 = vpop.f32.mrb[17].mxu0  ;;  %5223 = vmatpush3.bf16.xpose.msra.mxu0 %v2527_v22  ;;  %5230 = vmatprep.mubr.msk.bf16.mxu1 %vm5708_vm4, %v5707_v49 }
 0x402   : > { %v1946_v26 = vadd.f32 %v4693_v21, %v1945_v25  ;;  %v5149_v27 = vpop.f32.mrb[18].mxu0  ;;  %5224 = vmatprep.mubr.msk.bf16.mxu0 %vm5708_vm4, %v5707_v49  ;;  %5240 = vmatprep.subr.bf16.mxu1 %v5707_v49  ;;  %v6344_v25 = vld [vmem:[#allocation3 + $0x8] sm:$0xff] }
 0x403   : > { %v1957_v52 = vadd.f32 %v5149_v27, %v4693_v21  ;;  %v1948_v55 = vpop.f32.mrb[19].mxu0  ;;  %5234 = vmatprep.subr.bf16.mxu0 %v5707_v49 }
 0x404   : > { %v1949_v57 = vadd.f32 %v4693_v21, %v1948_v55  ;;  %v6339_v21 = vld [vmem:[#allocation3 + $0x18] sm:$0xff] }
 0x405   : > { %v2055_v58 = vpack.c.bf16 %v1957_v52, %v1954_v24 }
 0x406   : > { %v2054_v59 = vpack.c.bf16 %v1949_v57, %v1946_v26  ;;  %v5208_v43 = vpop.f32.mrb[16].mxu1 }
 0x407   : > { %5231 = vmatmul.mubr.msk.bf16.vlgmr.msra.gmra.mrb[24].mxu1 %vm2428_vm5, %v1687_v17  ;;  %v2668_v60 = vsel %vm2428_vm5, %v2055_v58, 0  ;;  %v6311_v45 = vadd.f32 %v5208_v43, %v4764_v41  ;;  %v2401_v46 = vpop.f32.mrb[17].mxu1 }
 0x408   : > { %5225 = vmatmul.mubr.msk.bf16.vlgmr.msra.gmra.mrb[32].mxu0 %vm2428_vm5, %v1686_v18  ;;  %5241 = vmatpush3.bf16.xpose.msra.mxu1 %v2668_v60  ;;  %v2621_v28 = vsel %vm2428_vm5, %v2054_v59, 0  ;;  %v6315_v50 = vadd.f32 %v4764_v41, %v2401_v46  ;;  %v5209_v51 = vpop.f32.mrb[18].mxu1 }
 0x409   : > { %5235 = vmatpush3.bf16.xpose.msra.mxu0 %v2621_v28  ;;  %5242 = vmatprep.mubr.msk.bf16.mxu1 %vm5708_vm4, %v5707_v49  ;;  %v6319_v56 = vadd.f32 %v5209_v51, %v4764_v41  ;;  %v2404_v61 = vpop.f32.mrb[19].mxu1 }
 0x40a   : > { %5236 = vmatprep.mubr.msk.bf16.mxu0 %vm5708_vm4, %v5707_v49  ;;  %5252 = vmatprep.subr.bf16.mxu1 %v5707_v49  ;;  %v6323_v1 = vadd.f32 %v4764_v41, %v2404_v61 }
 0x40b   : > { %5246 = vmatprep.subr.bf16.mxu0 %v5707_v49  ;;  %v2423_v4 = vpack.c.bf16 %v6319_v56, %v6311_v45 }
 0x40c   : > { %v2422_v8 = vpack.c.bf16 %v6323_v1, %v6315_v50 }
 0x40f   : > { %5243 = vmatmul.mubr.msk.bf16.vlgmr.msra.gmra.mrb[28].mxu1 %vm2428_vm5, %v1689_v39 }
 0x410   : > { %5237 = vmatmul.mubr.msk.bf16.vlgmr.msra.gmra.mrb[36].mxu0 %vm2428_vm5, %v1688_v40  ;;  %5253 = vmatpush3.bf16.xpose.msra.mxu1 %v2762_v7  ;;  %v5172_v17 = vpop.f32.mrb[20].mxu0 }
 0x411   : > { %5247 = vmatpush3.bf16.xpose.msra.mxu0 %v2715_v12  ;;  %5254 = vmatprep.mubr.msk.bf16.mxu1 %vm5708_vm4, %v5707_v49  ;;  %v2140_v18 = vadd.f32 %v5172_v17, %v4716_v15  ;;  %v2131_v29 = vpop.f32.mrb[21].mxu0 }
 0x412   : > { %5248 = vmatprep.mubr.msk.bf16.mxu0 %vm5708_vm4, %v5707_v49  ;;  %5258 = vmatprep.subr.bf16.mxu0 %v5707_v49  ;;  %v2132_v0 = vadd.f32 %v4716_v15, %v2131_v29  ;;  %v5173_v5 = vpop.f32.mrb[22].mxu0 }
 0x413   : > { %5264 = vmatprep.subr.bf16.mxu1 %v5707_v49  ;;  %v2143_v2 = vadd.f32 %v5173_v5, %v4716_v15  ;;  %v2134_v9 = vpop.f32.mrb[23].mxu0 }
 0x414   : > { %v2135_v33 = vadd.f32 %v4716_v15, %v2134_v9 }
 0x415   : > { %v2417_v36 = vpack.c.bf16 %v2143_v2, %v2140_v18 }
 0x416   : > { %v2416_v38 = vpack.c.bf16 %v2135_v33, %v2132_v0 }
 0x417   : > { %5255 = vmatmul.mubr.msk.bf16.vlgmr.msra.gmra.mrb[32].mxu1 %vm2428_vm5, %v1691_v11  ;;  %v6295_v11 = vadd.f32 %v5184_v30, %v4732_v16 }
 0x418   : > { %5249 = vmatmul.mubr.msk.bf16.vlgmr.msra.gmra.mrb[40].mxu0 %vm2428_vm5, %v1690_v14  ;;  %5266 = vmatprep.mubr.msk.bf16.mxu1 %vm5708_vm4, %v5707_v49  ;;  %v6297_v14 = vadd.f32 %v4732_v16, %v2221_v31 }
 0x419   : > { %5260 = vmatprep.mubr.msk.bf16.mxu0 %vm5708_vm4, %v5707_v49  ;;  %v2419_v39 = vpack.c.bf16 %v6299_v34, %v6295_v11  ;;  %5265 = vmatpush3.bf16.msra.mxu1 %v2417_v36 }
 0x41a   : > { %v2418_v40 = vpack.c.bf16 %v6301_v37, %v6297_v14  ;;  %5259 = vmatpush3.bf16.msra.mxu0 %v2416_v38  ;;  %5276 = vmatprep.subr.bf16.mxu1 %v5707_v49 }
 0x41b   : > { %5270 = vmatprep.subr.bf16.mxu0 %v5707_v49 }
 0x420   : > { %v5196_v44 = vpop.f32.mrb[24].mxu0 }
 0x421   : > { %v6313_v47 = vadd.f32 %v5196_v44, %v4748_v42  ;;  %v2311_v48 = vpop.f32.mrb[25].mxu0 }
 0x422   : > { %v6317_v53 = vadd.f32 %v4748_v42, %v2311_v48  ;;  %v5197_v54 = vpop.f32.mrb[26].mxu0 }
 0x423   : > { %v6321_v62 = vadd.f32 %v5197_v54, %v4748_v42  ;;  %v2314_v63 = vpop.f32.mrb[27].mxu0 }
 0x424   : > { %v6325_v3 = vadd.f32 %v4748_v42, %v2314_v63 }
 0x425   : > { %v2421_v6 = vpack.c.bf16 %v6321_v62, %v6313_v47 }
 0x426   : > { %v2420_v10 = vpack.c.bf16 %v6325_v3, %v6317_v53 }
 0x4d2   : > { %v2516_v20 = vpop.f32.mrb[20].mxu1 }
 0x4d3   : > { %v6342_v22 = vadd.f32 %v2516_v20, %v6335_v13  ;;  %v2469_v23 = vpop.f32.mrb[28].mxu0  ;;  %v5220_v24 = vpop.f32.mrb[21].mxu1 }
 0x4d4   : > { %v6347_v26 = vadd.f32 %v2469_v23, %v6337_v19  ;;  %v5214_v27 = vpop.f32.mrb[29].mxu0  ;;  %v2519_v52 = vpop.f32.mrb[22].mxu1 }
 0x4d5   : > { %v6350_v55 = vadd.f32 %v2519_v52, %v6339_v21  ;;  %v2472_v57 = vpop.f32.mrb[30].mxu0  ;;  %v5221_v58 = vpop.f32.mrb[23].mxu1  ;;  %v2811_v59 = vsel %vm2428_vm5, %v6342_v22, -inf }
 0x4d6   : > { %v6355_v60 = vadd.f32 %v2472_v57, %v6344_v25  ;;  %2812 = vmax.xlane.f32.xlu1 %v2811_v59  ;;  %v5215_v28 = vpop.f32.mrb[31].mxu0  ;;  %v2805_v7 = vsel %vm2428_vm5, %v6347_v26, -inf }
 0x4d7   : > { %2806 = vmax.xlane.f32.xlu0 %v2805_v7  ;;  %v2814_v12 = vsel %vm2428_vm5, %v6350_v55, -inf }
 0x4d8   : > { %v2808_v16 = vsel %vm2428_vm5, %v6355_v60, -inf }
 0x4da   : > { %2815 = vmax.xlane.f32.xlu1 %v2814_v12  ;;  %v2610_v15 = vpop.f32.mrb[24].mxu1 }
 0x4db   : > { %v5232_v17 = vpop.f32.mrb[25].mxu1  ;;  %2809 = vmax.xlane.f32.xlu0 %v2808_v16  ;;  %v2563_v18 = vpop.f32.mrb[32].mxu0  ;;  %v6367_v2 = vadd.f32 %v2610_v15, %v6335_v13 }
 0x4dc   : > { %v6364_v29 = vadd.f32 %v2563_v18, %v6337_v19  ;;  %v5226_v30 = vpop.f32.mrb[33].mxu0  ;;  %v2613_v0 = vpop.f32.mrb[26].mxu1 }
 0x4dd   : > { %v2566_v5 = vpop.f32.mrb[34].mxu0  ;;  %v5233_v31 = vpop.f32.mrb[27].mxu1  ;;  %v6375_v35 = vadd.f32 %v2613_v0, %v6339_v21  ;;  %v2823_v41 = vsel %vm2428_vm5, %v6367_v2, -inf }
 0x4de   : > { %v6370_v9 = vadd.f32 %v2566_v5, %v6344_v25  ;;  %v5227_v32 = vpop.f32.mrb[35].mxu0  ;;  %v2817_v33 = vsel %vm2428_vm5, %v6364_v29, -inf }
 0x4df   : > { %2818 = vmax.xlane.f32.xlu0 %v2817_v33  ;;  %v2826_v51 = vsel %vm2428_vm5, %v6375_v35, -inf }
 0x4e0   : > { %v2820_v36 = vsel %vm2428_vm5, %v6370_v9, -inf }
 0x4e1   : > { %2821 = vmax.xlane.f32.xlu1 %v2820_v36 }
 0x4e2   : > { %v2704_v38 = vpop.f32.mrb[28].mxu1 }
 0x4e3   : > { %v5244_v42 = vpop.f32.mrb[29].mxu1  ;;  %2824 = vmax.xlane.f32.xlu0 %v2823_v41  ;;  %v2657_v43 = vpop.f32.mrb[36].mxu0  ;;  %v6387_v63 = vadd.f32 %v2704_v38, %v6335_v13 }
 0x4e4   : > { %v6382_v44 = vadd.f32 %v2657_v43, %v6337_v19  ;;  %v5238_v46 = vpop.f32.mrb[37].mxu0  ;;  %v2707_v48 = vpop.f32.mrb[30].mxu1 }
 0x4e5   : > { %v5245_v54 = vpop.f32.mrb[31].mxu1  ;;  %2827 = vmax.xlane.f32.xlu1 %v2826_v51  ;;  %v2660_v61 = vpop.f32.mrb[38].mxu0  ;;  %v6395_v27 = vadd.f32 %v2707_v48, %v6339_v21  ;;  %v2835_v58 = vsel %vm2428_vm5, %v6387_v63, -inf }
 0x4e6   : > { %v6390_v20 = vadd.f32 %v2660_v61, %v6344_v25  ;;  %v5239_v23 = vpop.f32.mrb[39].mxu0  ;;  %v2829_v24 = vsel %vm2428_vm5, %v6382_v44, -inf }
 0x4e7   : > { %2830 = vmax.xlane.f32.xlu0 %v2829_v24  ;;  %v2838_v16 = vsel %vm2428_vm5, %v6395_v27, -inf }
 0x4e8   : > { %v2832_v52 = vsel %vm2428_vm5, %v6390_v20, -inf }
 0x4e9   : > { %2833 = vmax.xlane.f32.xlu1 %v2832_v52 }
 0x4ea   : > { %v2798_v57 = vpop.f32.mrb[32].mxu1 }
 0x4eb   : > { %v5256_v59 = vpop.f32.mrb[33].mxu1  ;;  %2836 = vmax.xlane.f32.xlu0 %v2835_v58  ;;  %v2751_v28 = vpop.f32.mrb[40].mxu0  ;;  %v6407_v30 = vadd.f32 %v2798_v57, %v6335_v13 }
 0x4ec   : > { %v6402_v7 = vadd.f32 %v2751_v28, %v6337_v19  ;;  %v5250_v12 = vpop.f32.mrb[41].mxu0  ;;  %v2801_v15 = vpop.f32.mrb[34].mxu1 }
 0x4ed   : > { %v5257_v17 = vpop.f32.mrb[35].mxu1  ;;  %2839 = vmax.xlane.f32.xlu1 %v2838_v16  ;;  %v2754_v18 = vpop.f32.mrb[42].mxu0  ;;  %v6415_v19 = vadd.f32 %v2801_v15, %v6339_v21  ;;  %v2847_v33 = vsel %vm2428_vm5, %v6407_v30, -inf }
 0x4ee   : > { %v6410_v0 = vadd.f32 %v2754_v18, %v6344_v25  ;;  %v5251_v5 = vpop.f32.mrb[43].mxu0  ;;  %v2841_v31 = vsel %vm2428_vm5, %v6402_v7, -inf }
 0x4ef   : > { %2842 = vmax.xlane.f32.xlu0 %v2841_v31  ;;  %v2850_v13 = vsel %vm2428_vm5, %v6415_v19, -inf }
 0x4f0   : > { %v2844_v32 = vsel %vm2428_vm5, %v6410_v0, -inf }
 0x4f1   : > { %2845 = vmax.xlane.f32.xlu1 %v2844_v32 }
 0x4f3   : > { %2848 = vmax.xlane.f32.xlu0 %v2847_v33 }
 0x4f5   : > { %2851 = vmax.xlane.f32.xlu1 %v2850_v13 }
 0x563   : > { %v2813_v25 = vpop.xlane.xlu1 %2812 }
 0x564   : > { %v2855_v36 = vsub.f32 %v6342_v22, %v2813_v25  ;;  %v2807_v38 = vpop.xlane.xlu0 %2806 }
 0x565   : > { %v2853_v41 = vsub.f32 %v6347_v26, %v2807_v38 }
 0x566   : > { %v2873_v21 = vmul.f32 1.442695, %v2855_v36 }
 0x567   : > { %v2869_v42 = vmul.f32 1.442695, %v2853_v41  ;;  %v2816_v43 = vpop.xlane.xlu1 %2815 }
 0x568   : > { %v2856_v46 = vsub.f32 %v6350_v55, %v2816_v43  ;;  %v2810_v48 = vpop.xlane.xlu0 %2809 }
 0x569   : > { %5523 = vpow2.f32 %v2869_v42  ;;  %v2854_v51 = vsub.f32 %v6355_v60, %v2810_v48 }
 0x56a   : > { %5525 = vpow2.f32 %v2873_v21  ;;  %v2875_v54 = vmul.f32 1.442695, %v2856_v46 }
 0x56b   : > { %v2871_v61 = vmul.f32 1.442695, %v2854_v51 }
 0x56c   : > { %v2819_v23 = vpop.xlane.xlu0 %2818 }
 0x56d   : > { %5527 = vpow2.f32 %v2871_v61  ;;  %v2857_v24 = vsub.f32 %v6364_v29, %v2819_v23 }
 0x56e   : > { %v2822_v22 = vpop.xlane.xlu1 %2821  ;;  %5529 = vpow2.f32 %v2875_v54 }
 0x56f   : > { %v2877_v52 = vmul.f32 1.442695, %v2857_v24  ;;  %v2858_v26 = vsub.f32 %v6370_v9, %v2822_v22 }
 0x570   : > { %v2825_v57 = vpop.xlane.xlu0 %2824 }
 0x571   : > { %5531 = vpow2.f32 %v2877_v52  ;;  %v2879_v58 = vmul.f32 1.442695, %v2858_v26  ;;  %v2859_v55 = vsub.f32 %v6367_v2, %v2825_v57 }
 0x572   : > { %v2828_v59 = vpop.xlane.xlu1 %2827 }
 0x573   : > { %v6430_v28 = vpop.eup %5523  ;;  %5533 = vpow2.f32 %v2879_v58  ;;  %v2881_v60 = vmul.f32 1.442695, %v2859_v55  ;;  %v2860_v12 = vsub.f32 %v6375_v35, %v2828_v59 }
 0x574   : > { %v2831_v15 = vpop.xlane.xlu0 %2830  ;;  %v2901_v29 = vsel %vm2428_vm5, %v6430_v28, 0.0  ;;  %v6435_v16 = vpop.eup %5525 }
 0x575   : > { %5535 = vpow2.f32 %v2881_v60  ;;  %v2883_v9 = vmul.f32 1.442695, %v2860_v12  ;;  %v2861_v17 = vsub.f32 %v6382_v44, %v2831_v15  ;;  %2902 = vadd.xlane.f32.xlu0 %v2901_v29  ;;  %v2907_v35 = vsel %vm2428_vm5, %v6435_v16, 0.0 }
 0x576   : > { %v2834_v18 = vpop.xlane.xlu1 %2833 }
 0x577   : > { %v6438_v2 = vpop.eup %5527  ;;  %5537 = vpow2.f32 %v2883_v9  ;;  %v2885_v5 = vmul.f32 1.442695, %v2861_v17  ;;  %v2862_v31 = vsub.f32 %v6390_v20, %v2834_v18 }
 0x578   : > { %v2837_v32 = vpop.xlane.xlu0 %2836  ;;  %v2904_v33 = vsel %vm2428_vm5, %v6438_v2, 0.0  ;;  %v6445_v13 = vpop.eup %5529 }
 0x579   : > { %5539 = vpow2.f32 %v2885_v5  ;;  %v2887_v25 = vmul.f32 1.442695, %v2862_v31  ;;  %v2863_v44 = vsub.f32 %v6387_v63, %v2837_v32  ;;  %2908 = vadd.xlane.f32.xlu0 %v2907_v35  ;;  %2905 = vadd.xlane.f32.xlu1 %v2904_v33  ;;  %v2910_v43 = vsel %vm2428_vm5, %v6445_v13, 0.0 }
 0x57a   : > { %v2840_v36 = vpop.xlane.xlu1 %2839 }
 0x57b   : > { %v6448_v38 = vpop.eup %5531  ;;  %5541 = vpow2.f32 %v2887_v25  ;;  %v2889_v20 = vmul.f32 1.442695, %v2863_v44  ;;  %v2864_v41 = vsub.f32 %v6395_v27, %v2840_v36 }
 0x57c   : > { %v2843_v21 = vpop.xlane.xlu0 %2842  ;;  %v2913_v42 = vsel %vm2428_vm5, %v6448_v38, 0.0 }
 0x57d   : > { %v6455_v46 = vpop.eup %5533  ;;  %5543 = vpow2.f32 %v2889_v20  ;;  %v2891_v63 = vmul.f32 1.442695, %v2864_v41  ;;  %v2865_v48 = vsub.f32 %v6402_v7, %v2843_v21  ;;  %2914 = vadd.xlane.f32.xlu0 %v2913_v42  ;;  %2911 = vadd.xlane.f32.xlu1 %v2910_v43 }
 0x57e   : > { %v2846_v51 = vpop.xlane.xlu1 %2845  ;;  %v2916_v22 = vsel %vm2428_vm5, %v6455_v46, 0.0 }
 0x57f   : > { %v6458_v54 = vpop.eup %5535  ;;  %5545 = vpow2.f32 %v2891_v63  ;;  %v2893_v27 = vmul.f32 1.442695, %v2865_v48  ;;  %v2866_v61 = vsub.f32 %v6410_v0, %v2846_v51 }
 0x580   : > { %v2849_v23 = vpop.xlane.xlu0 %2848  ;;  %v2919_v24 = vsel %vm2428_vm5, %v6458_v54, 0.0 }
 0x581   : > { %v6465_v52 = vpop.eup %5537  ;;  %5547 = vpow2.f32 %v2893_v27  ;;  %v2895_v7 = vmul.f32 1.442695, %v2866_v61  ;;  %v2867_v26 = vsub.f32 %v6407_v30, %v2849_v23  ;;  %2920 = vadd.xlane.f32.xlu0 %v2919_v24  ;;  %2917 = vadd.xlane.f32.xlu1 %v2916_v22 }
 0x582   : > { %v2852_v57 = vpop.xlane.xlu1 %2851  ;;  %v2922_v60 = vsel %vm2428_vm5, %v6465_v52, 0.0 }
 0x583   : > { %v6468_v58 = vpop.eup %5539  ;;  %5549 = vpow2.f32 %v2895_v7  ;;  %v2897_v0 = vmul.f32 1.442695, %v2867_v26  ;;  %v2868_v55 = vsub.f32 %v6415_v19, %v2852_v57 }
 0x584   : > { %v2925_v59 = vsel %vm2428_vm5, %v6468_v58, 0.0 }
 0x585   : > { %v6475_v12 = vpop.eup %5541  ;;  %5551 = vpow2.f32 %v2897_v0  ;;  %v2899_v15 = vmul.f32 1.442695, %v2868_v55  ;;  %2926 = vadd.xlane.f32.xlu0 %v2925_v59  ;;  %2923 = vadd.xlane.f32.xlu1 %v2922_v60 }
 0x586   : > { %v2928_v19 = vsel %vm2428_vm5, %v6475_v12, 0.0 }
 0x587   : > { %v6477_v30 = vpop.eup %5543  ;;  %5553 = vpow2.f32 %v2899_v15 }
 0x588   : > { %v2931_v29 = vsel %vm2428_vm5, %v6477_v30, 0.0 }
 0x589   : > { %v6483_v9 = vpop.eup %5545  ;;  %2932 = vadd.xlane.f32.xlu0 %v2931_v29  ;;  %2929 = vadd.xlane.f32.xlu1 %v2928_v19 }
 0x58a   : > { %v2934_v5 = vsel %vm2428_vm5, %v6483_v9, 0.0 }
 0x58b   : > { %v6485_v17 = vpop.eup %5547 }
 0x58c   : > { %v2937_v18 = vsel %vm2428_vm5, %v6485_v17, 0.0 }
 0x58d   : > { %v6491_v31 = vpop.eup %5549  ;;  %2938 = vadd.xlane.f32.xlu0 %v2937_v18  ;;  %2935 = vadd.xlane.f32.xlu1 %v2934_v5 }
 0x58e   : > { %v2940_v33 = vsel %vm2428_vm5, %v6491_v31, 0.0 }
 0x58f   : > { %v6493_v32 = vpop.eup %5551 }
 0x590   : > { %v2943_v35 = vsel %vm2428_vm5, %v6493_v32, 0.0 }
 0x591   : > { %v6499_v25 = vpop.eup %5553  ;;  %2944 = vadd.xlane.f32.xlu0 %v2943_v35  ;;  %2941 = vadd.xlane.f32.xlu1 %v2940_v33 }
 0x592   : > { %v2946_v44 = vsel %vm2428_vm5, %v6499_v25, 0.0 }
 0x595   : > { %2947 = vadd.xlane.f32.xlu1 %v2946_v44  ;;  %v5492_v44 = vld [vmem:[%s5903_s26] sm:$0xff]  }
 0x602   : > { %v2903_v36 = vpop.xlane.xlu0 %2902 }
 0x603   : > { %5555 = vrcp.f32 %v2903_v36 }
 0x606   : > { %v2909_v20 = vpop.xlane.xlu0 %2908  ;;  %v2906_v41 = vpop.xlane.xlu1 %2905 }
 0x607   : > { %5557 = vrcp.f32 %v2906_v41 }
 0x608   : > { %5559 = vrcp.f32 %v2909_v20 }
 0x60a   : > { %v2915_v21 = vpop.xlane.xlu0 %2914  ;;  %v2912_v42 = vpop.xlane.xlu1 %2911 }
 0x60b   : > { %5561 = vrcp.f32 %v2912_v42 }
 0x60c   : > { %5563 = vrcp.f32 %v2915_v21 }
 0x60d   : > { %v5556_v48 = vpop.eup %5555 }
 0x60e   : > { %v2921_v43 = vpop.xlane.xlu0 %2920  ;;  %v2918_v63 = vpop.xlane.xlu1 %2917  ;;  %v2965_v23 = vmul.f32 %v5556_v48, %v6430_v28 }
 0x60f   : > { %5565 = vrcp.f32 %v2918_v63 }
 0x610   : > { %5567 = vrcp.f32 %v2921_v43 }
 0x611   : > { %v5558_v51 = vpop.eup %5557 }
 0x612   : > { %v2927_v27 = vpop.xlane.xlu0 %2926  ;;  %v2924_v61 = vpop.xlane.xlu1 %2923  ;;  %v2966_v24 = vmul.f32 %v5558_v51, %v6438_v2 }
 0x613   : > { %v5560_v22 = vpop.eup %5559  ;;  %5569 = vrcp.f32 %v2924_v61 }
 0x614   : > { %v2981_v7 = vpack.c.bf16 %v2966_v24, %v2965_v23  ;;  %5571 = vrcp.f32 %v2927_v27  ;;  %v2967_v55 = vmul.f32 %v5560_v22, %v6435_v16 }
 0x615   : > { %v5562_v26 = vpop.eup %5561 }
 0x616   : > { %v2933_v57 = vpop.xlane.xlu0 %2932  ;;  %v2930_v0 = vpop.xlane.xlu1 %2929  ;;  %v2968_v59 = vmul.f32 %v5562_v26, %v6445_v13  ;;  %5261 = vmatmul.mubr.msk.bf16.vlgmr.msra.gmra.mrb[44].mxu0 %vm2428_vm5, %v2981_v7  ;;  %v5493_v7 = vld [vmem:[%s5903_s26 + $0x10] sm:$0xff]  }
 0x617   : > { %v5564_v60 = vpop.eup %5563  ;;  %5271 = vmatpush3.bf16.msra.mxu0 %v2418_v40  ;;  %5573 = vrcp.f32 %v2930_v0  ;;  %5272 = vmatprep.mubr.msk.bf16.mxu0 %vm5708_vm4, %v5707_v49 }
 0x618   : > { %v2982_v28 = vpack.c.bf16 %v2968_v59, %v2967_v55  ;;  %5282 = vmatprep.subr.bf16.mxu0 %v5707_v49  ;;  %5575 = vrcp.f32 %v2933_v57  ;;  %v2969_v13 = vmul.f32 %v5564_v60, %v6448_v38 }
 0x619   : > { %v5566_v2 = vpop.eup %5565 }
 0x61a   : > { %v2939_v15 = vpop.xlane.xlu0 %2938  ;;  %v2936_v16 = vpop.xlane.xlu1 %2935  ;;  %v2970_v29 = vmul.f32 %v5566_v2, %v6455_v46  ;;  %5267 = vmatmul.mubr.msk.bf16.vlgmr.msra.gmra.mrb[36].mxu1 %vm2428_vm5, %v2982_v28 }
 0x61b   : > { %v5568_v19 = vpop.eup %5567  ;;  %5277 = vmatpush3.bf16.msra.mxu1 %v2419_v39  ;;  %5577 = vrcp.f32 %v2936_v16  ;;  %5278 = vmatprep.mubr.msk.bf16.mxu1 %vm5708_vm4, %v5707_v49 }
 0x61c   : > { %v2983_v14 = vpack.c.bf16 %v2970_v29, %v2969_v13  ;;  %5288 = vmatprep.subr.bf16.mxu1 %v5707_v49  ;;  %5579 = vrcp.f32 %v2939_v15  ;;  %v2971_v46 = vmul.f32 %v5568_v19, %v6458_v54 }
 0x61d   : > { %v5570_v37 = vpop.eup %5569 }
 0x61e   : > { %v2945_v40 = vpop.xlane.xlu0 %2944  ;;  %v2942_v38 = vpop.xlane.xlu1 %2941  ;;  %v2972_v18 = vmul.f32 %v5570_v37, %v6465_v52  ;;  %5273 = vmatmul.mubr.msk.bf16.vlgmr.msra.gmra.mrb[48].mxu0 %vm2428_vm5, %v2983_v14 }
 0x61f   : > { %v5572_v5 = vpop.eup %5571  ;;  %5283 = vmatpush3.bf16.msra.mxu0 %v2420_v10  ;;  %5581 = vrcp.f32 %v2942_v38  ;;  %5284 = vmatprep.mubr.msk.bf16.mxu0 %vm5708_vm4, %v5707_v49 }
 0x620   : > { %5583 = vrcp.f32 %v2945_v40  ;;  %v2984_v11 = vpack.c.bf16 %v2972_v18, %v2971_v46  ;;  %5294 = vmatprep.subr.bf16.mxu0 %v5707_v49  ;;  %v2973_v54 = vmul.f32 %v5572_v5, %v6468_v58  ;;  %v5494_v40 = vld [vmem:[%s5903_s26 + $0x18] sm:$0xff]  }
 0x621   : > { %v5574_v34 = vpop.eup %5573 }
 0x622   : > { %v2948_v39 = vpop.xlane.xlu1 %2947  ;;  %v2974_v52 = vmul.f32 %v5574_v34, %v6475_v12  ;;  %5279 = vmatmul.mubr.msk.bf16.vlgmr.msra.gmra.mrb[40].mxu1 %vm2428_vm5, %v2984_v11  ;;  %v5576_v35 = vpop.eup %5575  ;;  %v4805_v34 = vld [vmem:[%s6887_s8] ss:$0 sm:$0xff] }
 0x623   : > { %5585 = vrcp.f32 %v2948_v39  ;;  %5289 = vmatpush3.bf16.msra.mxu1 %v2421_v6  ;;  %5290 = vmatprep.mubr.msk.bf16.mxu1 %vm5708_vm4, %v5707_v49  ;;  %v2975_v10 = vmul.f32 %v5576_v35, %v6477_v30 }
 0x624   : > { %v2985_v53 = vpack.c.bf16 %v2974_v52, %v2973_v54  ;;  %5300 = vmatprep.subr.bf16.mxu1 %v5707_v49 }
 0x625   : > { %v5578_v3 = vpop.eup %5577 }
 0x626   : > { %v2976_v58 = vmul.f32 %v5578_v3, %v6483_v9  ;;  %5285 = vmatmul.mubr.msk.bf16.vlgmr.msra.gmra.mrb[52].mxu0 %vm2428_vm5, %v2985_v53  ;;  %v5580_v12 = vpop.eup %5579 }
 0x627   : > { %5295 = vmatpush3.bf16.msra.mxu0 %v2422_v8  ;;  %5296 = vmatprep.mubr.msk.bf16.mxu0 %vm5708_vm4, %v5707_v49  ;;  %v2977_v33 = vmul.f32 %v5580_v12, %v6485_v17  ;;  %v5619_v12 = vld [vmem:[#allocation2] sm:$0xff] }
 0x628   : > { %v2986_v47 = vpack.c.bf16 %v2976_v58, %v2975_v10 }
 0x629   : > { %v5582_v62 = vpop.eup %5581 }
 0x62a   : > { %v5584_v6 = vpop.eup %5583  ;;  %v2978_v30 = vmul.f32 %v5582_v62, %v6491_v31  ;;  %5291 = vmatmul.mubr.msk.bf16.vlgmr.msra.gmra.mrb[44].mxu1 %vm2428_vm5, %v2986_v47  ;;  %v5491_v31 = vld [vmem:[%s5903_s26 + $0x8] sm:$0xff]  }
 0x62b   : > { %5301 = vmatpush3.bf16.msra.mxu1 %v2423_v4  ;;  %5302 = vmatprep.mubr.msk.bf16.mxu1 %vm5708_vm4, %v5707_v49  ;;  %v2979_v8 = vmul.f32 %v5584_v6, %v6493_v32  ;;  %v5620_v6 = vld [vmem:[#allocation2 + $0x8] sm:$0xff] }
 0x62c   : > { %v2987_v1 = vpack.c.bf16 %v2978_v30, %v2977_v33  ;;  %5306 = vmatprep.subr.bf16.mxu0 %v5491_v31  ;;  %v5621_v30 = vld [vmem:[#allocation2 + $0x10] sm:$0xff] }
 0x62d   : > { %v5586_v50 = vpop.eup %5585 }
 0x62e   : > { %v2980_v9 = vmul.f32 %v5586_v50, %v6499_v25  ;;  %5297 = vmatmul.mubr.msk.bf16.vlgmr.msra.gmra.mrb[56].mxu0 %vm2428_vm5, %v2987_v1 }
 0x62f   : > { %5307 = vmatpush3.bf16.msra.mxu0 %v5491_v31 }
 0x630   : > { %v2988_v17 = vpack.c.bf16 %v2980_v9, %v2979_v8  ;;  %5312 = vmatprep.subr.bf16.mxu0 %v5492_v44  ;;  %v5622_v8 = vld [vmem:[#allocation2 + $0x18] sm:$0xff] }
 0x632   : > { %5303 = vmatmul.mubr.msk.bf16.vlgmr.msra.gmra.mrb[48].mxu1 %vm2428_vm5, %v2988_v17 }
 0x6e9   : > { %v3026_v45 = vpop.f32.mrb[44].mxu0 }
 0x6ea   : > { %v5262_v56 = vpop.f32.mrb[45].mxu0 }
 0x6eb   : > { %v3029_v4 = vpop.f32.mrb[46].mxu0 }
 0x6ec   : > { %v3341_v49 = vpack.c.bf16 %v3029_v4, %v3026_v45  ;;  %v5263_v36 = vpop.f32.mrb[47].mxu0 }
 0x6ed   : > { %v3070_v20 = vpop.f32.mrb[36].mxu1 }
 0x6ee   : > { %v5268_v32 = vpop.f32.mrb[37].mxu1 }
 0x6ef   : > { %v3073_v41 = vpop.f32.mrb[38].mxu1 }
 0x6f0   : > { %v3342_v25 = vpack.c.bf16 %v3073_v41, %v3070_v20  ;;  %v5269_v21 = vpop.f32.mrb[39].mxu1 }
 0x6f1   : > { %v3114_v42 = vpop.f32.mrb[48].mxu0 }
 0x6f2   : > { %v5274_v43 = vpop.f32.mrb[49].mxu0 }
 0x6f3   : > { %v3117_v63 = vpop.f32.mrb[50].mxu0 }
 0x6f4   : > { %v3345_v48 = vpack.c.bf16 %v3117_v63, %v3114_v42  ;;  %v5275_v51 = vpop.f32.mrb[51].mxu0 }
 0x6f5   : > { %v3158_v27 = vpop.f32.mrb[40].mxu1 }
 0x6f6   : > { %v5280_v61 = vpop.f32.mrb[41].mxu1  ;;  %5308 = vmatprep.mubr.msk.bf16.mxu0 %vm2428_vm5, %v3345_v48 }
 0x6f7   : > { %v3161_v23 = vpop.f32.mrb[42].mxu1 }
 0x6f8   : > { %v3346_v24 = vpack.c.bf16 %v3161_v23, %v3158_v27  ;;  %v5281_v22 = vpop.f32.mrb[43].mxu1 }
 0x6f9   : > { %v3202_v26 = vpop.f32.mrb[52].mxu0  ;;  %v5497_v22 = vld [vmem:[%s5917_s5 + $0x4] ss:$8 sps:$4 sm:$0xff]  }
 0x6fa   : > { %v5286_v57 = vpop.f32.mrb[53].mxu0  ;;  %5309 = vmatmul.mubr.msk.bf16.vlgmr.msra.gmra.mrb[60].mxu0 %vm2428_vm5, %v3346_v24  ;;  %3770 = vmatprep.subr.bf16.mxu1 %v5497_v22 }
 0x6fb   : > { %v3205_v0 = vpop.f32.mrb[54].mxu0  ;;  %5313 = vmatpush3.bf16.msra.mxu0 %v5492_v44  ;;  %5314 = vmatprep.mubr.msk.bf16.mxu0 %vm2428_vm5, %v3341_v49  ;;  %v5498_v57 = vld [vmem:[%s5917_s5 + $0x10] ss:$8 sps:$4 sm:$0xff]  }
 0x6fc   : > { %v3472_v55 = vpack.c.bf16 %v3205_v0, %v3202_v26  ;;  %v5287_v59 = vpop.f32.mrb[55].mxu0  ;;  %5318 = vmatprep.subr.bf16.mxu0 %v5493_v7  ;;  %v5500_v26 = vld [vmem:[%s5917_s5 + $0x14] ss:$8 sps:$4 sm:$0xff]   ;;  %v5503_v0 = vld [vmem:[%s5917_s5 + $0x24] ss:$8 sps:$4 sm:$0xff]  }
 0x6fd   : > { %v3246_v60 = vpop.f32.mrb[44].mxu1  ;;  %v5506_v59 = vld [vmem:[%s5917_s5 + $0x34] ss:$8 sps:$4 sm:$0xff]  }
 0x6fe   : > { %v5292_v28 = vpop.f32.mrb[45].mxu1 }
 0x6ff   : > { %v3249_v2 = vpop.f32.mrb[46].mxu1  ;;  %v5709_v28 = vmov 0  }
 0x700   : > { %v3473_v15 = vpack.c.bf16 %v3249_v2, %v3246_v60  ;;  %v5293_v16 = vpop.f32.mrb[47].mxu1  ;;  %v5504_v60 = vld [vmem:[%s5917_s5 + $0x30] ss:$8 sps:$4 sm:$0xff]   ;;  %3802 = vmatprep.mubr.bf16.mxu1 %v5709_v28 }
 0x701   : > { %v3290_v13 = vpop.f32.mrb[56].mxu0 }
 0x702   : > { %v5298_v29 = vpop.f32.mrb[57].mxu0 }
 0x703   : > { %v3293_v19 = vpop.f32.mrb[58].mxu0 }
 0x704   : > { %v3542_v14 = vpack.c.bf16 %v3293_v19, %v3290_v13  ;;  %v5299_v37 = vpop.f32.mrb[59].mxu0 }
 0x705   : > { %v3334_v38 = vpop.f32.mrb[48].mxu1 }
 0x706   : > { %v5304_v46 = vpop.f32.mrb[49].mxu1  ;;  %5315 = vmatmul.mubr.msk.bf16.vlgmr.msra.gmra.mrb[60].mxu0 %vm2428_vm5, %v3342_v25 }
 0x707   : > { %v3337_v18 = vpop.f32.mrb[50].mxu1  ;;  %5319 = vmatpush3.bf16.msra.mxu0 %v5493_v7  ;;  %5320 = vmatprep.mubr.msk.bf16.mxu0 %vm2428_vm5, %v3472_v55  ;;  %v5495_v7 = vld [vmem:[%s5917_s5] ss:$8 sps:$4 sm:$0xff]  }
 0x708   : > { %v3543_v5 = vpack.c.bf16 %v3337_v18, %v3334_v38  ;;  %v5305_v11 = vpop.f32.mrb[51].mxu1  ;;  %5324 = vmatprep.subr.bf16.mxu0 %v5494_v40  ;;  %3771 = vmatpush1.bf16.msra.mxu1 %v5495_v7  ;;  %v5501_v55 = vld [vmem:[%s5917_s5 + $0x20] ss:$8 sps:$4 sm:$0xff]  }
 0x709   : > { %3772 = vmatprep.subr.bf16.mxu1 %v5500_v26  ;;  %v4806_v11 = vld [vmem:[%s6888_s10] ss:$0 sm:$0xff] }
 0x70c   : > { %3773 = vmatpush1.bf16.msra.mxu1 %v5498_v57 }
 0x70d   : > { %3774 = vmatprep.subr.bf16.mxu1 %v5503_v0 }
 0x710   : > { %3775 = vmatpush1.bf16.msra.mxu1 %v5501_v55 }
 0x711   : > { %3776 = vmatprep.subr.bf16.mxu1 %v5506_v59 }
 0x712   : > { %5321 = vmatmul.mubr.msk.bf16.vlgmr.msra.gmra.mrb[60].mxu0 %vm2428_vm5, %v3473_v15 }
 0x713   : > { %5325 = vmatpush3.bf16.msra.mxu0 %v5494_v40  ;;  %5326 = vmatprep.mubr.msk.bf16.mxu0 %vm2428_vm5, %v3542_v14 }
 0x714   : > { %3777 = vmatpush1.bf16.msra.mxu1 %v5504_v60 }
 0x71e   : > { %5327 = vmatmul.mubr.msk.bf16.vlgmr.msra.gmra.mrb[60].mxu0 %vm2428_vm5, %v3543_v5 }
 0x7f1   : > { %v5328_v39 = vpop.f32.mrb[60].mxu0 }
 0x7f2   : > { %v3593_v54 = vpop.f32.mrb[61].mxu0  ;;  %v3621_v52 = vadd.f32 %v5328_v39, %v4805_v34 }
 0x7f3   : > { %v3619_v35 = vadd.f32 %v4805_v34, %v3593_v54  ;;  %v5329_v53 = vpop.f32.mrb[62].mxu0 }
 0x7f4   : > { %v3596_v3 = vpop.f32.mrb[63].mxu0  ;;  %v3622_v10 = vadd.f32 %v5329_v53, %v4805_v34  ;;  %v3625_v50 = vadd.f32 %v5621_v30, %v3621_v52  ;;  %v4807_v53 = vld [vmem:[%s6889_s28] ss:$0 sm:$0xff] }
 0x7f5   : > { %v3620_v58 = vadd.f32 %v4805_v34, %v3596_v3  ;;  %v3623_v47 = vadd.f32 %v5619_v12, %v3619_v35 }
 0x7f6   : > { %v3626_v9 = vadd.f32 %v5622_v8, %v3622_v10  ;;  %v3635_v17 = vsel %vm1358_vm3, %v3625_v50, 0.0 }
 0x7f7   : > { %v3629_v62 = vsel %vm1358_vm3, %v3623_v47, 0.0  ;;  %v3624_v33 = vadd.f32 %v5620_v6, %v3620_v58 }
 0x7f8   : > { %3630 = vadd.xlane.f32.xlu0 %v3629_v62  ;;  %v3638_v31 = vsel %vm1358_vm3, %v3626_v9, 0.0 }
 0x7f9   : > { %v3632_v1 = vsel %vm1358_vm3, %v3624_v33, 0.0 }
 0x7fa   : > { %3633 = vadd.xlane.f32.xlu1 %v3632_v1 }
 0x7fc   : > { %3636 = vadd.xlane.f32.xlu0 %v3635_v17  ;;  %v5508_v17 = vld [vmem:[%s5928_s12] sm:$0xff]  }
 0x7fe   : > { %3639 = vadd.xlane.f32.xlu1 %v3638_v31  ;;  %v5509_v31 = vld [vmem:[%s5928_s12 + $0x48] sm:$0xff]  }
 0x885   : > { %v3631_v44 = vpop.xlane.xlu0 %3630 }
 0x886   : > { %v3642_v45 = vmul.f32 0.015625, %v3631_v44  ;;  %v5510_v44 = vld [vmem:[%s5928_s12 + $0x8] sm:$0xff]  }
 0x887   : > { %v3634_v56 = vpop.xlane.xlu1 %3633 }
 0x888   : > { %v3646_v4 = vsub.f32 %v3623_v47, %v3642_v45  ;;  %v3643_v49 = vmul.f32 0.015625, %v3634_v56  ;;  %v5511_v45 = vld [vmem:[%s5928_s12 + $0x50] sm:$0xff]  }
 0x889   : > { %v3637_v36 = vpop.xlane.xlu0 %3636  ;;  %v5512_v56 = vld [vmem:[%s5928_s12 + $0x10] sm:$0xff]  }
 0x88a   : > { %v3647_v20 = vsub.f32 %v3624_v33, %v3643_v49  ;;  %v3644_v32 = vmul.f32 0.015625, %v3637_v36  ;;  %v3650_v41 = vmul.f32 %v3646_v4, %v3646_v4  ;;  %v5514_v49 = vld [vmem:[%s5928_s12 + $0x18] sm:$0xff]   ;;  %v5515_v36 = vld [vmem:[%s5928_s12 + $0x60] sm:$0xff]  }
 0x88b   : > { %v3640_v25 = vpop.xlane.xlu1 %3639 }
 0x88c   : > { %v3648_v21 = vsub.f32 %v3625_v50, %v3644_v32  ;;  %v3645_v42 = vmul.f32 0.015625, %v3640_v25  ;;  %v3654_v43 = vsel %vm1358_vm3, %v3650_v41, 0.0  ;;  %v3651_v63 = vmul.f32 %v3647_v20, %v3647_v20  ;;  %v5517_v32 = vld [vmem:[%s5928_s12 + $0x68] sm:$0xff]   ;;  %v5519_v25 = vld [vmem:[%s5928_s12 + $0x70] sm:$0xff]  }
 0x88d   : > { %3655 = vadd.xlane.f32.xlu0 %v3654_v43  ;;  %v5518_v41 = vld [vmem:[%s5928_s12 + $0x28] sm:$0xff]   ;;  %v5522_v43 = vld [vmem:[%s5928_s12 + $0x38] sm:$0xff]  }
 0x88e   : > { %v3649_v48 = vsub.f32 %v3626_v9, %v3645_v42  ;;  %v3657_v51 = vsel %vm1358_vm3, %v3651_v63, 0.0  ;;  %v3652_v27 = vmul.f32 %v3648_v21, %v3648_v21  ;;  %v5507_v9 = vld [vmem:[%s5928_s12 + $0x40] sm:$0xff]   ;;  %v5521_v42 = vld [vmem:[%s5928_s12 + $0x78] sm:$0xff]   ;;  %v3714_v63 = vlaneseq }
 0x88f   : > { %3658 = vadd.xlane.f32.xlu1 %v3657_v51  ;;  %4994 = vmatprep.subr.bf16.mxu1 %v5507_v9 }
 0x890   : > { %v3660_v61 = vsel %vm1358_vm3, %v3652_v27, 0.0  ;;  %v3653_v23 = vmul.f32 %v3649_v48, %v3649_v48  ;;  %v3712_v27 = vld [vmem:[%s5923_s27] sm:$0x3] }
 0x891   : > { %3661 = vadd.xlane.f32.xlu0 %v3660_v61 }
 0x892   : > { %v3663_v24 = vsel %vm1358_vm3, %v3653_v23, 0.0 }
 0x893   : > { %3664 = vadd.xlane.f32.xlu1 %v3663_v24 }
 0x91a   : > { %v3656_v2 = vpop.xlane.xlu0 %3655 }
 0x91b   : > { %v3666_v15 = vmul.f32 0.015625, %v3656_v2 }
 0x91c   : > { %v3659_v16 = vpop.xlane.xlu1 %3658 }
 0x91d   : > { %v3670_v13 = vadd.f32 1e-05, %v3666_v15  ;;  %v3667_v29 = vmul.f32 0.015625, %v3659_v16 }
 0x91e   : > { %v3662_v19 = vpop.xlane.xlu0 %3661 }
 0x91f   : > { %5587 = vrsqrt.f32 %v3670_v13  ;;  %v3671_v14 = vadd.f32 1e-05, %v3667_v29  ;;  %v3668_v37 = vmul.f32 0.015625, %v3662_v19 }
 0x920   : > { %v3665_v40 = vpop.xlane.xlu1 %3664 }
 0x921   : > { %5589 = vrsqrt.f32 %v3671_v14  ;;  %v3672_v38 = vadd.f32 1e-05, %v3668_v37  ;;  %v3669_v46 = vmul.f32 0.015625, %v3665_v40 }
 0x923   : > { %5591 = vrsqrt.f32 %v3672_v38  ;;  %v3673_v18 = vadd.f32 1e-05, %v3669_v46 }
 0x925   : > { %5593 = vrsqrt.f32 %v3673_v18 }
 0x929   : > { %v5588_v5 = vpop.eup %5587 }
 0x92a   : > { %v3678_v34 = vmul.f32 %v5588_v5, %v3646_v4  ;;  %v5513_v4 = vld [vmem:[%s5928_s12 + $0x58] sm:$0xff]  }
 0x92b   : > { %v5590_v39 = vpop.eup %5589 }
 0x92c   : > { %v3688_v54 = vmul.f32 %v4806_v11, %v3678_v34  ;;  %v3679_v52 = vmul.f32 %v5590_v39, %v3647_v20  ;;  %v5516_v20 = vld [vmem:[%s5928_s12 + $0x20] sm:$0xff]  }
 0x92d   : > { %v5592_v35 = vpop.eup %5591 }
 0x92e   : > { %v3689_v3 = vmul.f32 %v4806_v11, %v3679_v52  ;;  %v3680_v58 = vmul.f32 %v5592_v35, %v3648_v21  ;;  %v6604_v47 = vadd.f32 %v4807_v53, %v3688_v54  ;;  %v5520_v21 = vld [vmem:[%s5928_s12 + $0x30] sm:$0xff]  }
 0x92f   : > { %v5594_v10 = vpop.eup %5593 }
 0x930   : > { %v3681_v12 = vmul.f32 %v5594_v10, %v3649_v48  ;;  %v6606_v62 = vadd.f32 %v4807_v53, %v3689_v3  ;;  %v3690_v30 = vmul.f32 %v4806_v11, %v3680_v58  ;;  %v3715_v48 = vshrl.u32 %v3714_v63, 7 }
 0x932   : > { %v3702_v6 = vpack.c.bf16 %v6606_v62, %v6604_v47  ;;  %v3691_v33 = vmul.f32 %v4806_v11, %v3681_v12  ;;  %v6613_v1 = vadd.f32 %v4807_v53, %v3690_v30  ;;  %v3716_v51 = vsub.s32 0, %v3715_v48 }
 0x933   : > { %v3720_v61 = vsub.s32 1, %v3715_v48 }
 0x934   : > { %4816 = vmatmul.mubr.msk.bf16.vlgmr.msra.gmra.mrb[52].mxu1 %vm1358_vm3, %v3702_v6  ;;  %v6611_v50 = vadd.f32 %v4807_v53, %v3691_v33  ;;  %v3717_v23 = vrot.slane %v3712_v27, %v3716_v51 }
 0x935   : > { %3812 = vmatprep.mubr.bf16.mxu1 %v5709_v28  ;;  %4995 = vmatpush3.bf16.msra.mxu1 %v5508_v17  ;;  %v3721_v24 = vrot.slane %v3712_v27, %v3720_v61 }
 0x936   : > { %v3703_v8 = vpack.c.bf16 %v6611_v50, %v6613_v1  ;;  %4996 = vmatprep.subr.bf16.mxu1 %v5509_v31 }
 0x939   : > { %4997 = vmatpush3.bf16.msra.mxu1 %v5510_v44 }
 0x93a   : > { %4998 = vmatprep.subr.bf16.mxu1 %v5511_v45 }
 0x93c   : > { %4817 = vmatmul.mubr.msk.bf16.gmra.mrb[56].mxu1 %vm1358_vm3, %v3703_v8 }
 0x93d   : > { %4999 = vmatpush3.bf16.msra.mxu1 %v5512_v56 }
 0x93e   : > { %5000 = vmatprep.subr.bf16.mxu1 %v5513_v4 }
 0x941   : > { %5001 = vmatpush3.bf16.msra.mxu1 %v5514_v49 }
 0x942   : > { %5002 = vmatprep.subr.bf16.mxu1 %v5515_v36 }
 0x945   : > { %5003 = vmatpush3.bf16.msra.mxu1 %v5516_v20 }
 0x946   : > { %5004 = vmatprep.subr.bf16.mxu1 %v5517_v32 }
 0x949   : > { %5005 = vmatpush3.bf16.msra.mxu1 %v5518_v41 }
 0x94a   : > { %5006 = vmatprep.subr.bf16.mxu1 %v5519_v25 }
 0x94d   : > { %5007 = vmatpush3.bf16.msra.mxu1 %v5520_v21 }
 0x94e   : > { %5008 = vmatprep.subr.bf16.mxu1 %v5521_v42 }
 0x951   : > { %5009 = vmatpush3.bf16.msra.mxu1 %v5522_v43 }
 0xa07   : > { %v3804_v22 = vpop.f32.mrb[52].mxu1 }
 0xa08   : > { %v6635_v7 = vadd.f32 %v3804_v22, %v3717_v23  ;;  %v3806_v26 = vpop.f32.mrb[53].mxu1 }
 0xa09   : > { %v6637_v57 = vadd.f32 %v3806_v26, %v3721_v24  ;;  %v3808_v0 = vpop.f32.mrb[54].mxu1 }
 0xa0a   : > { %v3823_v55 = vmul.f32 %v6635_v7, %v6635_v7  ;;  %v6641_v59 = vadd.f32 %v3808_v0, %v3717_v23  ;;  %v3810_v60 = vpop.f32.mrb[55].mxu1 }
 0xa0b   : > { %v3824_v28 = vmul.f32 %v6637_v57, %v6637_v57  ;;  %v6645_v2 = vadd.f32 %v3810_v60, %v3721_v24 }
 0xa0c   : > { %v3831_v15 = vmul.f32 %v3823_v55, %v6635_v7  ;;  %v3825_v16 = vmul.f32 %v6641_v59, %v6641_v59 }
 0xa0d   : > { %v3832_v13 = vmul.f32 %v3824_v28, %v6637_v57  ;;  %v3826_v29 = vmul.f32 %v6645_v2, %v6645_v2 }
 0xa0e   : > { %v3839_v19 = vmul.f32 0.044715, %v3831_v15  ;;  %v3833_v14 = vmul.f32 %v3825_v16, %v6641_v59 }
 0xa0f   : > { %v3840_v37 = vmul.f32 0.044715, %v3832_v13  ;;  %v3834_v40 = vmul.f32 %v3826_v29, %v6645_v2  ;;  %v3814_v38 = vpop.f32.mrb[56].mxu1 }
 0xa10   : > { %v3847_v46 = vadd.f32 %v3839_v19, %v6635_v7  ;;  %v3841_v18 = vmul.f32 0.044715, %v3833_v14  ;;  %v6656_v5 = vadd.f32 %v3814_v38, %v3717_v23  ;;  %v3816_v11 = vpop.f32.mrb[57].mxu1 }
 0xa11   : > { %v3848_v34 = vadd.f32 %v3840_v37, %v6637_v57  ;;  %v3842_v39 = vmul.f32 0.044715, %v3834_v40  ;;  %v6659_v54 = vadd.f32 %v3816_v11, %v3721_v24  ;;  %v3818_v52 = vpop.f32.mrb[58].mxu1 }
 0xa12   : > { %v3855_v35 = vmul.f32 0.7978846, %v3847_v46  ;;  %v3849_v53 = vadd.f32 %v3841_v18, %v6641_v59  ;;  %v3827_v3 = vmul.f32 %v6656_v5, %v6656_v5  ;;  %v6664_v10 = vadd.f32 %v3818_v52, %v3717_v23  ;;  %v3820_v58 = vpop.f32.mrb[59].mxu1 }
 0xa13   : > { %v3856_v12 = vmul.f32 0.7978846, %v3848_v34  ;;  %v3850_v6 = vadd.f32 %v3842_v39, %v6645_v2  ;;  %v3828_v33 = vmul.f32 %v6659_v54, %v6659_v54  ;;  %v6669_v30 = vadd.f32 %v3820_v58, %v3721_v24 }
 0xa14   : > { %5595 = vtanh.f32 %v3855_v35  ;;  %v3857_v8 = vmul.f32 0.7978846, %v3849_v53  ;;  %v3835_v9 = vmul.f32 %v3827_v3, %v6656_v5  ;;  %v3829_v17 = vmul.f32 %v6664_v10, %v6664_v10 }
 0xa15   : > { %5597 = vtanh.f32 %v3856_v12  ;;  %v3858_v31 = vmul.f32 0.7978846, %v3850_v6  ;;  %v3836_v44 = vmul.f32 %v3828_v33, %v6659_v54  ;;  %v3830_v45 = vmul.f32 %v6669_v30, %v6669_v30 }
 0xa16   : > { %5599 = vtanh.f32 %v3857_v8  ;;  %v3843_v56 = vmul.f32 0.044715, %v3835_v9  ;;  %v3837_v4 = vmul.f32 %v3829_v17, %v6664_v10  ;;  %v4818_v9 = vld [vmem:[%s1022_s29] ss:$0 sm:$0xff] }
 0xa17   : > { %5601 = vtanh.f32 %v3858_v31  ;;  %v3844_v49 = vmul.f32 0.044715, %v3836_v44  ;;  %v3838_v36 = vmul.f32 %v3830_v45, %v6669_v30 }
 0xa18   : > { %v3851_v20 = vadd.f32 %v3843_v56, %v6656_v5  ;;  %v3845_v32 = vmul.f32 0.044715, %v3837_v4 }
 0xa19   : > { %v3852_v41 = vadd.f32 %v3844_v49, %v6659_v54  ;;  %v3846_v25 = vmul.f32 0.044715, %v3838_v36 }
 0xa1a   : > { %v3859_v21 = vmul.f32 0.7978846, %v3851_v20  ;;  %v3853_v42 = vadd.f32 %v3845_v32, %v6664_v10 }
 0xa1b   : > { %v3860_v43 = vmul.f32 0.7978846, %v3852_v41  ;;  %v3854_v63 = vadd.f32 %v3846_v25, %v6669_v30 }
 0xa1c   : > { %5603 = vtanh.f32 %v3859_v21  ;;  %v3861_v48 = vmul.f32 0.7978846, %v3853_v42 }
 0xa1d   : > { %5605 = vtanh.f32 %v3860_v43  ;;  %v3862_v51 = vmul.f32 0.7978846, %v3854_v63 }
 0xa1e   : > { %v5596_v27 = vpop.eup %5595  ;;  %5607 = vtanh.f32 %v3861_v48 }
 0xa1f   : > { %v5598_v61 = vpop.eup %5597  ;;  %v3871_v23 = vadd.f32 1.0, %v5596_v27  ;;  %5609 = vtanh.f32 %v3862_v51 }
 0xa20   : > { %v5600_v24 = vpop.eup %5599  ;;  %v3872_v22 = vadd.f32 1.0, %v5598_v61 }
 0xa21   : > { %v5602_v26 = vpop.eup %5601  ;;  %v3879_v0 = vmul.f32 0.5, %v3871_v23  ;;  %v3873_v55 = vadd.f32 1.0, %v5600_v24 }
 0xa22   : > { %v3874_v60 = vadd.f32 1.0, %v5602_v26  ;;  %v3880_v28 = vmul.f32 0.5, %v3872_v22 }
 0xa23   : > { %v3881_v15 = vmul.f32 0.5, %v3873_v55  ;;  %v3887_v13 = vmul.f32 %v3879_v0, %v6635_v7 }
 0xa24   : > { %v3882_v16 = vmul.f32 0.5, %v3874_v60  ;;  %v3888_v14 = vmul.f32 %v3880_v28, %v6637_v57 }
 0xa25   : > { %v3889_v29 = vmul.f32 %v3881_v15, %v6641_v59 }
 0xa26   : > { %v5604_v19 = vpop.eup %5603  ;;  %v3890_v37 = vmul.f32 %v3882_v16, %v6645_v2 }
 0xa27   : > { %v5606_v40 = vpop.eup %5605  ;;  %v3895_v38 = vpack.c.bf16 %v3889_v29, %v3887_v13  ;;  %v3875_v46 = vadd.f32 1.0, %v5604_v19 }
 0xa28   : > { %v5608_v18 = vpop.eup %5607  ;;  %v3896_v11 = vpack.c.bf16 %v3890_v37, %v3888_v14  ;;  %v3876_v34 = vadd.f32 1.0, %v5606_v40 }
 0xa29   : > { %v5610_v39 = vpop.eup %5609  ;;  %v3877_v52 = vadd.f32 1.0, %v5608_v18  ;;  %v3883_v35 = vmul.f32 0.5, %v3875_v46 }
 0xa2a   : > { %4066 = vmatprep.mubr.bf16.mxu1 %v3896_v11  ;;  %v3878_v53 = vadd.f32 1.0, %v5610_v39  ;;  %v3884_v7 = vmul.f32 0.5, %v3876_v34 }
 0xa2b   : > { %4067 = vmatmul.mubr.bf16.vlgmr.msra.gmra.mrb[60].mxu1 %v3895_v38  ;;  %v3885_v59 = vmul.f32 0.5, %v3877_v52  ;;  %v3891_v57 = vmul.f32 %v3883_v35, %v6656_v5 }
 0xa2c   : > { %v3886_v3 = vmul.f32 0.5, %v3878_v53  ;;  %v3892_v58 = vmul.f32 %v3884_v7, %v6659_v54 }
 0xa2d   : > { %v3893_v2 = vmul.f32 %v3885_v59, %v6664_v10 }
 0xa2e   : > { %v3894_v12 = vmul.f32 %v3886_v3, %v6669_v30 }
 0xa2f   : > { %v3897_v6 = vpack.c.bf16 %v3893_v2, %v3891_v57  ;;  %v4835_v57 = vld [vmem:[%s1025_s14] ss:$0 sm:$0xff] }
 0xa30   : > { %v3898_v33 = vpack.c.bf16 %v3894_v12, %v3892_v58  ;;  %v4836_v12 = vld [vmem:[%s1028_s15] ss:$0 sm:$0xff]  ;;  %s6890_s15 = sld [smem:[#allocation11_spill]] }
 0xa32   : > { %4074 = vmatprep.mubr.bf16.mxu1 %v3898_v33 }
 0xa33   : > { %4075 = vmatmul.mubr.bf16.gmra.mrb[64].mxu1 %v3897_v6 }
 0xa36   : > { %p4837_p5 = scmp.ne.s32.totalorder %s6890_s15, 1 }
 0xa37   : > { %s6891_s3 = sld [smem:[#allocation24_spill]] (!%p4837_p5)  ;;  %s6892_s28 = sld [smem:[#allocation22_spill]] (!%p4837_p5) }
 0xa38   : > { %s6893_s29 = sld [smem:[#allocation23_spill]] (!%p4837_p5) }
 0xafe   : > { %v5010_v8 = vpop.f32.mrb[60].mxu1 }
 0xaff   : > { %v5011_v17 = vpop.f32.mrb[61].mxu1 }
 0xb00   : > { %v5012_v31 = vadd.f32 %v5011_v17, %v5010_v8  ;;  %v5013_v44 = vpop.f32.mrb[62].mxu1 }
 0xb01   : > { %v5014_v5 = vpop.f32.mrb[63].mxu1 }
 0xb02   : > { %v4069_v45 = vadd.f32 %v5012_v31, %v4818_v9  ;;  %v5015_v10 = vadd.f32 %v5014_v5, %v5013_v44 }
 0xb04   : > { %v4072_v56 = vadd.f32 %v5015_v10, %v4818_v9  ;;  %v4083_v54 = vadd.f32 %v4069_v45, %v6604_v47 }
 0xb06   : > { %v5016_v30 = vpop.f32.mrb[64].mxu1  ;;  %v4089_v4 = vsel %vm1358_vm3, %v4083_v54, 0.0  ;;  %v4084_v49 = vadd.f32 %v4072_v56, %v6606_v62 }
 0xb07   : > { %4090 = vadd.xlane.f32.xlu0 %v4089_v4  ;;  %v5017_v36 = vpop.f32.mrb[65].mxu1 }
 0xb08   : > { %v5018_v20 = vadd.f32 %v5017_v36, %v5016_v30  ;;  %v5019_v32 = vpop.f32.mrb[66].mxu1  ;;  %v4092_v41 = vsel %vm1358_vm3, %v4084_v49, 0.0 }
 0xb09   : > { %4093 = vadd.xlane.f32.xlu1 %v4092_v41  ;;  %v5020_v25 = vpop.f32.mrb[67].mxu1 }
 0xb0a   : > { %v4077_v21 = vadd.f32 %v5018_v20, %v4818_v9  ;;  %v5021_v42 = vadd.f32 %v5020_v25, %v5019_v32 }
 0xb0c   : > { %v4080_v43 = vadd.f32 %v5021_v42, %v4818_v9  ;;  %v4085_v63 = vadd.f32 %v4077_v21, %v6613_v1 }
 0xb0e   : > { %v4095_v47 = vsel %vm1358_vm3, %v4085_v63, 0.0  ;;  %v4086_v48 = vadd.f32 %v4080_v43, %v6611_v50 }
 0xb0f   : > { %4096 = vadd.xlane.f32.xlu0 %v4095_v47 }
 0xb10   : > { %v4098_v62 = vsel %vm1358_vm3, %v4086_v48, 0.0 }
 0xb11   : > { %4099 = vadd.xlane.f32.xlu1 %v4098_v62 }
 0xb94   : > { %v4091_v51 = vpop.xlane.xlu0 %4090 }
 0xb95   : > { %v4101_v27 = vmul.f32 0.015625, %v4091_v51 }
 0xb96   : > { %v4094_v61 = vpop.xlane.xlu1 %4093 }
 0xb97   : > { %v4105_v23 = vsub.f32 %v4083_v54, %v4101_v27  ;;  %v4102_v24 = vmul.f32 0.015625, %v4094_v61 }
 0xb99   : > { %v4106_v22 = vsub.f32 %v4084_v49, %v4102_v24  ;;  %v4109_v26 = vmul.f32 %v4105_v23, %v4105_v23 }
 0xb9b   : > { %v4113_v0 = vsel %vm1358_vm3, %v4109_v26, 0.0  ;;  %v4110_v55 = vmul.f32 %v4106_v22, %v4106_v22 }
 0xb9c   : > { %4114 = vadd.xlane.f32.xlu0 %v4113_v0  ;;  %v4097_v1 = vpop.xlane.xlu0 %4096 }
 0xb9d   : > { %v4103_v60 = vmul.f32 0.015625, %v4097_v1  ;;  %v4116_v28 = vsel %vm1358_vm3, %v4110_v55, 0.0 }
 0xb9e   : > { %4117 = vadd.xlane.f32.xlu1 %v4116_v28  ;;  %v4100_v50 = vpop.xlane.xlu1 %4099  ;;  %v5624_v28 = vld [vmem:[%s6891_s3 + $0x8] sm:$0xff] (!%p4837_p5)  }
 0xb9f   : > { %v4107_v15 = vsub.f32 %v4085_v63, %v4103_v60  ;;  %v4104_v16 = vmul.f32 0.015625, %v4100_v50  ;;  %v5623_v60 = vld [vmem:[%s6891_s3] sm:$0xff] (!%p4837_p5)   ;;  %v5625_v50 = vld [vmem:[%s6891_s3 + $0x10] sm:$0xff] (!%p4837_p5)  }
 0xba0   : > { %5330 = vmatprep.subr.bf16.mxu0 (!%p4837_p5), %v5623_v60 }
 0xba1   : > { %v4108_v13 = vsub.f32 %v4086_v48, %v4104_v16  ;;  %v4111_v29 = vmul.f32 %v4107_v15, %v4107_v15  ;;  %5331 = vmatpush3.bf16.msra.mxu0 (!%p4837_p5), %v5623_v60 }
 0xba2   : > { %5332 = vmatprep.subr.bf16.mxu0 (!%p4837_p5), %v5624_v28 }
 0xba3   : > { %v4119_v19 = vsel %vm1358_vm3, %v4111_v29, 0.0  ;;  %v4112_v14 = vmul.f32 %v4108_v13, %v4108_v13 }
 0xba4   : > { %4120 = vadd.xlane.f32.xlu0 %v4119_v19 }
 0xba5   : > { %v4122_v37 = vsel %vm1358_vm3, %v4112_v14, 0.0  ;;  %5333 = vmatpush3.bf16.msra.mxu0 (!%p4837_p5), %v5624_v28 }
 0xba6   : > { %4123 = vadd.xlane.f32.xlu1 %v4122_v37  ;;  %5334 = vmatprep.subr.bf16.mxu0 (!%p4837_p5), %v5625_v50 }
 0xba9   : > { %5335 = vmatpush3.bf16.msra.mxu0 (!%p4837_p5), %v5625_v50 }
 0xc29   : > { %v4115_v40 = vpop.xlane.xlu0 %4114 }
 0xc2a   : > { %v4125_v38 = vmul.f32 0.015625, %v4115_v40 }
 0xc2b   : > { %v4118_v46 = vpop.xlane.xlu1 %4117 }
 0xc2c   : > { %v4129_v18 = vadd.f32 1e-05, %v4125_v38  ;;  %v4126_v11 = vmul.f32 0.015625, %v4118_v46 }
 0xc2e   : > { %5611 = vrsqrt.f32 %v4129_v18  ;;  %v4130_v34 = vadd.f32 1e-05, %v4126_v11 }
 0xc30   : > { %5613 = vrsqrt.f32 %v4130_v34 }
 0xc31   : > { %v4121_v39 = vpop.xlane.xlu0 %4120 }
 0xc32   : > { %v4127_v52 = vmul.f32 0.015625, %v4121_v39 }
 0xc33   : > { %v4124_v35 = vpop.xlane.xlu1 %4123 }
 0xc34   : > { %v4131_v53 = vadd.f32 1e-05, %v4127_v52  ;;  %v4128_v7 = vmul.f32 0.015625, %v4124_v35  ;;  %v4838_v52 = vld [vmem:[%s6892_s28] ss:$0 sm:$0xff] (!%p4837_p5) }
 0xc36   : > { %5615 = vrsqrt.f32 %v4131_v53  ;;  %v4132_v59 = vadd.f32 1e-05, %v4128_v7  ;;  %v4839_v53 = vld [vmem:[%s6893_s29] ss:$0 sm:$0xff] (!%p4837_p5) }
 0xc38   : > { %v5612_v3 = vpop.eup %5611  ;;  %5617 = vrsqrt.f32 %v4132_v59 }
 0xc39   : > { %v4137_v2 = vmul.f32 %v5612_v3, %v4105_v23 }
 0xc3a   : > { %v5614_v58 = vpop.eup %5613 }
 0xc3b   : > { %v4147_v6 = vmul.f32 %v4835_v57, %v4137_v2  ;;  %v4138_v33 = vmul.f32 %v5614_v58, %v4106_v22 }
 0xc3d   : > { %v4157_v8 = vadd.f32 %v4836_v12, %v4147_v6  ;;  %v4148_v9 = vmul.f32 %v4835_v57, %v4138_v33 }
 0xc3f   : > { %4161 = vst.msk [vmem:[#allocation2] sm:$0xff] %vm1358_vm3, %v4157_v8  ;;  %v4158_v17 = vadd.f32 %v4836_v12, %v4148_v9  ;;  %v4171_v4 = vsel (!%p4837_p5), %vm1358_vm3, %v4157_v8, 0.0 }
 0xc40   : > { %v5616_v31 = vpop.eup %5615  ;;  %4172 = vadd.xlane.f32.xlu0 (!%p4837_p5), %v4171_v4 }
 0xc41   : > { %4162 = vst.msk [vmem:[#allocation2 + $0x8] sm:$0xff] %vm1358_vm3, %v4158_v17  ;;  %v4139_v44 = vmul.f32 %v5616_v31, %v4107_v15  ;;  %v4174_v36 = vsel (!%p4837_p5), %vm1358_vm3, %v4158_v17, 0.0  ;;  %v5626_v15 = vld [vmem:[%s6891_s3 + $0x18] sm:$0xff] (!%p4837_p5)  }
 0xc42   : > { %v5618_v5 = vpop.eup %5617  ;;  %5336 = vmatprep.subr.bf16.mxu0 (!%p4837_p5), %v5626_v15 }
 0xc43   : > { %v4149_v45 = vmul.f32 %v4835_v57, %v4139_v44  ;;  %v4140_v10 = vmul.f32 %v5618_v5, %v4108_v13  ;;  %4168 = sbr.rel (%p4837_p5) target bundleno = 3678 (0xe5e), region = 128  ;;  %5337 = vmatpush3.bf16.msra.mxu0 (!%p4837_p5), %v5626_v15 }
 0xc44   : > { %4175 = vadd.xlane.f32.xlu0 (!%p4837_p5), %v4174_v36 }
 0xc45   : > { %v4159_v56 = vadd.f32 %v4836_v12, %v4149_v45  ;;  %v4150_v54 = vmul.f32 %v4835_v57, %v4140_v10 }
 0xc47   : > { %4163 = vst.msk [vmem:[#allocation2 + $0x10] sm:$0xff] %vm1358_vm3, %v4159_v56  ;;  %v4160_v30 = vadd.f32 %v4836_v12, %v4150_v54  ;;  %v4177_v49 = vsel (!%p4837_p5), %vm1358_vm3, %v4159_v56, 0.0 }
 0xc48   : > { %4178 = vadd.xlane.f32.xlu1 (!%p4837_p5), %v4177_v49 }
 0xc49   : > { %4164 = vst.msk [vmem:[#allocation2 + $0x18] sm:$0xff] %vm1358_vm3, %v4160_v30  ;;  %v4180_v20 = vsel (!%p4837_p5), %vm1358_vm3, %v4160_v30, 0.0 }
 0xc4c   : > { %4181 = vadd.xlane.f32.xlu1 %v4180_v20 }
 0xccd   : > { %v4173_v32 = vpop.xlane.xlu0 %4172 }
 0xcce   : > { %v4183_v25 = vmul.f32 0.015625, %v4173_v32 }
 0xcd0   : > { %v4187_v42 = vsub.f32 %v4157_v8, %v4183_v25 }
 0xcd1   : > { %v4176_v63 = vpop.xlane.xlu0 %4175 }
 0xcd2   : > { %v4184_v48 = vmul.f32 0.015625, %v4176_v63  ;;  %v4191_v51 = vmul.f32 %v4187_v42, %v4187_v42 }
 0xcd4   : > { %v4188_v61 = vsub.f32 %v4158_v17, %v4184_v48  ;;  %v4195_v24 = vsel %vm1358_vm3, %v4191_v51, 0.0 }
 0xcd5   : > { %v4179_v41 = vpop.xlane.xlu1 %4178  ;;  %4196 = vadd.xlane.f32.xlu0 %v4195_v24 }
 0xcd6   : > { %v4185_v21 = vmul.f32 0.015625, %v4179_v41  ;;  %v4192_v26 = vmul.f32 %v4188_v61, %v4188_v61 }
 0xcd8   : > { %v4189_v43 = vsub.f32 %v4159_v56, %v4185_v21  ;;  %v4198_v55 = vsel %vm1358_vm3, %v4192_v26, 0.0 }
 0xcd9   : > { %v4182_v47 = vpop.xlane.xlu1 %4181  ;;  %4199 = vadd.xlane.f32.xlu1 %v4198_v55 }
 0xcda   : > { %v4186_v62 = vmul.f32 0.015625, %v4182_v47  ;;  %v4193_v27 = vmul.f32 %v4189_v43, %v4189_v43 }
 0xcdc   : > { %v4190_v23 = vsub.f32 %v4160_v30, %v4186_v62  ;;  %v4201_v22 = vsel %vm1358_vm3, %v4193_v27, 0.0 }
 0xcdd   : > { %4202 = vadd.xlane.f32.xlu0 %v4201_v22 }
 0xcde   : > { %v4194_v0 = vmul.f32 %v4190_v23, %v4190_v23 }
 0xce0   : > { %v4204_v1 = vsel %vm1358_vm3, %v4194_v0, 0.0 }
 0xce1   : > { %4205 = vadd.xlane.f32.xlu1 %v4204_v1 }
 0xd62   : > { %v4197_v16 = vpop.xlane.xlu0 %4196 }
 0xd63   : > { %v4207_v13 = vmul.f32 0.015625, %v4197_v16 }
 0xd65   : > { %v4211_v29 = vadd.f32 1e-05, %v4207_v13 }
 0xd66   : > { %v4200_v19 = vpop.xlane.xlu1 %4199 }
 0xd67   : > { %5627 = vrsqrt.f32 %v4211_v29  ;;  %v4208_v37 = vmul.f32 0.015625, %v4200_v19 }
 0xd69   : > { %v4212_v38 = vadd.f32 1e-05, %v4208_v37 }
 0xd6a   : > { %v4203_v14 = vpop.xlane.xlu0 %4202 }
 0xd6b   : > { %v4209_v40 = vmul.f32 0.015625, %v4203_v14  ;;  %5629 = vrsqrt.f32 %v4212_v38 }
 0xd6d   : > { %v4213_v46 = vadd.f32 1e-05, %v4209_v40 }
 0xd6e   : > { %v4206_v18 = vpop.xlane.xlu1 %4205 }
 0xd6f   : > { %v4210_v11 = vmul.f32 0.015625, %v4206_v18  ;;  %5631 = vrsqrt.f32 %v4213_v46 }
 0xd71   : > { %v4214_v34 = vadd.f32 1e-05, %v4210_v11  ;;  %v5628_v39 = vpop.eup %5627 }
 0xd72   : > { %v4219_v35 = vmul.f32 %v5628_v39, %v4187_v42 }
 0xd73   : > { %5633 = vrsqrt.f32 %v4214_v34 }
 0xd74   : > { %v4229_v7 = vmul.f32 %v4838_v52, %v4219_v35 }
 0xd75   : > { %v5630_v59 = vpop.eup %5629 }
 0xd76   : > { %v4220_v57 = vmul.f32 %v5630_v59, %v4188_v61  ;;  %v4239_v2 = vadd.f32 %v4839_v53, %v4229_v7 }
 0xd78   : > { %v4230_v12 = vmul.f32 %v4838_v52, %v4220_v57  ;;  %4243 = vst.msk [vmem:[#allocation4] sm:$0xff] %vm1358_vm3, %v4239_v2 }
 0xd79   : > { %v5632_v3 = vpop.eup %5631 }
 0xd7a   : > { %v4221_v58 = vmul.f32 %v5632_v3, %v4189_v43  ;;  %v4240_v8 = vadd.f32 %v4839_v53, %v4230_v12 }
 0xd7c   : > { %v4231_v33 = vmul.f32 %v4838_v52, %v4221_v58  ;;  %4244 = vst.msk [vmem:[#allocation4 + $0x8] sm:$0xff] %vm1358_vm3, %v4240_v8  ;;  %v4247_v31 = vpack.c.bf16 %v4240_v8, %v4239_v2 }
 0xd7d   : > { %v5634_v6 = vpop.eup %5633 }
 0xd7e   : > { %v4222_v9 = vmul.f32 %v5634_v6, %v4190_v23  ;;  %v4241_v17 = vadd.f32 %v4839_v53, %v4231_v33  ;;  %5338 = vmatprep.mubr.msk.bf16.mxu0 %vm1358_vm3, %v4247_v31 }
 0xd80   : > { %v4232_v44 = vmul.f32 %v4838_v52, %v4222_v9  ;;  %4245 = vst.msk [vmem:[#allocation4 + $0x10] sm:$0xff] %vm1358_vm3, %v4241_v17 }
 0xd82   : > { %v4242_v5 = vadd.f32 %v4839_v53, %v4232_v44 }
 0xd84   : > { %4246 = vst.msk [vmem:[#allocation4 + $0x18] sm:$0xff] %vm1358_vm3, %v4242_v5  ;;  %v4248_v45 = vpack.c.bf16 %v4242_v5, %v4241_v17 }
 0xd86   : > { %5339 = vmatmul.mubr.msk.bf16.vlgmr.msra.gmra.mrb[0].mxu0 %vm1358_vm3, %v4248_v45 }
 0xe59   : > { %v5340_v10 = vpop.f32.mrb[0].mxu0 }
 0xe5a   : > { %4338 = vst [vmem:[#allocation6 + $0x10] sm:$0xff] %v5340_v10  ;;  %v4321_v56 = vpop.f32.mrb[1].mxu0 }
 0xe5b   : > { %4336 = vst [vmem:[#allocation6] sm:$0xff] %v4321_v56  ;;  %v5341_v54 = vpop.f32.mrb[2].mxu0 }
 0xe5c   : > { %4339 = vst [vmem:[#allocation6 + $0x18] sm:$0xff] %v5341_v54  ;;  %v4324_v30 = vpop.f32.mrb[3].mxu0 }
 0xe5d   : > { %4337 = vst [vmem:[#allocation6 + $0x8] sm:$0xff] %v4324_v30 }
 0xe5e PF: > { %s6894_s4 = sld [smem:[#allocation11_spill]]  ;;  %s5710_s9 = smov [#allocation4]  }
 0xe5f   : > { %s4346_s0 = sshll.u32 %s5710_s9, 4  ;;  %s4347_s0 = int_to_ptr.vmem [resolvable:$true] %s4346_s0 }
 0xe60   : > { %s5635_s15 = scalar_lea.vmem %s4347_s0, 512  ;;  %p5642_p10 = scmp.lt.s32.totalorder %s4347_s0, %s4347_s0 }
 0xe61   : > { %p5636_p7 = scmp.ne.s32.totalorder %s4347_s0, %s5635_s15  ;;  %p5643_p11 = scmp.lt.s32.totalorder %s5635_s15, %s5635_s15 }
 0xe63   : > { %p5644_p12 = por %p5643_p11, %p5642_p10 }
 0xe64   : > { %p5410_p6 = scmp.eq.s32.totalorder %s6894_s4, 1 }
 0xe66   : > { %p5637_p8 = pnand %p5636_p7, %p5410_p6 }
 0xe68   : > { %p5638_p9 = pneg %p5637_p8 }
 0xe6a   : > { %p5645_p13 = pnand %p5644_p12, %p5638_p9 }
 0xe6c   : > { %5648 = shalt.err (!%p5645_p13)
}
 0xe6d   : > { %s6895_s13 = sld [smem:[#allocation32_spill]] }
 0xe73   : > { %s5649_s26 = scalar_lea.hbm %s6895_s13, 512 }
 0xe74   : > { %p5650_p0 = scmp.ne.s32.totalorder %s6895_s13, %s5649_s26  ;;  %p5655_p3 = scmp.lt.u32.totalorder %s5649_s26, %s6895_s13 }
 0xe76   : > { %p5651_p1 = pnand %p5650_p0, %p5410_p6 }
 0xe78   : > { %p5652_p2 = pneg %p5651_p1 }
 0xe7a   : > { %p5657_p4 = pnand %p5655_p3, %p5652_p2 }
 0xe7c   : > { %5660 = shalt.err (!%p5657_p4)
}
 0xe7d   : > { %s5711_s1 = smov 128   ;;  %s5712_s6 = smov 8  }
 0xe7e   : > { %5403 = dma.vmem_to_hbm [thread:$0]  (%p5410_p6), %s4347_s0, 512, %s6895_s13, [#allocation5], %s5711_s1, %s5711_s1, %s5712_s6  }
 0xe7f   : > { %s5713_s12 = smov [#allocation6]  }
 0xe80   : > { %s4359_s29 = sshll.u32 %s5713_s12, 4  ;;  %s4360_s29 = int_to_ptr.vmem [resolvable:$true] %s4359_s29 }
 0xe81   : > { %s5661_s9 = scalar_lea.vmem %s4360_s29, 512  ;;  %p5668_p9 = scmp.lt.s32.totalorder %s4360_s29, %s4360_s29 }
 0xe82   : > { %p5662_p5 = scmp.ne.s32.totalorder %s4360_s29, %s5661_s9  ;;  %p5669_p10 = scmp.lt.s32.totalorder %s5661_s9, %s5661_s9 }
 0xe84   : > { %p5663_p7 = pnand %p5662_p5, %p5410_p6  ;;  %p5670_p11 = por %p5669_p10, %p5668_p9 }
 0xe86   : > { %p5664_p8 = pneg %p5663_p7 }
 0xe88   : > { %p5671_p12 = pnand %p5670_p11, %p5664_p8 }
 0xe8a   : > { %5674 = shalt.err (!%p5671_p12)
}
 0xe8b   : > { %s6896_s14 = sld [smem:[#allocation33_spill]] }
 0xe91   : > { %s5675_s26 = scalar_lea.hbm %s6896_s14, 512 }
 0xe92   : > { %p5676_p13 = scmp.ne.s32.totalorder %s6896_s14, %s5675_s26  ;;  %p5681_p2 = scmp.lt.u32.totalorder %s5675_s26, %s6896_s14 }
 0xe94   : > { %p5677_p0 = pnand %p5676_p13, %p5410_p6 }
 0xe96   : > { %p5678_p1 = pneg %p5677_p0 }
 0xe98   : > { %p5683_p3 = pnand %p5681_p2, %p5678_p1 }
 0xe9a   : > { %5686 = shalt.err (!%p5683_p3)
}
 0xe9b   : > { %5405 = dma.vmem_to_hbm [thread:$0]  (%p5410_p6), %s4360_s29, 512, %s6896_s14, [#allocation7], %s5711_s1, %s5711_s1, %s5712_s6  }
 0xe9c   : > { %5692 = dma.done.wait (%p5410_p6), [#allocation5], 512  }
 0xe9d   : > { %5694 = vsyncadd (%p5410_p6), [#allocation5], 4294966784 }
 0xe9e   : > { %5696 = dma.done.wait (%p5410_p6), [#allocation7], 512  }
 0xe9f   : > { %5698 = vsyncadd (%p5410_p6), [#allocation7], 4294966784 }
 0xea0 PF: > { %s6897_s27 = sld [smem:[#allocation10_spill]] }
 0xea6   : > { %s39_s27 = sadd.s32 1, %s6897_s27  }
 0xea7   : > { %p36_p4 = scmp.ge.s32.totalorder %s39_s27, 4  }
 0xea9   :  { %38 = sbr.rel (!%p36_p4) target bundleno = 21 (0x15), region = 229 }
 0xeb0   :  { %4379 = vsyncpa [#allocation5], 1 }
 0xeb1   :  { %4381 = vsyncpa [#allocation5 + $0x1], 1 }
 0xeb2   :  { %4382 = vsyncpa [#allocation7], 1 }

</bundles_post_ra>
